<compile_context>
chip_gen: v6e
topology: v6e:2x2x1
jax: 0.10.0
libtpu: 0.0.40
codegen_flags: <defaults>
</compile_context>

<pallas_src>
import jax
import jax.numpy as jnp
from jax import lax
from jax.experimental import pallas as pl
from jax.experimental.pallas import tpu as pltpu

KSIZE = 5   # 5x5 kernel, stride 1, no padding, conv bias disabled (separate param)
CIN = 2     # forward slices exactly channels 0 and 1

_UNROLL_BATCH = 4   # fully unroll the in-block image loop up to this many images


def _fused_conv_kernel(w_ref, b_ref, x_ref, o_ref):
    # w_ref: SMEM (C*CIN*KSIZE*KSIZE,) flattened stacked weights, index
    #        layout ((c*CIN + ci)*KSIZE + i)*KSIZE + j
    # b_ref: SMEM (C,) per-output-channel bias
    # x_ref: VMEM (Bt, CIN, H, W)   one batch chunk
    # o_ref: VMEM (Bt, C, OH, OW)   one batch chunk, NCHW
    bt, cin, H, W = x_ref.shape
    _, C, OH, OW = o_ref.shape

    # Hoist all scalar-path work out of the per-image loop: 200 SMEM scalar
    # loads + C bias broadcasts happen once per grid step, not once per image.
    w = [w_ref[idx] for idx in range(C * cin * KSIZE * KSIZE)]
    bias_tile = [jnp.full((OH, OW), b_ref[c], dtype=jnp.float32) for c in range(C)]

    def one_image(b):
        # One accumulator per output channel, initialized with its bias tile.
        accs = [bias_tile[c] for c in range(C)]
        for ci in range(cin):
            for i in range(KSIZE):
                for j in range(KSIZE):
                    # Ref-level static slice: shifted (OH, OW) window comes in
                    # through the vld slots; no post-load XLU shuffle of a
                    # loaded (H, W) value.
                    sh = x_ref[b, ci, i:i + OH, j:j + OW]
                    for c in range(C):
                        widx = ((c * cin + ci) * KSIZE + i) * KSIZE + j
                        accs[c] = accs[c] + w[widx] * sh
        for c in range(C):
            o_ref[b, c] = accs[c].astype(o_ref.dtype)

    if bt <= _UNROLL_BATCH:
        # Small chunks (the demo path): static indices everywhere, fully unrolled.
        for b in range(bt):
            one_image(b)
    else:
        # Large batch chunks: scf.for over the images with a dynamic index.
        @pl.loop(0, bt)
        def _(b):
            one_image(b)


@jax.jit
def custom_conv_forward(x, w1, w2, bias):
    """x: (B, 2, H, W) f32; w1, w2: (C, 1, 5, 5); bias: (1, C, 1, 1). Returns NCHW."""
    B, cin, H, W = x.shape
    assert cin == CIN, "CustomConv forward slices channel 0 and channel 1"
    C = w1.shape[0]
    OH, OW = H - KSIZE + 1, W - KSIZE + 1

    # Stack the two 1-in-channel weights along the input-channel axis and flatten.
    # Index layout matches the kernel: [c, ci, i, j] row-major.
    w_flat = jnp.concatenate([w1, w2], axis=1).reshape(-1)   # (C*CIN*25,)
    b_flat = bias.reshape(-1)                                # (C,)

    # ---- batch tiling -------------------------------------------------------
    # Per-grid-step overhead is ~0.35 us and tiny per-image DMAs waste HBM BW,
    # so chunk the batch into few, large blocks.  Keep >= 2 grid steps whenever
    # B >= 2 so v7x's two TensorCores each get a chunk; cap the chunk so the
    # double-buffered (input + output) blocks stay far under v7x's 64 MiB VMEM.
    itemsize = jnp.dtype(x.dtype).itemsize
    per_image_bytes = (CIN * H * W + C * OH * OW) * itemsize
    vmem_budget = 16 * 1024 * 1024
    max_bt = max(1, vmem_budget // (2 * per_image_bytes))   # 2x for double-buffering
    n_steps = 2 if B >= 2 else 1
    bt = min(max(1, pl.cdiv(B, n_steps)), max_bt)
    n_blocks = pl.cdiv(B, bt)
    B_pad = n_blocks * bt
    xp = x if B_pad == B else jnp.pad(x, ((0, B_pad - B), (0, 0), (0, 0), (0, 0)))

    flops = 2 * B * C * OH * OW * CIN * KSIZE * KSIZE
    bytes_accessed = (x.size + w_flat.size + b_flat.size + B * C * OH * OW) * itemsize

    out = pl.pallas_call(
        _fused_conv_kernel,
        out_shape=jax.ShapeDtypeStruct((B_pad, C, OH, OW), x.dtype),
        grid=(n_blocks,),
        in_specs=[
            pl.BlockSpec(memory_space=pltpu.MemorySpace.SMEM),        # weights (scalars)
            pl.BlockSpec(memory_space=pltpu.MemorySpace.SMEM),        # bias (scalars)
            pl.BlockSpec((bt, CIN, H, W), lambda s: (s, 0, 0, 0)),    # one batch chunk
        ],
        out_specs=pl.BlockSpec((bt, C, OH, OW), lambda s: (s, 0, 0, 0)),
        compiler_params=pltpu.CompilerParams(
            dimension_semantics=("parallel",),          # batch chunks: megacore-splittable
            vmem_limit_bytes=32 * 1024 * 1024,          # raise vs v5e default; v7x-safe
        ),
        cost_estimate=pl.CostEstimate(
            flops=flops, transcendentals=0, bytes_accessed=bytes_accessed,
        ),
    )(w_flat, b_flat, xp)
    return out[:B] if B_pad != B else out


if __name__ == "__main__":
    key = jax.random.PRNGKey(0)
    kx, k1, k2 = jax.random.split(key, 3)

    B, H, W = 2, 16, 16
    channels = 4

    x = jax.random.normal(kx, (B, CIN, H, W), dtype=jnp.float32)
    # Deterministic param init (shapes from nn.Conv2d(1, channels, 5, bias=False))
    w1 = jax.random.normal(k1, (channels, 1, KSIZE, KSIZE), dtype=jnp.float32) * 0.1
    w2 = jax.random.normal(k2, (channels, 1, KSIZE, KSIZE), dtype=jnp.float32) * 0.1
    bias = jnp.zeros((1, channels, 1, 1), dtype=jnp.float32)  # matches torch.zeros init

    out = jax.block_until_ready(custom_conv_forward(x, w1, w2, bias))

    # Independent reference: two separate 1-channel convs + bias (mirrors PyTorch forward)
    dn = lax.conv_dimension_numbers(x[:, :1].shape, w1.shape, ("NCHW", "OIHW", "NCHW"))
    ref1 = lax.conv_general_dilated(x[:, :1], w1, (1, 1), "VALID", dimension_numbers=dn)
    ref2 = lax.conv_general_dilated(x[:, 1:], w2, (1, 1), "VALID", dimension_numbers=dn)
    ref = ref1 + ref2 + bias

    assert out.shape == (B, channels, H - 4, W - 4), out.shape
    err = float(jnp.max(jnp.abs(out - ref)))
    assert jnp.allclose(out, ref, atol=1e-4, rtol=1e-4), err

    print("KERNEL_OK")
</pallas_src>

<mosaic_0001>
module attributes {stable_mosaic.version = 11 : i64} {
  func.func @_fused_conv_kernel(%arg0: i32, %arg1: memref<200xf32, #tpu.memory_space<smem>>, %arg2: memref<4xf32, #tpu.memory_space<smem>>, %arg3: memref<1x2x16x16xf32, #tpu.memory_space<vmem>>, %arg4: memref<1x4x12x12xf32, #tpu.memory_space<vmem>>) attributes {dimension_semantics = [#tpu.dimension_semantics<parallel>], iteration_bounds = array<i64: 2>, scalar_prefetch = 0 : i64, scratch_operands = 0 : i64, tpu.core_type = #tpu.core_type<tc>, window_params = [{transform_indices = @transform_0, window_bounds = array<i64: 200>}, {transform_indices = @transform_1, window_bounds = array<i64: 4>}, {transform_indices = @transform_2, window_bounds = array<i64: 1, 2, 16, 16>}, {transform_indices = @transform_3, window_bounds = array<i64: 1, 4, 12, 12>}]} {
    %c0 = arith.constant 0 : index
    %0 = memref.load %arg1[%c0] : memref<200xf32, #tpu.memory_space<smem>>
    %c1 = arith.constant 1 : index
    %1 = memref.load %arg1[%c1] : memref<200xf32, #tpu.memory_space<smem>>
    %c2 = arith.constant 2 : index
    %2 = memref.load %arg1[%c2] : memref<200xf32, #tpu.memory_space<smem>>
    %c3 = arith.constant 3 : index
    %3 = memref.load %arg1[%c3] : memref<200xf32, #tpu.memory_space<smem>>
    %c4 = arith.constant 4 : index
    %4 = memref.load %arg1[%c4] : memref<200xf32, #tpu.memory_space<smem>>
    %c5 = arith.constant 5 : index
    %5 = memref.load %arg1[%c5] : memref<200xf32, #tpu.memory_space<smem>>
    %c6 = arith.constant 6 : index
    %6 = memref.load %arg1[%c6] : memref<200xf32, #tpu.memory_space<smem>>
    %c7 = arith.constant 7 : index
    %7 = memref.load %arg1[%c7] : memref<200xf32, #tpu.memory_space<smem>>
    %c8 = arith.constant 8 : index
    %8 = memref.load %arg1[%c8] : memref<200xf32, #tpu.memory_space<smem>>
    %c9 = arith.constant 9 : index
    %9 = memref.load %arg1[%c9] : memref<200xf32, #tpu.memory_space<smem>>
    %c10 = arith.constant 10 : index
    %10 = memref.load %arg1[%c10] : memref<200xf32, #tpu.memory_space<smem>>
    %c11 = arith.constant 11 : index
    %11 = memref.load %arg1[%c11] : memref<200xf32, #tpu.memory_space<smem>>
    %c12 = arith.constant 12 : index
    %12 = memref.load %arg1[%c12] : memref<200xf32, #tpu.memory_space<smem>>
    %c13 = arith.constant 13 : index
    %13 = memref.load %arg1[%c13] : memref<200xf32, #tpu.memory_space<smem>>
    %c14 = arith.constant 14 : index
    %14 = memref.load %arg1[%c14] : memref<200xf32, #tpu.memory_space<smem>>
    %c15 = arith.constant 15 : index
    %15 = memref.load %arg1[%c15] : memref<200xf32, #tpu.memory_space<smem>>
    %c16 = arith.constant 16 : index
    %16 = memref.load %arg1[%c16] : memref<200xf32, #tpu.memory_space<smem>>
    %c17 = arith.constant 17 : index
    %17 = memref.load %arg1[%c17] : memref<200xf32, #tpu.memory_space<smem>>
    %c18 = arith.constant 18 : index
    %18 = memref.load %arg1[%c18] : memref<200xf32, #tpu.memory_space<smem>>
    %c19 = arith.constant 19 : index
    %19 = memref.load %arg1[%c19] : memref<200xf32, #tpu.memory_space<smem>>
    %c20 = arith.constant 20 : index
    %20 = memref.load %arg1[%c20] : memref<200xf32, #tpu.memory_space<smem>>
    %c21 = arith.constant 21 : index
    %21 = memref.load %arg1[%c21] : memref<200xf32, #tpu.memory_space<smem>>
    %c22 = arith.constant 22 : index
    %22 = memref.load %arg1[%c22] : memref<200xf32, #tpu.memory_space<smem>>
    %c23 = arith.constant 23 : index
    %23 = memref.load %arg1[%c23] : memref<200xf32, #tpu.memory_space<smem>>
    %c24 = arith.constant 24 : index
    %24 = memref.load %arg1[%c24] : memref<200xf32, #tpu.memory_space<smem>>
    %c25 = arith.constant 25 : index
    %25 = memref.load %arg1[%c25] : memref<200xf32, #tpu.memory_space<smem>>
    %c26 = arith.constant 26 : index
    %26 = memref.load %arg1[%c26] : memref<200xf32, #tpu.memory_space<smem>>
    %c27 = arith.constant 27 : index
    %27 = memref.load %arg1[%c27] : memref<200xf32, #tpu.memory_space<smem>>
    %c28 = arith.constant 28 : index
    %28 = memref.load %arg1[%c28] : memref<200xf32, #tpu.memory_space<smem>>
    %c29 = arith.constant 29 : index
    %29 = memref.load %arg1[%c29] : memref<200xf32, #tpu.memory_space<smem>>
    %c30 = arith.constant 30 : index
    %30 = memref.load %arg1[%c30] : memref<200xf32, #tpu.memory_space<smem>>
    %c31 = arith.constant 31 : index
    %31 = memref.load %arg1[%c31] : memref<200xf32, #tpu.memory_space<smem>>
    %c32 = arith.constant 32 : index
    %32 = memref.load %arg1[%c32] : memref<200xf32, #tpu.memory_space<smem>>
    %c33 = arith.constant 33 : index
    %33 = memref.load %arg1[%c33] : memref<200xf32, #tpu.memory_space<smem>>
    %c34 = arith.constant 34 : index
    %34 = memref.load %arg1[%c34] : memref<200xf32, #tpu.memory_space<smem>>
    %c35 = arith.constant 35 : index
    %35 = memref.load %arg1[%c35] : memref<200xf32, #tpu.memory_space<smem>>
    %c36 = arith.constant 36 : index
    %36 = memref.load %arg1[%c36] : memref<200xf32, #tpu.memory_space<smem>>
    %c37 = arith.constant 37 : index
    %37 = memref.load %arg1[%c37] : memref<200xf32, #tpu.memory_space<smem>>
    %c38 = arith.constant 38 : index
    %38 = memref.load %arg1[%c38] : memref<200xf32, #tpu.memory_space<smem>>
    %c39 = arith.constant 39 : index
    %39 = memref.load %arg1[%c39] : memref<200xf32, #tpu.memory_space<smem>>
    %c40 = arith.constant 40 : index
    %40 = memref.load %arg1[%c40] : memref<200xf32, #tpu.memory_space<smem>>
    %c41 = arith.constant 41 : index
    %41 = memref.load %arg1[%c41] : memref<200xf32, #tpu.memory_space<smem>>
    %c42 = arith.constant 42 : index
    %42 = memref.load %arg1[%c42] : memref<200xf32, #tpu.memory_space<smem>>
    %c43 = arith.constant 43 : index
    %43 = memref.load %arg1[%c43] : memref<200xf32, #tpu.memory_space<smem>>
    %c44 = arith.constant 44 : index
    %44 = memref.load %arg1[%c44] : memref<200xf32, #tpu.memory_space<smem>>
    %c45 = arith.constant 45 : index
    %45 = memref.load %arg1[%c45] : memref<200xf32, #tpu.memory_space<smem>>
    %c46 = arith.constant 46 : index
    %46 = memref.load %arg1[%c46] : memref<200xf32, #tpu.memory_space<smem>>
    %c47 = arith.constant 47 : index
    %47 = memref.load %arg1[%c47] : memref<200xf32, #tpu.memory_space<smem>>
    %c48 = arith.constant 48 : index
    %48 = memref.load %arg1[%c48] : memref<200xf32, #tpu.memory_space<smem>>
    %c49 = arith.constant 49 : index
    %49 = memref.load %arg1[%c49] : memref<200xf32, #tpu.memory_space<smem>>
    %c50 = arith.constant 50 : index
    %50 = memref.load %arg1[%c50] : memref<200xf32, #tpu.memory_space<smem>>
    %c51 = arith.constant 51 : index
    %51 = memref.load %arg1[%c51] : memref<200xf32, #tpu.memory_space<smem>>
    %c52 = arith.constant 52 : index
    %52 = memref.load %arg1[%c52] : memref<200xf32, #tpu.memory_space<smem>>
    %c53 = arith.constant 53 : index
    %53 = memref.load %arg1[%c53] : memref<200xf32, #tpu.memory_space<smem>>
    %c54 = arith.constant 54 : index
    %54 = memref.load %arg1[%c54] : memref<200xf32, #tpu.memory_space<smem>>
    %c55 = arith.constant 55 : index
    %55 = memref.load %arg1[%c55] : memref<200xf32, #tpu.memory_space<smem>>
    %c56 = arith.constant 56 : index
    %56 = memref.load %arg1[%c56] : memref<200xf32, #tpu.memory_space<smem>>
    %c57 = arith.constant 57 : index
    %57 = memref.load %arg1[%c57] : memref<200xf32, #tpu.memory_space<smem>>
    %c58 = arith.constant 58 : index
    %58 = memref.load %arg1[%c58] : memref<200xf32, #tpu.memory_space<smem>>
    %c59 = arith.constant 59 : index
    %59 = memref.load %arg1[%c59] : memref<200xf32, #tpu.memory_space<smem>>
    %c60 = arith.constant 60 : index
    %60 = memref.load %arg1[%c60] : memref<200xf32, #tpu.memory_space<smem>>
    %c61 = arith.constant 61 : index
    %61 = memref.load %arg1[%c61] : memref<200xf32, #tpu.memory_space<smem>>
    %c62 = arith.constant 62 : index
    %62 = memref.load %arg1[%c62] : memref<200xf32, #tpu.memory_space<smem>>
    %c63 = arith.constant 63 : index
    %63 = memref.load %arg1[%c63] : memref<200xf32, #tpu.memory_space<smem>>
    %c64 = arith.constant 64 : index
    %64 = memref.load %arg1[%c64] : memref<200xf32, #tpu.memory_space<smem>>
    %c65 = arith.constant 65 : index
    %65 = memref.load %arg1[%c65] : memref<200xf32, #tpu.memory_space<smem>>
    %c66 = arith.constant 66 : index
    %66 = memref.load %arg1[%c66] : memref<200xf32, #tpu.memory_space<smem>>
    %c67 = arith.constant 67 : index
    %67 = memref.load %arg1[%c67] : memref<200xf32, #tpu.memory_space<smem>>
    %c68 = arith.constant 68 : index
    %68 = memref.load %arg1[%c68] : memref<200xf32, #tpu.memory_space<smem>>
    %c69 = arith.constant 69 : index
    %69 = memref.load %arg1[%c69] : memref<200xf32, #tpu.memory_space<smem>>
    %c70 = arith.constant 70 : index
    %70 = memref.load %arg1[%c70] : memref<200xf32, #tpu.memory_space<smem>>
    %c71 = arith.constant 71 : index
    %71 = memref.load %arg1[%c71] : memref<200xf32, #tpu.memory_space<smem>>
    %c72 = arith.constant 72 : index
    %72 = memref.load %arg1[%c72] : memref<200xf32, #tpu.memory_space<smem>>
    %c73 = arith.constant 73 : index
    %73 = memref.load %arg1[%c73] : memref<200xf32, #tpu.memory_space<smem>>
    %c74 = arith.constant 74 : index
    %74 = memref.load %arg1[%c74] : memref<200xf32, #tpu.memory_space<smem>>
    %c75 = arith.constant 75 : index
    %75 = memref.load %arg1[%c75] : memref<200xf32, #tpu.memory_space<smem>>
    %c76 = arith.constant 76 : index
    %76 = memref.load %arg1[%c76] : memref<200xf32, #tpu.memory_space<smem>>
    %c77 = arith.constant 77 : index
    %77 = memref.load %arg1[%c77] : memref<200xf32, #tpu.memory_space<smem>>
    %c78 = arith.constant 78 : index
    %78 = memref.load %arg1[%c78] : memref<200xf32, #tpu.memory_space<smem>>
    %c79 = arith.constant 79 : index
    %79 = memref.load %arg1[%c79] : memref<200xf32, #tpu.memory_space<smem>>
    %c80 = arith.constant 80 : index
    %80 = memref.load %arg1[%c80] : memref<200xf32, #tpu.memory_space<smem>>
    %c81 = arith.constant 81 : index
    %81 = memref.load %arg1[%c81] : memref<200xf32, #tpu.memory_space<smem>>
    %c82 = arith.constant 82 : index
    %82 = memref.load %arg1[%c82] : memref<200xf32, #tpu.memory_space<smem>>
    %c83 = arith.constant 83 : index
    %83 = memref.load %arg1[%c83] : memref<200xf32, #tpu.memory_space<smem>>
    %c84 = arith.constant 84 : index
    %84 = memref.load %arg1[%c84] : memref<200xf32, #tpu.memory_space<smem>>
    %c85 = arith.constant 85 : index
    %85 = memref.load %arg1[%c85] : memref<200xf32, #tpu.memory_space<smem>>
    %c86 = arith.constant 86 : index
    %86 = memref.load %arg1[%c86] : memref<200xf32, #tpu.memory_space<smem>>
    %c87 = arith.constant 87 : index
    %87 = memref.load %arg1[%c87] : memref<200xf32, #tpu.memory_space<smem>>
    %c88 = arith.constant 88 : index
    %88 = memref.load %arg1[%c88] : memref<200xf32, #tpu.memory_space<smem>>
    %c89 = arith.constant 89 : index
    %89 = memref.load %arg1[%c89] : memref<200xf32, #tpu.memory_space<smem>>
    %c90 = arith.constant 90 : index
    %90 = memref.load %arg1[%c90] : memref<200xf32, #tpu.memory_space<smem>>
    %c91 = arith.constant 91 : index
    %91 = memref.load %arg1[%c91] : memref<200xf32, #tpu.memory_space<smem>>
    %c92 = arith.constant 92 : index
    %92 = memref.load %arg1[%c92] : memref<200xf32, #tpu.memory_space<smem>>
    %c93 = arith.constant 93 : index
    %93 = memref.load %arg1[%c93] : memref<200xf32, #tpu.memory_space<smem>>
    %c94 = arith.constant 94 : index
    %94 = memref.load %arg1[%c94] : memref<200xf32, #tpu.memory_space<smem>>
    %c95 = arith.constant 95 : index
    %95 = memref.load %arg1[%c95] : memref<200xf32, #tpu.memory_space<smem>>
    %c96 = arith.constant 96 : index
    %96 = memref.load %arg1[%c96] : memref<200xf32, #tpu.memory_space<smem>>
    %c97 = arith.constant 97 : index
    %97 = memref.load %arg1[%c97] : memref<200xf32, #tpu.memory_space<smem>>
    %c98 = arith.constant 98 : index
    %98 = memref.load %arg1[%c98] : memref<200xf32, #tpu.memory_space<smem>>
    %c99 = arith.constant 99 : index
    %99 = memref.load %arg1[%c99] : memref<200xf32, #tpu.memory_space<smem>>
    %c100 = arith.constant 100 : index
    %100 = memref.load %arg1[%c100] : memref<200xf32, #tpu.memory_space<smem>>
    %c101 = arith.constant 101 : index
    %101 = memref.load %arg1[%c101] : memref<200xf32, #tpu.memory_space<smem>>
    %c102 = arith.constant 102 : index
    %102 = memref.load %arg1[%c102] : memref<200xf32, #tpu.memory_space<smem>>
    %c103 = arith.constant 103 : index
    %103 = memref.load %arg1[%c103] : memref<200xf32, #tpu.memory_space<smem>>
    %c104 = arith.constant 104 : index
    %104 = memref.load %arg1[%c104] : memref<200xf32, #tpu.memory_space<smem>>
    %c105 = arith.constant 105 : index
    %105 = memref.load %arg1[%c105] : memref<200xf32, #tpu.memory_space<smem>>
    %c106 = arith.constant 106 : index
    %106 = memref.load %arg1[%c106] : memref<200xf32, #tpu.memory_space<smem>>
    %c107 = arith.constant 107 : index
    %107 = memref.load %arg1[%c107] : memref<200xf32, #tpu.memory_space<smem>>
    %c108 = arith.constant 108 : index
    %108 = memref.load %arg1[%c108] : memref<200xf32, #tpu.memory_space<smem>>
    %c109 = arith.constant 109 : index
    %109 = memref.load %arg1[%c109] : memref<200xf32, #tpu.memory_space<smem>>
    %c110 = arith.constant 110 : index
    %110 = memref.load %arg1[%c110] : memref<200xf32, #tpu.memory_space<smem>>
    %c111 = arith.constant 111 : index
    %111 = memref.load %arg1[%c111] : memref<200xf32, #tpu.memory_space<smem>>
    %c112 = arith.constant 112 : index
    %112 = memref.load %arg1[%c112] : memref<200xf32, #tpu.memory_space<smem>>
    %c113 = arith.constant 113 : index
    %113 = memref.load %arg1[%c113] : memref<200xf32, #tpu.memory_space<smem>>
    %c114 = arith.constant 114 : index
    %114 = memref.load %arg1[%c114] : memref<200xf32, #tpu.memory_space<smem>>
    %c115 = arith.constant 115 : index
    %115 = memref.load %arg1[%c115] : memref<200xf32, #tpu.memory_space<smem>>
    %c116 = arith.constant 116 : index
    %116 = memref.load %arg1[%c116] : memref<200xf32, #tpu.memory_space<smem>>
    %c117 = arith.constant 117 : index
    %117 = memref.load %arg1[%c117] : memref<200xf32, #tpu.memory_space<smem>>
    %c118 = arith.constant 118 : index
    %118 = memref.load %arg1[%c118] : memref<200xf32, #tpu.memory_space<smem>>
    %c119 = arith.constant 119 : index
    %119 = memref.load %arg1[%c119] : memref<200xf32, #tpu.memory_space<smem>>
    %c120 = arith.constant 120 : index
    %120 = memref.load %arg1[%c120] : memref<200xf32, #tpu.memory_space<smem>>
    %c121 = arith.constant 121 : index
    %121 = memref.load %arg1[%c121] : memref<200xf32, #tpu.memory_space<smem>>
    %c122 = arith.constant 122 : index
    %122 = memref.load %arg1[%c122] : memref<200xf32, #tpu.memory_space<smem>>
    %c123 = arith.constant 123 : index
    %123 = memref.load %arg1[%c123] : memref<200xf32, #tpu.memory_space<smem>>
    %c124 = arith.constant 124 : index
    %124 = memref.load %arg1[%c124] : memref<200xf32, #tpu.memory_space<smem>>
    %c125 = arith.constant 125 : index
    %125 = memref.load %arg1[%c125] : memref<200xf32, #tpu.memory_space<smem>>
    %c126 = arith.constant 126 : index
    %126 = memref.load %arg1[%c126] : memref<200xf32, #tpu.memory_space<smem>>
    %c127 = arith.constant 127 : index
    %127 = memref.load %arg1[%c127] : memref<200xf32, #tpu.memory_space<smem>>
    %c128 = arith.constant 128 : index
    %128 = memref.load %arg1[%c128] : memref<200xf32, #tpu.memory_space<smem>>
    %c129 = arith.constant 129 : index
    %129 = memref.load %arg1[%c129] : memref<200xf32, #tpu.memory_space<smem>>
    %c130 = arith.constant 130 : index
    %130 = memref.load %arg1[%c130] : memref<200xf32, #tpu.memory_space<smem>>
    %c131 = arith.constant 131 : index
    %131 = memref.load %arg1[%c131] : memref<200xf32, #tpu.memory_space<smem>>
    %c132 = arith.constant 132 : index
    %132 = memref.load %arg1[%c132] : memref<200xf32, #tpu.memory_space<smem>>
    %c133 = arith.constant 133 : index
    %133 = memref.load %arg1[%c133] : memref<200xf32, #tpu.memory_space<smem>>
    %c134 = arith.constant 134 : index
    %134 = memref.load %arg1[%c134] : memref<200xf32, #tpu.memory_space<smem>>
    %c135 = arith.constant 135 : index
    %135 = memref.load %arg1[%c135] : memref<200xf32, #tpu.memory_space<smem>>
    %c136 = arith.constant 136 : index
    %136 = memref.load %arg1[%c136] : memref<200xf32, #tpu.memory_space<smem>>
    %c137 = arith.constant 137 : index
    %137 = memref.load %arg1[%c137] : memref<200xf32, #tpu.memory_space<smem>>
    %c138 = arith.constant 138 : index
    %138 = memref.load %arg1[%c138] : memref<200xf32, #tpu.memory_space<smem>>
    %c139 = arith.constant 139 : index
    %139 = memref.load %arg1[%c139] : memref<200xf32, #tpu.memory_space<smem>>
    %c140 = arith.constant 140 : index
    %140 = memref.load %arg1[%c140] : memref<200xf32, #tpu.memory_space<smem>>
    %c141 = arith.constant 141 : index
    %141 = memref.load %arg1[%c141] : memref<200xf32, #tpu.memory_space<smem>>
    %c142 = arith.constant 142 : index
    %142 = memref.load %arg1[%c142] : memref<200xf32, #tpu.memory_space<smem>>
    %c143 = arith.constant 143 : index
    %143 = memref.load %arg1[%c143] : memref<200xf32, #tpu.memory_space<smem>>
    %c144 = arith.constant 144 : index
    %144 = memref.load %arg1[%c144] : memref<200xf32, #tpu.memory_space<smem>>
    %c145 = arith.constant 145 : index
    %145 = memref.load %arg1[%c145] : memref<200xf32, #tpu.memory_space<smem>>
    %c146 = arith.constant 146 : index
    %146 = memref.load %arg1[%c146] : memref<200xf32, #tpu.memory_space<smem>>
    %c147 = arith.constant 147 : index
    %147 = memref.load %arg1[%c147] : memref<200xf32, #tpu.memory_space<smem>>
    %c148 = arith.constant 148 : index
    %148 = memref.load %arg1[%c148] : memref<200xf32, #tpu.memory_space<smem>>
    %c149 = arith.constant 149 : index
    %149 = memref.load %arg1[%c149] : memref<200xf32, #tpu.memory_space<smem>>
    %c150 = arith.constant 150 : index
    %150 = memref.load %arg1[%c150] : memref<200xf32, #tpu.memory_space<smem>>
    %c151 = arith.constant 151 : index
    %151 = memref.load %arg1[%c151] : memref<200xf32, #tpu.memory_space<smem>>
    %c152 = arith.constant 152 : index
    %152 = memref.load %arg1[%c152] : memref<200xf32, #tpu.memory_space<smem>>
    %c153 = arith.constant 153 : index
    %153 = memref.load %arg1[%c153] : memref<200xf32, #tpu.memory_space<smem>>
    %c154 = arith.constant 154 : index
    %154 = memref.load %arg1[%c154] : memref<200xf32, #tpu.memory_space<smem>>
    %c155 = arith.constant 155 : index
    %155 = memref.load %arg1[%c155] : memref<200xf32, #tpu.memory_space<smem>>
    %c156 = arith.constant 156 : index
    %156 = memref.load %arg1[%c156] : memref<200xf32, #tpu.memory_space<smem>>
    %c157 = arith.constant 157 : index
    %157 = memref.load %arg1[%c157] : memref<200xf32, #tpu.memory_space<smem>>
    %c158 = arith.constant 158 : index
    %158 = memref.load %arg1[%c158] : memref<200xf32, #tpu.memory_space<smem>>
    %c159 = arith.constant 159 : index
    %159 = memref.load %arg1[%c159] : memref<200xf32, #tpu.memory_space<smem>>
    %c160 = arith.constant 160 : index
    %160 = memref.load %arg1[%c160] : memref<200xf32, #tpu.memory_space<smem>>
    %c161 = arith.constant 161 : index
    %161 = memref.load %arg1[%c161] : memref<200xf32, #tpu.memory_space<smem>>
    %c162 = arith.constant 162 : index
    %162 = memref.load %arg1[%c162] : memref<200xf32, #tpu.memory_space<smem>>
    %c163 = arith.constant 163 : index
    %163 = memref.load %arg1[%c163] : memref<200xf32, #tpu.memory_space<smem>>
    %c164 = arith.constant 164 : index
    %164 = memref.load %arg1[%c164] : memref<200xf32, #tpu.memory_space<smem>>
    %c165 = arith.constant 165 : index
    %165 = memref.load %arg1[%c165] : memref<200xf32, #tpu.memory_space<smem>>
    %c166 = arith.constant 166 : index
    %166 = memref.load %arg1[%c166] : memref<200xf32, #tpu.memory_space<smem>>
    %c167 = arith.constant 167 : index
    %167 = memref.load %arg1[%c167] : memref<200xf32, #tpu.memory_space<smem>>
    %c168 = arith.constant 168 : index
    %168 = memref.load %arg1[%c168] : memref<200xf32, #tpu.memory_space<smem>>
    %c169 = arith.constant 169 : index
    %169 = memref.load %arg1[%c169] : memref<200xf32, #tpu.memory_space<smem>>
    %c170 = arith.constant 170 : index
    %170 = memref.load %arg1[%c170] : memref<200xf32, #tpu.memory_space<smem>>
    %c171 = arith.constant 171 : index
    %171 = memref.load %arg1[%c171] : memref<200xf32, #tpu.memory_space<smem>>
    %c172 = arith.constant 172 : index
    %172 = memref.load %arg1[%c172] : memref<200xf32, #tpu.memory_space<smem>>
    %c173 = arith.constant 173 : index
    %173 = memref.load %arg1[%c173] : memref<200xf32, #tpu.memory_space<smem>>
    %c174 = arith.constant 174 : index
    %174 = memref.load %arg1[%c174] : memref<200xf32, #tpu.memory_space<smem>>
    %c175 = arith.constant 175 : index
    %175 = memref.load %arg1[%c175] : memref<200xf32, #tpu.memory_space<smem>>
    %c176 = arith.constant 176 : index
    %176 = memref.load %arg1[%c176] : memref<200xf32, #tpu.memory_space<smem>>
    %c177 = arith.constant 177 : index
    %177 = memref.load %arg1[%c177] : memref<200xf32, #tpu.memory_space<smem>>
    %c178 = arith.constant 178 : index
    %178 = memref.load %arg1[%c178] : memref<200xf32, #tpu.memory_space<smem>>
    %c179 = arith.constant 179 : index
    %179 = memref.load %arg1[%c179] : memref<200xf32, #tpu.memory_space<smem>>
    %c180 = arith.constant 180 : index
    %180 = memref.load %arg1[%c180] : memref<200xf32, #tpu.memory_space<smem>>
    %c181 = arith.constant 181 : index
    %181 = memref.load %arg1[%c181] : memref<200xf32, #tpu.memory_space<smem>>
    %c182 = arith.constant 182 : index
    %182 = memref.load %arg1[%c182] : memref<200xf32, #tpu.memory_space<smem>>
    %c183 = arith.constant 183 : index
    %183 = memref.load %arg1[%c183] : memref<200xf32, #tpu.memory_space<smem>>
    %c184 = arith.constant 184 : index
    %184 = memref.load %arg1[%c184] : memref<200xf32, #tpu.memory_space<smem>>
    %c185 = arith.constant 185 : index
    %185 = memref.load %arg1[%c185] : memref<200xf32, #tpu.memory_space<smem>>
    %c186 = arith.constant 186 : index
    %186 = memref.load %arg1[%c186] : memref<200xf32, #tpu.memory_space<smem>>
    %c187 = arith.constant 187 : index
    %187 = memref.load %arg1[%c187] : memref<200xf32, #tpu.memory_space<smem>>
    %c188 = arith.constant 188 : index
    %188 = memref.load %arg1[%c188] : memref<200xf32, #tpu.memory_space<smem>>
    %c189 = arith.constant 189 : index
    %189 = memref.load %arg1[%c189] : memref<200xf32, #tpu.memory_space<smem>>
    %c190 = arith.constant 190 : index
    %190 = memref.load %arg1[%c190] : memref<200xf32, #tpu.memory_space<smem>>
    %c191 = arith.constant 191 : index
    %191 = memref.load %arg1[%c191] : memref<200xf32, #tpu.memory_space<smem>>
    %c192 = arith.constant 192 : index
    %192 = memref.load %arg1[%c192] : memref<200xf32, #tpu.memory_space<smem>>
    %c193 = arith.constant 193 : index
    %193 = memref.load %arg1[%c193] : memref<200xf32, #tpu.memory_space<smem>>
    %c194 = arith.constant 194 : index
    %194 = memref.load %arg1[%c194] : memref<200xf32, #tpu.memory_space<smem>>
    %c195 = arith.constant 195 : index
    %195 = memref.load %arg1[%c195] : memref<200xf32, #tpu.memory_space<smem>>
    %c196 = arith.constant 196 : index
    %196 = memref.load %arg1[%c196] : memref<200xf32, #tpu.memory_space<smem>>
    %c197 = arith.constant 197 : index
    %197 = memref.load %arg1[%c197] : memref<200xf32, #tpu.memory_space<smem>>
    %c198 = arith.constant 198 : index
    %198 = memref.load %arg1[%c198] : memref<200xf32, #tpu.memory_space<smem>>
    %c199 = arith.constant 199 : index
    %199 = memref.load %arg1[%c199] : memref<200xf32, #tpu.memory_space<smem>>
    %c0_0 = arith.constant 0 : index
    %200 = memref.load %arg2[%c0_0] : memref<4xf32, #tpu.memory_space<smem>>
    %201 = vector.broadcast %200 : f32 to vector<12x12xf32>
    %c1_1 = arith.constant 1 : index
    %202 = memref.load %arg2[%c1_1] : memref<4xf32, #tpu.memory_space<smem>>
    %203 = vector.broadcast %202 : f32 to vector<12x12xf32>
    %c2_2 = arith.constant 2 : index
    %204 = memref.load %arg2[%c2_2] : memref<4xf32, #tpu.memory_space<smem>>
    %205 = vector.broadcast %204 : f32 to vector<12x12xf32>
    %c3_3 = arith.constant 3 : index
    %206 = memref.load %arg2[%c3_3] : memref<4xf32, #tpu.memory_space<smem>>
    %207 = vector.broadcast %206 : f32 to vector<12x12xf32>
    %c0_4 = arith.constant 0 : index
    %c0_5 = arith.constant 0 : index
    %c0_6 = arith.constant 0 : index
    %c0_7 = arith.constant 0 : index
    %208 = vector.load %arg3[%c0_4, %c0_5, %c0_6, %c0_7] : memref<1x2x16x16xf32, #tpu.memory_space<vmem>>, vector<1x1x12x12xf32>
    %209 = vector.shape_cast %208 : vector<1x1x12x12xf32> to vector<12x12xf32>
    %210 = vector.broadcast %0 : f32 to vector<12x12xf32>
    %211 = arith.mulf %210, %209 : vector<12x12xf32>
    %212 = arith.addf %201, %211 : vector<12x12xf32>
    %213 = vector.broadcast %50 : f32 to vector<12x12xf32>
    %214 = arith.mulf %213, %209 : vector<12x12xf32>
    %215 = arith.addf %203, %214 : vector<12x12xf32>
    %216 = vector.broadcast %100 : f32 to vector<12x12xf32>
    %217 = arith.mulf %216, %209 : vector<12x12xf32>
    %218 = arith.addf %205, %217 : vector<12x12xf32>
    %219 = vector.broadcast %150 : f32 to vector<12x12xf32>
    %220 = arith.mulf %219, %209 : vector<12x12xf32>
    %221 = arith.addf %207, %220 : vector<12x12xf32>
    %c0_8 = arith.constant 0 : index
    %c0_9 = arith.constant 0 : index
    %c0_10 = arith.constant 0 : index
    %c1_11 = arith.constant 1 : index
    %222 = vector.load %arg3[%c0_8, %c0_9, %c0_10, %c1_11] : memref<1x2x16x16xf32, #tpu.memory_space<vmem>>, vector<1x1x12x12xf32>
    %223 = vector.shape_cast %222 : vector<1x1x12x12xf32> to vector<12x12xf32>
    %224 = vector.broadcast %1 : f32 to vector<12x12xf32>
    %225 = arith.mulf %224, %223 : vector<12x12xf32>
    %226 = arith.addf %212, %225 : vector<12x12xf32>
    %227 = vector.broadcast %51 : f32 to vector<12x12xf32>
    %228 = arith.mulf %227, %223 : vector<12x12xf32>
    %229 = arith.addf %215, %228 : vector<12x12xf32>
    %230 = vector.broadcast %101 : f32 to vector<12x12xf32>
    %231 = arith.mulf %230, %223 : vector<12x12xf32>
    %232 = arith.addf %218, %231 : vector<12x12xf32>
    %233 = vector.broadcast %151 : f32 to vector<12x12xf32>
    %234 = arith.mulf %233, %223 : vector<12x12xf32>
    %235 = arith.addf %221, %234 : vector<12x12xf32>
    %c0_12 = arith.constant 0 : index
    %c0_13 = arith.constant 0 : index
    %c0_14 = arith.constant 0 : index
    %c2_15 = arith.constant 2 : index
    %236 = vector.load %arg3[%c0_12, %c0_13, %c0_14, %c2_15] : memref<1x2x16x16xf32, #tpu.memory_space<vmem>>, vector<1x1x12x12xf32>
    %237 = vector.shape_cast %236 : vector<1x1x12x12xf32> to vector<12x12xf32>
    %238 = vector.broadcast %2 : f32 to vector<12x12xf32>
    %239 = arith.mulf %238, %237 : vector<12x12xf32>
    %240 = arith.addf %226, %239 : vector<12x12xf32>
    %241 = vector.broadcast %52 : f32 to vector<12x12xf32>
    %242 = arith.mulf %241, %237 : vector<12x12xf32>
    %243 = arith.addf %229, %242 : vector<12x12xf32>
    %244 = vector.broadcast %102 : f32 to vector<12x12xf32>
    %245 = arith.mulf %244, %237 : vector<12x12xf32>
    %246 = arith.addf %232, %245 : vector<12x12xf32>
    %247 = vector.broadcast %152 : f32 to vector<12x12xf32>
    %248 = arith.mulf %247, %237 : vector<12x12xf32>
    %249 = arith.addf %235, %248 : vector<12x12xf32>
    %c0_16 = arith.constant 0 : index
    %c0_17 = arith.constant 0 : index
    %c0_18 = arith.constant 0 : index
    %c3_19 = arith.constant 3 : index
    %250 = vector.load %arg3[%c0_16, %c0_17, %c0_18, %c3_19] : memref<1x2x16x16xf32, #tpu.memory_space<vmem>>, vector<1x1x12x12xf32>
    %251 = vector.shape_cast %250 : vector<1x1x12x12xf32> to vector<12x12xf32>
    %252 = vector.broadcast %3 : f32 to vector<12x12xf32>
    %253 = arith.mulf %252, %251 : vector<12x12xf32>
    %254 = arith.addf %240, %253 : vector<12x12xf32>
    %255 = vector.broadcast %53 : f32 to vector<12x12xf32>
    %256 = arith.mulf %255, %251 : vector<12x12xf32>
    %257 = arith.addf %243, %256 : vector<12x12xf32>
    %258 = vector.broadcast %103 : f32 to vector<12x12xf32>
    %259 = arith.mulf %258, %251 : vector<12x12xf32>
    %260 = arith.addf %246, %259 : vector<12x12xf32>
    %261 = vector.broadcast %153 : f32 to vector<12x12xf32>
    %262 = arith.mulf %261, %251 : vector<12x12xf32>
    %263 = arith.addf %249, %262 : vector<12x12xf32>
    %c0_20 = arith.constant 0 : index
    %c0_21 = arith.constant 0 : index
    %c0_22 = arith.constant 0 : index
    %c4_23 = arith.constant 4 : index
    %264 = vector.load %arg3[%c0_20, %c0_21, %c0_22, %c4_23] : memref<1x2x16x16xf32, #tpu.memory_space<vmem>>, vector<1x1x12x12xf32>
    %265 = vector.shape_cast %264 : vector<1x1x12x12xf32> to vector<12x12xf32>
    %266 = vector.broadcast %4 : f32 to vector<12x12xf32>
    %267 = arith.mulf %266, %265 : vector<12x12xf32>
    %268 = arith.addf %254, %267 : vector<12x12xf32>
    %269 = vector.broadcast %54 : f32 to vector<12x12xf32>
    %270 = arith.mulf %269, %265 : vector<12x12xf32>
    %271 = arith.addf %257, %270 : vector<12x12xf32>
    %272 = vector.broadcast %104 : f32 to vector<12x12xf32>
    %273 = arith.mulf %272, %265 : vector<12x12xf32>
    %274 = arith.addf %260, %273 : vector<12x12xf32>
    %275 = vector.broadcast %154 : f32 to vector<12x12xf32>
    %276 = arith.mulf %275, %265 : vector<12x12xf32>
    %277 = arith.addf %263, %276 : vector<12x12xf32>
    %c0_24 = arith.constant 0 : index
    %c0_25 = arith.constant 0 : index
    %c1_26 = arith.constant 1 : index
    %c0_27 = arith.constant 0 : index
    %278 = vector.load %arg3[%c0_24, %c0_25, %c1_26, %c0_27] : memref<1x2x16x16xf32, #tpu.memory_space<vmem>>, vector<1x1x12x12xf32>
    %279 = vector.shape_cast %278 : vector<1x1x12x12xf32> to vector<12x12xf32>
    %280 = vector.broadcast %5 : f32 to vector<12x12xf32>
    %281 = arith.mulf %280, %279 : vector<12x12xf32>
    %282 = arith.addf %268, %281 : vector<12x12xf32>
    %283 = vector.broadcast %55 : f32 to vector<12x12xf32>
    %284 = arith.mulf %283, %279 : vector<12x12xf32>
    %285 = arith.addf %271, %284 : vector<12x12xf32>
    %286 = vector.broadcast %105 : f32 to vector<12x12xf32>
    %287 = arith.mulf %286, %279 : vector<12x12xf32>
    %288 = arith.addf %274, %287 : vector<12x12xf32>
    %289 = vector.broadcast %155 : f32 to vector<12x12xf32>
    %290 = arith.mulf %289, %279 : vector<12x12xf32>
    %291 = arith.addf %277, %290 : vector<12x12xf32>
    %c0_28 = arith.constant 0 : index
    %c0_29 = arith.constant 0 : index
    %c1_30 = arith.constant 1 : index
    %c1_31 = arith.constant 1 : index
    %292 = vector.load %arg3[%c0_28, %c0_29, %c1_30, %c1_31] : memref<1x2x16x16xf32, #tpu.memory_space<vmem>>, vector<1x1x12x12xf32>
    %293 = vector.shape_cast %292 : vector<1x1x12x12xf32> to vector<12x12xf32>
    %294 = vector.broadcast %6 : f32 to vector<12x12xf32>
    %295 = arith.mulf %294, %293 : vector<12x12xf32>
    %296 = arith.addf %282, %295 : vector<12x12xf32>
    %297 = vector.broadcast %56 : f32 to vector<12x12xf32>
    %298 = arith.mulf %297, %293 : vector<12x12xf32>
    %299 = arith.addf %285, %298 : vector<12x12xf32>
    %300 = vector.broadcast %106 : f32 to vector<12x12xf32>
    %301 = arith.mulf %300, %293 : vector<12x12xf32>
    %302 = arith.addf %288, %301 : vector<12x12xf32>
    %303 = vector.broadcast %156 : f32 to vector<12x12xf32>
    %304 = arith.mulf %303, %293 : vector<12x12xf32>
    %305 = arith.addf %291, %304 : vector<12x12xf32>
    %c0_32 = arith.constant 0 : index
    %c0_33 = arith.constant 0 : index
    %c1_34 = arith.constant 1 : index
    %c2_35 = arith.constant 2 : index
    %306 = vector.load %arg3[%c0_32, %c0_33, %c1_34, %c2_35] : memref<1x2x16x16xf32, #tpu.memory_space<vmem>>, vector<1x1x12x12xf32>
    %307 = vector.shape_cast %306 : vector<1x1x12x12xf32> to vector<12x12xf32>
    %308 = vector.broadcast %7 : f32 to vector<12x12xf32>
    %309 = arith.mulf %308, %307 : vector<12x12xf32>
    %310 = arith.addf %296, %309 : vector<12x12xf32>
    %311 = vector.broadcast %57 : f32 to vector<12x12xf32>
    %312 = arith.mulf %311, %307 : vector<12x12xf32>
    %313 = arith.addf %299, %312 : vector<12x12xf32>
    %314 = vector.broadcast %107 : f32 to vector<12x12xf32>
    %315 = arith.mulf %314, %307 : vector<12x12xf32>
    %316 = arith.addf %302, %315 : vector<12x12xf32>
    %317 = vector.broadcast %157 : f32 to vector<12x12xf32>
    %318 = arith.mulf %317, %307 : vector<12x12xf32>
    %319 = arith.addf %305, %318 : vector<12x12xf32>
    %c0_36 = arith.constant 0 : index
    %c0_37 = arith.constant 0 : index
    %c1_38 = arith.constant 1 : index
    %c3_39 = arith.constant 3 : index
    %320 = vector.load %arg3[%c0_36, %c0_37, %c1_38, %c3_39] : memref<1x2x16x16xf32, #tpu.memory_space<vmem>>, vector<1x1x12x12xf32>
    %321 = vector.shape_cast %320 : vector<1x1x12x12xf32> to vector<12x12xf32>
    %322 = vector.broadcast %8 : f32 to vector<12x12xf32>
    %323 = arith.mulf %322, %321 : vector<12x12xf32>
    %324 = arith.addf %310, %323 : vector<12x12xf32>
    %325 = vector.broadcast %58 : f32 to vector<12x12xf32>
    %326 = arith.mulf %325, %321 : vector<12x12xf32>
    %327 = arith.addf %313, %326 : vector<12x12xf32>
    %328 = vector.broadcast %108 : f32 to vector<12x12xf32>
    %329 = arith.mulf %328, %321 : vector<12x12xf32>
    %330 = arith.addf %316, %329 : vector<12x12xf32>
    %331 = vector.broadcast %158 : f32 to vector<12x12xf32>
    %332 = arith.mulf %331, %321 : vector<12x12xf32>
    %333 = arith.addf %319, %332 : vector<12x12xf32>
    %c0_40 = arith.constant 0 : index
    %c0_41 = arith.constant 0 : index
    %c1_42 = arith.constant 1 : index
    %c4_43 = arith.constant 4 : index
    %334 = vector.load %arg3[%c0_40, %c0_41, %c1_42, %c4_43] : memref<1x2x16x16xf32, #tpu.memory_space<vmem>>, vector<1x1x12x12xf32>
    %335 = vector.shape_cast %334 : vector<1x1x12x12xf32> to vector<12x12xf32>
    %336 = vector.broadcast %9 : f32 to vector<12x12xf32>
    %337 = arith.mulf %336, %335 : vector<12x12xf32>
    %338 = arith.addf %324, %337 : vector<12x12xf32>
    %339 = vector.broadcast %59 : f32 to vector<12x12xf32>
    %340 = arith.mulf %339, %335 : vector<12x12xf32>
    %341 = arith.addf %327, %340 : vector<12x12xf32>
    %342 = vector.broadcast %109 : f32 to vector<12x12xf32>
    %343 = arith.mulf %342, %335 : vector<12x12xf32>
    %344 = arith.addf %330, %343 : vector<12x12xf32>
    %345 = vector.broadcast %159 : f32 to vector<12x12xf32>
    %346 = arith.mulf %345, %335 : vector<12x12xf32>
    %347 = arith.addf %333, %346 : vector<12x12xf32>
    %c0_44 = arith.constant 0 : index
    %c0_45 = arith.constant 0 : index
    %c2_46 = arith.constant 2 : index
    %c0_47 = arith.constant 0 : index
    %348 = vector.load %arg3[%c0_44, %c0_45, %c2_46, %c0_47] : memref<1x2x16x16xf32, #tpu.memory_space<vmem>>, vector<1x1x12x12xf32>
    %349 = vector.shape_cast %348 : vector<1x1x12x12xf32> to vector<12x12xf32>
    %350 = vector.broadcast %10 : f32 to vector<12x12xf32>
    %351 = arith.mulf %350, %349 : vector<12x12xf32>
    %352 = arith.addf %338, %351 : vector<12x12xf32>
    %353 = vector.broadcast %60 : f32 to vector<12x12xf32>
    %354 = arith.mulf %353, %349 : vector<12x12xf32>
    %355 = arith.addf %341, %354 : vector<12x12xf32>
    %356 = vector.broadcast %110 : f32 to vector<12x12xf32>
    %357 = arith.mulf %356, %349 : vector<12x12xf32>
    %358 = arith.addf %344, %357 : vector<12x12xf32>
    %359 = vector.broadcast %160 : f32 to vector<12x12xf32>
    %360 = arith.mulf %359, %349 : vector<12x12xf32>
    %361 = arith.addf %347, %360 : vector<12x12xf32>
    %c0_48 = arith.constant 0 : index
    %c0_49 = arith.constant 0 : index
    %c2_50 = arith.constant 2 : index
    %c1_51 = arith.constant 1 : index
    %362 = vector.load %arg3[%c0_48, %c0_49, %c2_50, %c1_51] : memref<1x2x16x16xf32, #tpu.memory_space<vmem>>, vector<1x1x12x12xf32>
    %363 = vector.shape_cast %362 : vector<1x1x12x12xf32> to vector<12x12xf32>
    %364 = vector.broadcast %11 : f32 to vector<12x12xf32>
    %365 = arith.mulf %364, %363 : vector<12x12xf32>
    %366 = arith.addf %352, %365 : vector<12x12xf32>
    %367 = vector.broadcast %61 : f32 to vector<12x12xf32>
    %368 = arith.mulf %367, %363 : vector<12x12xf32>
    %369 = arith.addf %355, %368 : vector<12x12xf32>
    %370 = vector.broadcast %111 : f32 to vector<12x12xf32>
    %371 = arith.mulf %370, %363 : vector<12x12xf32>
    %372 = arith.addf %358, %371 : vector<12x12xf32>
    %373 = vector.broadcast %161 : f32 to vector<12x12xf32>
    %374 = arith.mulf %373, %363 : vector<12x12xf32>
    %375 = arith.addf %361, %374 : vector<12x12xf32>
    %c0_52 = arith.constant 0 : index
    %c0_53 = arith.constant 0 : index
    %c2_54 = arith.constant 2 : index
    %c2_55 = arith.constant 2 : index
    %376 = vector.load %arg3[%c0_52, %c0_53, %c2_54, %c2_55] : memref<1x2x16x16xf32, #tpu.memory_space<vmem>>, vector<1x1x12x12xf32>
    %377 = vector.shape_cast %376 : vector<1x1x12x12xf32> to vector<12x12xf32>
    %378 = vector.broadcast %12 : f32 to vector<12x12xf32>
    %379 = arith.mulf %378, %377 : vector<12x12xf32>
    %380 = arith.addf %366, %379 : vector<12x12xf32>
    %381 = vector.broadcast %62 : f32 to vector<12x12xf32>
    %382 = arith.mulf %381, %377 : vector<12x12xf32>
    %383 = arith.addf %369, %382 : vector<12x12xf32>
    %384 = vector.broadcast %112 : f32 to vector<12x12xf32>
    %385 = arith.mulf %384, %377 : vector<12x12xf32>
    %386 = arith.addf %372, %385 : vector<12x12xf32>
    %387 = vector.broadcast %162 : f32 to vector<12x12xf32>
    %388 = arith.mulf %387, %377 : vector<12x12xf32>
    %389 = arith.addf %375, %388 : vector<12x12xf32>
    %c0_56 = arith.constant 0 : index
    %c0_57 = arith.constant 0 : index
    %c2_58 = arith.constant 2 : index
    %c3_59 = arith.constant 3 : index
    %390 = vector.load %arg3[%c0_56, %c0_57, %c2_58, %c3_59] : memref<1x2x16x16xf32, #tpu.memory_space<vmem>>, vector<1x1x12x12xf32>
    %391 = vector.shape_cast %390 : vector<1x1x12x12xf32> to vector<12x12xf32>
    %392 = vector.broadcast %13 : f32 to vector<12x12xf32>
    %393 = arith.mulf %392, %391 : vector<12x12xf32>
    %394 = arith.addf %380, %393 : vector<12x12xf32>
    %395 = vector.broadcast %63 : f32 to vector<12x12xf32>
    %396 = arith.mulf %395, %391 : vector<12x12xf32>
    %397 = arith.addf %383, %396 : vector<12x12xf32>
    %398 = vector.broadcast %113 : f32 to vector<12x12xf32>
    %399 = arith.mulf %398, %391 : vector<12x12xf32>
    %400 = arith.addf %386, %399 : vector<12x12xf32>
    %401 = vector.broadcast %163 : f32 to vector<12x12xf32>
    %402 = arith.mulf %401, %391 : vector<12x12xf32>
    %403 = arith.addf %389, %402 : vector<12x12xf32>
    %c0_60 = arith.constant 0 : index
    %c0_61 = arith.constant 0 : index
    %c2_62 = arith.constant 2 : index
    %c4_63 = arith.constant 4 : index
    %404 = vector.load %arg3[%c0_60, %c0_61, %c2_62, %c4_63] : memref<1x2x16x16xf32, #tpu.memory_space<vmem>>, vector<1x1x12x12xf32>
    %405 = vector.shape_cast %404 : vector<1x1x12x12xf32> to vector<12x12xf32>
    %406 = vector.broadcast %14 : f32 to vector<12x12xf32>
    %407 = arith.mulf %406, %405 : vector<12x12xf32>
    %408 = arith.addf %394, %407 : vector<12x12xf32>
    %409 = vector.broadcast %64 : f32 to vector<12x12xf32>
    %410 = arith.mulf %409, %405 : vector<12x12xf32>
    %411 = arith.addf %397, %410 : vector<12x12xf32>
    %412 = vector.broadcast %114 : f32 to vector<12x12xf32>
    %413 = arith.mulf %412, %405 : vector<12x12xf32>
    %414 = arith.addf %400, %413 : vector<12x12xf32>
    %415 = vector.broadcast %164 : f32 to vector<12x12xf32>
    %416 = arith.mulf %415, %405 : vector<12x12xf32>
    %417 = arith.addf %403, %416 : vector<12x12xf32>
    %c0_64 = arith.constant 0 : index
    %c0_65 = arith.constant 0 : index
    %c3_66 = arith.constant 3 : index
    %c0_67 = arith.constant 0 : index
    %418 = vector.load %arg3[%c0_64, %c0_65, %c3_66, %c0_67] : memref<1x2x16x16xf32, #tpu.memory_space<vmem>>, vector<1x1x12x12xf32>
    %419 = vector.shape_cast %418 : vector<1x1x12x12xf32> to vector<12x12xf32>
    %420 = vector.broadcast %15 : f32 to vector<12x12xf32>
    %421 = arith.mulf %420, %419 : vector<12x12xf32>
    %422 = arith.addf %408, %421 : vector<12x12xf32>
    %423 = vector.broadcast %65 : f32 to vector<12x12xf32>
    %424 = arith.mulf %423, %419 : vector<12x12xf32>
    %425 = arith.addf %411, %424 : vector<12x12xf32>
    %426 = vector.broadcast %115 : f32 to vector<12x12xf32>
    %427 = arith.mulf %426, %419 : vector<12x12xf32>
    %428 = arith.addf %414, %427 : vector<12x12xf32>
    %429 = vector.broadcast %165 : f32 to vector<12x12xf32>
    %430 = arith.mulf %429, %419 : vector<12x12xf32>
    %431 = arith.addf %417, %430 : vector<12x12xf32>
    %c0_68 = arith.constant 0 : index
    %c0_69 = arith.constant 0 : index
    %c3_70 = arith.constant 3 : index
    %c1_71 = arith.constant 1 : index
    %432 = vector.load %arg3[%c0_68, %c0_69, %c3_70, %c1_71] : memref<1x2x16x16xf32, #tpu.memory_space<vmem>>, vector<1x1x12x12xf32>
    %433 = vector.shape_cast %432 : vector<1x1x12x12xf32> to vector<12x12xf32>
    %434 = vector.broadcast %16 : f32 to vector<12x12xf32>
    %435 = arith.mulf %434, %433 : vector<12x12xf32>
    %436 = arith.addf %422, %435 : vector<12x12xf32>
    %437 = vector.broadcast %66 : f32 to vector<12x12xf32>
    %438 = arith.mulf %437, %433 : vector<12x12xf32>
    %439 = arith.addf %425, %438 : vector<12x12xf32>
    %440 = vector.broadcast %116 : f32 to vector<12x12xf32>
    %441 = arith.mulf %440, %433 : vector<12x12xf32>
    %442 = arith.addf %428, %441 : vector<12x12xf32>
    %443 = vector.broadcast %166 : f32 to vector<12x12xf32>
    %444 = arith.mulf %443, %433 : vector<12x12xf32>
    %445 = arith.addf %431, %444 : vector<12x12xf32>
    %c0_72 = arith.constant 0 : index
    %c0_73 = arith.constant 0 : index
    %c3_74 = arith.constant 3 : index
    %c2_75 = arith.constant 2 : index
    %446 = vector.load %arg3[%c0_72, %c0_73, %c3_74, %c2_75] : memref<1x2x16x16xf32, #tpu.memory_space<vmem>>, vector<1x1x12x12xf32>
    %447 = vector.shape_cast %446 : vector<1x1x12x12xf32> to vector<12x12xf32>
    %448 = vector.broadcast %17 : f32 to vector<12x12xf32>
    %449 = arith.mulf %448, %447 : vector<12x12xf32>
    %450 = arith.addf %436, %449 : vector<12x12xf32>
    %451 = vector.broadcast %67 : f32 to vector<12x12xf32>
    %452 = arith.mulf %451, %447 : vector<12x12xf32>
    %453 = arith.addf %439, %452 : vector<12x12xf32>
    %454 = vector.broadcast %117 : f32 to vector<12x12xf32>
    %455 = arith.mulf %454, %447 : vector<12x12xf32>
    %456 = arith.addf %442, %455 : vector<12x12xf32>
    %457 = vector.broadcast %167 : f32 to vector<12x12xf32>
    %458 = arith.mulf %457, %447 : vector<12x12xf32>
    %459 = arith.addf %445, %458 : vector<12x12xf32>
    %c0_76 = arith.constant 0 : index
    %c0_77 = arith.constant 0 : index
    %c3_78 = arith.constant 3 : index
    %c3_79 = arith.constant 3 : index
    %460 = vector.load %arg3[%c0_76, %c0_77, %c3_78, %c3_79] : memref<1x2x16x16xf32, #tpu.memory_space<vmem>>, vector<1x1x12x12xf32>
    %461 = vector.shape_cast %460 : vector<1x1x12x12xf32> to vector<12x12xf32>
    %462 = vector.broadcast %18 : f32 to vector<12x12xf32>
    %463 = arith.mulf %462, %461 : vector<12x12xf32>
    %464 = arith.addf %450, %463 : vector<12x12xf32>
    %465 = vector.broadcast %68 : f32 to vector<12x12xf32>
    %466 = arith.mulf %465, %461 : vector<12x12xf32>
    %467 = arith.addf %453, %466 : vector<12x12xf32>
    %468 = vector.broadcast %118 : f32 to vector<12x12xf32>
    %469 = arith.mulf %468, %461 : vector<12x12xf32>
    %470 = arith.addf %456, %469 : vector<12x12xf32>
    %471 = vector.broadcast %168 : f32 to vector<12x12xf32>
    %472 = arith.mulf %471, %461 : vector<12x12xf32>
    %473 = arith.addf %459, %472 : vector<12x12xf32>
    %c0_80 = arith.constant 0 : index
    %c0_81 = arith.constant 0 : index
    %c3_82 = arith.constant 3 : index
    %c4_83 = arith.constant 4 : index
    %474 = vector.load %arg3[%c0_80, %c0_81, %c3_82, %c4_83] : memref<1x2x16x16xf32, #tpu.memory_space<vmem>>, vector<1x1x12x12xf32>
    %475 = vector.shape_cast %474 : vector<1x1x12x12xf32> to vector<12x12xf32>
    %476 = vector.broadcast %19 : f32 to vector<12x12xf32>
    %477 = arith.mulf %476, %475 : vector<12x12xf32>
    %478 = arith.addf %464, %477 : vector<12x12xf32>
    %479 = vector.broadcast %69 : f32 to vector<12x12xf32>
    %480 = arith.mulf %479, %475 : vector<12x12xf32>
    %481 = arith.addf %467, %480 : vector<12x12xf32>
    %482 = vector.broadcast %119 : f32 to vector<12x12xf32>
    %483 = arith.mulf %482, %475 : vector<12x12xf32>
    %484 = arith.addf %470, %483 : vector<12x12xf32>
    %485 = vector.broadcast %169 : f32 to vector<12x12xf32>
    %486 = arith.mulf %485, %475 : vector<12x12xf32>
    %487 = arith.addf %473, %486 : vector<12x12xf32>
    %c0_84 = arith.constant 0 : index
    %c0_85 = arith.constant 0 : index
    %c4_86 = arith.constant 4 : index
    %c0_87 = arith.constant 0 : index
    %488 = vector.load %arg3[%c0_84, %c0_85, %c4_86, %c0_87] : memref<1x2x16x16xf32, #tpu.memory_space<vmem>>, vector<1x1x12x12xf32>
    %489 = vector.shape_cast %488 : vector<1x1x12x12xf32> to vector<12x12xf32>
    %490 = vector.broadcast %20 : f32 to vector<12x12xf32>
    %491 = arith.mulf %490, %489 : vector<12x12xf32>
    %492 = arith.addf %478, %491 : vector<12x12xf32>
    %493 = vector.broadcast %70 : f32 to vector<12x12xf32>
    %494 = arith.mulf %493, %489 : vector<12x12xf32>
    %495 = arith.addf %481, %494 : vector<12x12xf32>
    %496 = vector.broadcast %120 : f32 to vector<12x12xf32>
    %497 = arith.mulf %496, %489 : vector<12x12xf32>
    %498 = arith.addf %484, %497 : vector<12x12xf32>
    %499 = vector.broadcast %170 : f32 to vector<12x12xf32>
    %500 = arith.mulf %499, %489 : vector<12x12xf32>
    %501 = arith.addf %487, %500 : vector<12x12xf32>
    %c0_88 = arith.constant 0 : index
    %c0_89 = arith.constant 0 : index
    %c4_90 = arith.constant 4 : index
    %c1_91 = arith.constant 1 : index
    %502 = vector.load %arg3[%c0_88, %c0_89, %c4_90, %c1_91] : memref<1x2x16x16xf32, #tpu.memory_space<vmem>>, vector<1x1x12x12xf32>
    %503 = vector.shape_cast %502 : vector<1x1x12x12xf32> to vector<12x12xf32>
    %504 = vector.broadcast %21 : f32 to vector<12x12xf32>
    %505 = arith.mulf %504, %503 : vector<12x12xf32>
    %506 = arith.addf %492, %505 : vector<12x12xf32>
    %507 = vector.broadcast %71 : f32 to vector<12x12xf32>
    %508 = arith.mulf %507, %503 : vector<12x12xf32>
    %509 = arith.addf %495, %508 : vector<12x12xf32>
    %510 = vector.broadcast %121 : f32 to vector<12x12xf32>
    %511 = arith.mulf %510, %503 : vector<12x12xf32>
    %512 = arith.addf %498, %511 : vector<12x12xf32>
    %513 = vector.broadcast %171 : f32 to vector<12x12xf32>
    %514 = arith.mulf %513, %503 : vector<12x12xf32>
    %515 = arith.addf %501, %514 : vector<12x12xf32>
    %c0_92 = arith.constant 0 : index
    %c0_93 = arith.constant 0 : index
    %c4_94 = arith.constant 4 : index
    %c2_95 = arith.constant 2 : index
    %516 = vector.load %arg3[%c0_92, %c0_93, %c4_94, %c2_95] : memref<1x2x16x16xf32, #tpu.memory_space<vmem>>, vector<1x1x12x12xf32>
    %517 = vector.shape_cast %516 : vector<1x1x12x12xf32> to vector<12x12xf32>
    %518 = vector.broadcast %22 : f32 to vector<12x12xf32>
    %519 = arith.mulf %518, %517 : vector<12x12xf32>
    %520 = arith.addf %506, %519 : vector<12x12xf32>
    %521 = vector.broadcast %72 : f32 to vector<12x12xf32>
    %522 = arith.mulf %521, %517 : vector<12x12xf32>
    %523 = arith.addf %509, %522 : vector<12x12xf32>
    %524 = vector.broadcast %122 : f32 to vector<12x12xf32>
    %525 = arith.mulf %524, %517 : vector<12x12xf32>
    %526 = arith.addf %512, %525 : vector<12x12xf32>
    %527 = vector.broadcast %172 : f32 to vector<12x12xf32>
    %528 = arith.mulf %527, %517 : vector<12x12xf32>
    %529 = arith.addf %515, %528 : vector<12x12xf32>
    %c0_96 = arith.constant 0 : index
    %c0_97 = arith.constant 0 : index
    %c4_98 = arith.constant 4 : index
    %c3_99 = arith.constant 3 : index
    %530 = vector.load %arg3[%c0_96, %c0_97, %c4_98, %c3_99] : memref<1x2x16x16xf32, #tpu.memory_space<vmem>>, vector<1x1x12x12xf32>
    %531 = vector.shape_cast %530 : vector<1x1x12x12xf32> to vector<12x12xf32>
    %532 = vector.broadcast %23 : f32 to vector<12x12xf32>
    %533 = arith.mulf %532, %531 : vector<12x12xf32>
    %534 = arith.addf %520, %533 : vector<12x12xf32>
    %535 = vector.broadcast %73 : f32 to vector<12x12xf32>
    %536 = arith.mulf %535, %531 : vector<12x12xf32>
    %537 = arith.addf %523, %536 : vector<12x12xf32>
    %538 = vector.broadcast %123 : f32 to vector<12x12xf32>
    %539 = arith.mulf %538, %531 : vector<12x12xf32>
    %540 = arith.addf %526, %539 : vector<12x12xf32>
    %541 = vector.broadcast %173 : f32 to vector<12x12xf32>
    %542 = arith.mulf %541, %531 : vector<12x12xf32>
    %543 = arith.addf %529, %542 : vector<12x12xf32>
    %c0_100 = arith.constant 0 : index
    %c0_101 = arith.constant 0 : index
    %c4_102 = arith.constant 4 : index
    %c4_103 = arith.constant 4 : index
    %544 = vector.load %arg3[%c0_100, %c0_101, %c4_102, %c4_103] : memref<1x2x16x16xf32, #tpu.memory_space<vmem>>, vector<1x1x12x12xf32>
    %545 = vector.shape_cast %544 : vector<1x1x12x12xf32> to vector<12x12xf32>
    %546 = vector.broadcast %24 : f32 to vector<12x12xf32>
    %547 = arith.mulf %546, %545 : vector<12x12xf32>
    %548 = arith.addf %534, %547 : vector<12x12xf32>
    %549 = vector.broadcast %74 : f32 to vector<12x12xf32>
    %550 = arith.mulf %549, %545 : vector<12x12xf32>
    %551 = arith.addf %537, %550 : vector<12x12xf32>
    %552 = vector.broadcast %124 : f32 to vector<12x12xf32>
    %553 = arith.mulf %552, %545 : vector<12x12xf32>
    %554 = arith.addf %540, %553 : vector<12x12xf32>
    %555 = vector.broadcast %174 : f32 to vector<12x12xf32>
    %556 = arith.mulf %555, %545 : vector<12x12xf32>
    %557 = arith.addf %543, %556 : vector<12x12xf32>
    %c0_104 = arith.constant 0 : index
    %c1_105 = arith.constant 1 : index
    %c0_106 = arith.constant 0 : index
    %c0_107 = arith.constant 0 : index
    %558 = vector.load %arg3[%c0_104, %c1_105, %c0_106, %c0_107] : memref<1x2x16x16xf32, #tpu.memory_space<vmem>>, vector<1x1x12x12xf32>
    %559 = vector.shape_cast %558 : vector<1x1x12x12xf32> to vector<12x12xf32>
    %560 = vector.broadcast %25 : f32 to vector<12x12xf32>
    %561 = arith.mulf %560, %559 : vector<12x12xf32>
    %562 = arith.addf %548, %561 : vector<12x12xf32>
    %563 = vector.broadcast %75 : f32 to vector<12x12xf32>
    %564 = arith.mulf %563, %559 : vector<12x12xf32>
    %565 = arith.addf %551, %564 : vector<12x12xf32>
    %566 = vector.broadcast %125 : f32 to vector<12x12xf32>
    %567 = arith.mulf %566, %559 : vector<12x12xf32>
    %568 = arith.addf %554, %567 : vector<12x12xf32>
    %569 = vector.broadcast %175 : f32 to vector<12x12xf32>
    %570 = arith.mulf %569, %559 : vector<12x12xf32>
    %571 = arith.addf %557, %570 : vector<12x12xf32>
    %c0_108 = arith.constant 0 : index
    %c1_109 = arith.constant 1 : index
    %c0_110 = arith.constant 0 : index
    %c1_111 = arith.constant 1 : index
    %572 = vector.load %arg3[%c0_108, %c1_109, %c0_110, %c1_111] : memref<1x2x16x16xf32, #tpu.memory_space<vmem>>, vector<1x1x12x12xf32>
    %573 = vector.shape_cast %572 : vector<1x1x12x12xf32> to vector<12x12xf32>
    %574 = vector.broadcast %26 : f32 to vector<12x12xf32>
    %575 = arith.mulf %574, %573 : vector<12x12xf32>
    %576 = arith.addf %562, %575 : vector<12x12xf32>
    %577 = vector.broadcast %76 : f32 to vector<12x12xf32>
    %578 = arith.mulf %577, %573 : vector<12x12xf32>
    %579 = arith.addf %565, %578 : vector<12x12xf32>
    %580 = vector.broadcast %126 : f32 to vector<12x12xf32>
    %581 = arith.mulf %580, %573 : vector<12x12xf32>
    %582 = arith.addf %568, %581 : vector<12x12xf32>
    %583 = vector.broadcast %176 : f32 to vector<12x12xf32>
    %584 = arith.mulf %583, %573 : vector<12x12xf32>
    %585 = arith.addf %571, %584 : vector<12x12xf32>
    %c0_112 = arith.constant 0 : index
    %c1_113 = arith.constant 1 : index
    %c0_114 = arith.constant 0 : index
    %c2_115 = arith.constant 2 : index
    %586 = vector.load %arg3[%c0_112, %c1_113, %c0_114, %c2_115] : memref<1x2x16x16xf32, #tpu.memory_space<vmem>>, vector<1x1x12x12xf32>
    %587 = vector.shape_cast %586 : vector<1x1x12x12xf32> to vector<12x12xf32>
    %588 = vector.broadcast %27 : f32 to vector<12x12xf32>
    %589 = arith.mulf %588, %587 : vector<12x12xf32>
    %590 = arith.addf %576, %589 : vector<12x12xf32>
    %591 = vector.broadcast %77 : f32 to vector<12x12xf32>
    %592 = arith.mulf %591, %587 : vector<12x12xf32>
    %593 = arith.addf %579, %592 : vector<12x12xf32>
    %594 = vector.broadcast %127 : f32 to vector<12x12xf32>
    %595 = arith.mulf %594, %587 : vector<12x12xf32>
    %596 = arith.addf %582, %595 : vector<12x12xf32>
    %597 = vector.broadcast %177 : f32 to vector<12x12xf32>
    %598 = arith.mulf %597, %587 : vector<12x12xf32>
    %599 = arith.addf %585, %598 : vector<12x12xf32>
    %c0_116 = arith.constant 0 : index
    %c1_117 = arith.constant 1 : index
    %c0_118 = arith.constant 0 : index
    %c3_119 = arith.constant 3 : index
    %600 = vector.load %arg3[%c0_116, %c1_117, %c0_118, %c3_119] : memref<1x2x16x16xf32, #tpu.memory_space<vmem>>, vector<1x1x12x12xf32>
    %601 = vector.shape_cast %600 : vector<1x1x12x12xf32> to vector<12x12xf32>
    %602 = vector.broadcast %28 : f32 to vector<12x12xf32>
    %603 = arith.mulf %602, %601 : vector<12x12xf32>
    %604 = arith.addf %590, %603 : vector<12x12xf32>
    %605 = vector.broadcast %78 : f32 to vector<12x12xf32>
    %606 = arith.mulf %605, %601 : vector<12x12xf32>
    %607 = arith.addf %593, %606 : vector<12x12xf32>
    %608 = vector.broadcast %128 : f32 to vector<12x12xf32>
    %609 = arith.mulf %608, %601 : vector<12x12xf32>
    %610 = arith.addf %596, %609 : vector<12x12xf32>
    %611 = vector.broadcast %178 : f32 to vector<12x12xf32>
    %612 = arith.mulf %611, %601 : vector<12x12xf32>
    %613 = arith.addf %599, %612 : vector<12x12xf32>
    %c0_120 = arith.constant 0 : index
    %c1_121 = arith.constant 1 : index
    %c0_122 = arith.constant 0 : index
    %c4_123 = arith.constant 4 : index
    %614 = vector.load %arg3[%c0_120, %c1_121, %c0_122, %c4_123] : memref<1x2x16x16xf32, #tpu.memory_space<vmem>>, vector<1x1x12x12xf32>
    %615 = vector.shape_cast %614 : vector<1x1x12x12xf32> to vector<12x12xf32>
    %616 = vector.broadcast %29 : f32 to vector<12x12xf32>
    %617 = arith.mulf %616, %615 : vector<12x12xf32>
    %618 = arith.addf %604, %617 : vector<12x12xf32>
    %619 = vector.broadcast %79 : f32 to vector<12x12xf32>
    %620 = arith.mulf %619, %615 : vector<12x12xf32>
    %621 = arith.addf %607, %620 : vector<12x12xf32>
    %622 = vector.broadcast %129 : f32 to vector<12x12xf32>
    %623 = arith.mulf %622, %615 : vector<12x12xf32>
    %624 = arith.addf %610, %623 : vector<12x12xf32>
    %625 = vector.broadcast %179 : f32 to vector<12x12xf32>
    %626 = arith.mulf %625, %615 : vector<12x12xf32>
    %627 = arith.addf %613, %626 : vector<12x12xf32>
    %c0_124 = arith.constant 0 : index
    %c1_125 = arith.constant 1 : index
    %c1_126 = arith.constant 1 : index
    %c0_127 = arith.constant 0 : index
    %628 = vector.load %arg3[%c0_124, %c1_125, %c1_126, %c0_127] : memref<1x2x16x16xf32, #tpu.memory_space<vmem>>, vector<1x1x12x12xf32>
    %629 = vector.shape_cast %628 : vector<1x1x12x12xf32> to vector<12x12xf32>
    %630 = vector.broadcast %30 : f32 to vector<12x12xf32>
    %631 = arith.mulf %630, %629 : vector<12x12xf32>
    %632 = arith.addf %618, %631 : vector<12x12xf32>
    %633 = vector.broadcast %80 : f32 to vector<12x12xf32>
    %634 = arith.mulf %633, %629 : vector<12x12xf32>
    %635 = arith.addf %621, %634 : vector<12x12xf32>
    %636 = vector.broadcast %130 : f32 to vector<12x12xf32>
    %637 = arith.mulf %636, %629 : vector<12x12xf32>
    %638 = arith.addf %624, %637 : vector<12x12xf32>
    %639 = vector.broadcast %180 : f32 to vector<12x12xf32>
    %640 = arith.mulf %639, %629 : vector<12x12xf32>
    %641 = arith.addf %627, %640 : vector<12x12xf32>
    %c0_128 = arith.constant 0 : index
    %c1_129 = arith.constant 1 : index
    %c1_130 = arith.constant 1 : index
    %c1_131 = arith.constant 1 : index
    %642 = vector.load %arg3[%c0_128, %c1_129, %c1_130, %c1_131] : memref<1x2x16x16xf32, #tpu.memory_space<vmem>>, vector<1x1x12x12xf32>
    %643 = vector.shape_cast %642 : vector<1x1x12x12xf32> to vector<12x12xf32>
    %644 = vector.broadcast %31 : f32 to vector<12x12xf32>
    %645 = arith.mulf %644, %643 : vector<12x12xf32>
    %646 = arith.addf %632, %645 : vector<12x12xf32>
    %647 = vector.broadcast %81 : f32 to vector<12x12xf32>
    %648 = arith.mulf %647, %643 : vector<12x12xf32>
    %649 = arith.addf %635, %648 : vector<12x12xf32>
    %650 = vector.broadcast %131 : f32 to vector<12x12xf32>
    %651 = arith.mulf %650, %643 : vector<12x12xf32>
    %652 = arith.addf %638, %651 : vector<12x12xf32>
    %653 = vector.broadcast %181 : f32 to vector<12x12xf32>
    %654 = arith.mulf %653, %643 : vector<12x12xf32>
    %655 = arith.addf %641, %654 : vector<12x12xf32>
    %c0_132 = arith.constant 0 : index
    %c1_133 = arith.constant 1 : index
    %c1_134 = arith.constant 1 : index
    %c2_135 = arith.constant 2 : index
    %656 = vector.load %arg3[%c0_132, %c1_133, %c1_134, %c2_135] : memref<1x2x16x16xf32, #tpu.memory_space<vmem>>, vector<1x1x12x12xf32>
    %657 = vector.shape_cast %656 : vector<1x1x12x12xf32> to vector<12x12xf32>
    %658 = vector.broadcast %32 : f32 to vector<12x12xf32>
    %659 = arith.mulf %658, %657 : vector<12x12xf32>
    %660 = arith.addf %646, %659 : vector<12x12xf32>
    %661 = vector.broadcast %82 : f32 to vector<12x12xf32>
    %662 = arith.mulf %661, %657 : vector<12x12xf32>
    %663 = arith.addf %649, %662 : vector<12x12xf32>
    %664 = vector.broadcast %132 : f32 to vector<12x12xf32>
    %665 = arith.mulf %664, %657 : vector<12x12xf32>
    %666 = arith.addf %652, %665 : vector<12x12xf32>
    %667 = vector.broadcast %182 : f32 to vector<12x12xf32>
    %668 = arith.mulf %667, %657 : vector<12x12xf32>
    %669 = arith.addf %655, %668 : vector<12x12xf32>
    %c0_136 = arith.constant 0 : index
    %c1_137 = arith.constant 1 : index
    %c1_138 = arith.constant 1 : index
    %c3_139 = arith.constant 3 : index
    %670 = vector.load %arg3[%c0_136, %c1_137, %c1_138, %c3_139] : memref<1x2x16x16xf32, #tpu.memory_space<vmem>>, vector<1x1x12x12xf32>
    %671 = vector.shape_cast %670 : vector<1x1x12x12xf32> to vector<12x12xf32>
    %672 = vector.broadcast %33 : f32 to vector<12x12xf32>
    %673 = arith.mulf %672, %671 : vector<12x12xf32>
    %674 = arith.addf %660, %673 : vector<12x12xf32>
    %675 = vector.broadcast %83 : f32 to vector<12x12xf32>
    %676 = arith.mulf %675, %671 : vector<12x12xf32>
    %677 = arith.addf %663, %676 : vector<12x12xf32>
    %678 = vector.broadcast %133 : f32 to vector<12x12xf32>
    %679 = arith.mulf %678, %671 : vector<12x12xf32>
    %680 = arith.addf %666, %679 : vector<12x12xf32>
    %681 = vector.broadcast %183 : f32 to vector<12x12xf32>
    %682 = arith.mulf %681, %671 : vector<12x12xf32>
    %683 = arith.addf %669, %682 : vector<12x12xf32>
    %c0_140 = arith.constant 0 : index
    %c1_141 = arith.constant 1 : index
    %c1_142 = arith.constant 1 : index
    %c4_143 = arith.constant 4 : index
    %684 = vector.load %arg3[%c0_140, %c1_141, %c1_142, %c4_143] : memref<1x2x16x16xf32, #tpu.memory_space<vmem>>, vector<1x1x12x12xf32>
    %685 = vector.shape_cast %684 : vector<1x1x12x12xf32> to vector<12x12xf32>
    %686 = vector.broadcast %34 : f32 to vector<12x12xf32>
    %687 = arith.mulf %686, %685 : vector<12x12xf32>
    %688 = arith.addf %674, %687 : vector<12x12xf32>
    %689 = vector.broadcast %84 : f32 to vector<12x12xf32>
    %690 = arith.mulf %689, %685 : vector<12x12xf32>
    %691 = arith.addf %677, %690 : vector<12x12xf32>
    %692 = vector.broadcast %134 : f32 to vector<12x12xf32>
    %693 = arith.mulf %692, %685 : vector<12x12xf32>
    %694 = arith.addf %680, %693 : vector<12x12xf32>
    %695 = vector.broadcast %184 : f32 to vector<12x12xf32>
    %696 = arith.mulf %695, %685 : vector<12x12xf32>
    %697 = arith.addf %683, %696 : vector<12x12xf32>
    %c0_144 = arith.constant 0 : index
    %c1_145 = arith.constant 1 : index
    %c2_146 = arith.constant 2 : index
    %c0_147 = arith.constant 0 : index
    %698 = vector.load %arg3[%c0_144, %c1_145, %c2_146, %c0_147] : memref<1x2x16x16xf32, #tpu.memory_space<vmem>>, vector<1x1x12x12xf32>
    %699 = vector.shape_cast %698 : vector<1x1x12x12xf32> to vector<12x12xf32>
    %700 = vector.broadcast %35 : f32 to vector<12x12xf32>
    %701 = arith.mulf %700, %699 : vector<12x12xf32>
    %702 = arith.addf %688, %701 : vector<12x12xf32>
    %703 = vector.broadcast %85 : f32 to vector<12x12xf32>
    %704 = arith.mulf %703, %699 : vector<12x12xf32>
    %705 = arith.addf %691, %704 : vector<12x12xf32>
    %706 = vector.broadcast %135 : f32 to vector<12x12xf32>
    %707 = arith.mulf %706, %699 : vector<12x12xf32>
    %708 = arith.addf %694, %707 : vector<12x12xf32>
    %709 = vector.broadcast %185 : f32 to vector<12x12xf32>
    %710 = arith.mulf %709, %699 : vector<12x12xf32>
    %711 = arith.addf %697, %710 : vector<12x12xf32>
    %c0_148 = arith.constant 0 : index
    %c1_149 = arith.constant 1 : index
    %c2_150 = arith.constant 2 : index
    %c1_151 = arith.constant 1 : index
    %712 = vector.load %arg3[%c0_148, %c1_149, %c2_150, %c1_151] : memref<1x2x16x16xf32, #tpu.memory_space<vmem>>, vector<1x1x12x12xf32>
    %713 = vector.shape_cast %712 : vector<1x1x12x12xf32> to vector<12x12xf32>
    %714 = vector.broadcast %36 : f32 to vector<12x12xf32>
    %715 = arith.mulf %714, %713 : vector<12x12xf32>
    %716 = arith.addf %702, %715 : vector<12x12xf32>
    %717 = vector.broadcast %86 : f32 to vector<12x12xf32>
    %718 = arith.mulf %717, %713 : vector<12x12xf32>
    %719 = arith.addf %705, %718 : vector<12x12xf32>
    %720 = vector.broadcast %136 : f32 to vector<12x12xf32>
    %721 = arith.mulf %720, %713 : vector<12x12xf32>
    %722 = arith.addf %708, %721 : vector<12x12xf32>
    %723 = vector.broadcast %186 : f32 to vector<12x12xf32>
    %724 = arith.mulf %723, %713 : vector<12x12xf32>
    %725 = arith.addf %711, %724 : vector<12x12xf32>
    %c0_152 = arith.constant 0 : index
    %c1_153 = arith.constant 1 : index
    %c2_154 = arith.constant 2 : index
    %c2_155 = arith.constant 2 : index
    %726 = vector.load %arg3[%c0_152, %c1_153, %c2_154, %c2_155] : memref<1x2x16x16xf32, #tpu.memory_space<vmem>>, vector<1x1x12x12xf32>
    %727 = vector.shape_cast %726 : vector<1x1x12x12xf32> to vector<12x12xf32>
    %728 = vector.broadcast %37 : f32 to vector<12x12xf32>
    %729 = arith.mulf %728, %727 : vector<12x12xf32>
    %730 = arith.addf %716, %729 : vector<12x12xf32>
    %731 = vector.broadcast %87 : f32 to vector<12x12xf32>
    %732 = arith.mulf %731, %727 : vector<12x12xf32>
    %733 = arith.addf %719, %732 : vector<12x12xf32>
    %734 = vector.broadcast %137 : f32 to vector<12x12xf32>
    %735 = arith.mulf %734, %727 : vector<12x12xf32>
    %736 = arith.addf %722, %735 : vector<12x12xf32>
    %737 = vector.broadcast %187 : f32 to vector<12x12xf32>
    %738 = arith.mulf %737, %727 : vector<12x12xf32>
    %739 = arith.addf %725, %738 : vector<12x12xf32>
    %c0_156 = arith.constant 0 : index
    %c1_157 = arith.constant 1 : index
    %c2_158 = arith.constant 2 : index
    %c3_159 = arith.constant 3 : index
    %740 = vector.load %arg3[%c0_156, %c1_157, %c2_158, %c3_159] : memref<1x2x16x16xf32, #tpu.memory_space<vmem>>, vector<1x1x12x12xf32>
    %741 = vector.shape_cast %740 : vector<1x1x12x12xf32> to vector<12x12xf32>
    %742 = vector.broadcast %38 : f32 to vector<12x12xf32>
    %743 = arith.mulf %742, %741 : vector<12x12xf32>
    %744 = arith.addf %730, %743 : vector<12x12xf32>
    %745 = vector.broadcast %88 : f32 to vector<12x12xf32>
    %746 = arith.mulf %745, %741 : vector<12x12xf32>
    %747 = arith.addf %733, %746 : vector<12x12xf32>
    %748 = vector.broadcast %138 : f32 to vector<12x12xf32>
    %749 = arith.mulf %748, %741 : vector<12x12xf32>
    %750 = arith.addf %736, %749 : vector<12x12xf32>
    %751 = vector.broadcast %188 : f32 to vector<12x12xf32>
    %752 = arith.mulf %751, %741 : vector<12x12xf32>
    %753 = arith.addf %739, %752 : vector<12x12xf32>
    %c0_160 = arith.constant 0 : index
    %c1_161 = arith.constant 1 : index
    %c2_162 = arith.constant 2 : index
    %c4_163 = arith.constant 4 : index
    %754 = vector.load %arg3[%c0_160, %c1_161, %c2_162, %c4_163] : memref<1x2x16x16xf32, #tpu.memory_space<vmem>>, vector<1x1x12x12xf32>
    %755 = vector.shape_cast %754 : vector<1x1x12x12xf32> to vector<12x12xf32>
    %756 = vector.broadcast %39 : f32 to vector<12x12xf32>
    %757 = arith.mulf %756, %755 : vector<12x12xf32>
    %758 = arith.addf %744, %757 : vector<12x12xf32>
    %759 = vector.broadcast %89 : f32 to vector<12x12xf32>
    %760 = arith.mulf %759, %755 : vector<12x12xf32>
    %761 = arith.addf %747, %760 : vector<12x12xf32>
    %762 = vector.broadcast %139 : f32 to vector<12x12xf32>
    %763 = arith.mulf %762, %755 : vector<12x12xf32>
    %764 = arith.addf %750, %763 : vector<12x12xf32>
    %765 = vector.broadcast %189 : f32 to vector<12x12xf32>
    %766 = arith.mulf %765, %755 : vector<12x12xf32>
    %767 = arith.addf %753, %766 : vector<12x12xf32>
    %c0_164 = arith.constant 0 : index
    %c1_165 = arith.constant 1 : index
    %c3_166 = arith.constant 3 : index
    %c0_167 = arith.constant 0 : index
    %768 = vector.load %arg3[%c0_164, %c1_165, %c3_166, %c0_167] : memref<1x2x16x16xf32, #tpu.memory_space<vmem>>, vector<1x1x12x12xf32>
    %769 = vector.shape_cast %768 : vector<1x1x12x12xf32> to vector<12x12xf32>
    %770 = vector.broadcast %40 : f32 to vector<12x12xf32>
    %771 = arith.mulf %770, %769 : vector<12x12xf32>
    %772 = arith.addf %758, %771 : vector<12x12xf32>
    %773 = vector.broadcast %90 : f32 to vector<12x12xf32>
    %774 = arith.mulf %773, %769 : vector<12x12xf32>
    %775 = arith.addf %761, %774 : vector<12x12xf32>
    %776 = vector.broadcast %140 : f32 to vector<12x12xf32>
    %777 = arith.mulf %776, %769 : vector<12x12xf32>
    %778 = arith.addf %764, %777 : vector<12x12xf32>
    %779 = vector.broadcast %190 : f32 to vector<12x12xf32>
    %780 = arith.mulf %779, %769 : vector<12x12xf32>
    %781 = arith.addf %767, %780 : vector<12x12xf32>
    %c0_168 = arith.constant 0 : index
    %c1_169 = arith.constant 1 : index
    %c3_170 = arith.constant 3 : index
    %c1_171 = arith.constant 1 : index
    %782 = vector.load %arg3[%c0_168, %c1_169, %c3_170, %c1_171] : memref<1x2x16x16xf32, #tpu.memory_space<vmem>>, vector<1x1x12x12xf32>
    %783 = vector.shape_cast %782 : vector<1x1x12x12xf32> to vector<12x12xf32>
    %784 = vector.broadcast %41 : f32 to vector<12x12xf32>
    %785 = arith.mulf %784, %783 : vector<12x12xf32>
    %786 = arith.addf %772, %785 : vector<12x12xf32>
    %787 = vector.broadcast %91 : f32 to vector<12x12xf32>
    %788 = arith.mulf %787, %783 : vector<12x12xf32>
    %789 = arith.addf %775, %788 : vector<12x12xf32>
    %790 = vector.broadcast %141 : f32 to vector<12x12xf32>
    %791 = arith.mulf %790, %783 : vector<12x12xf32>
    %792 = arith.addf %778, %791 : vector<12x12xf32>
    %793 = vector.broadcast %191 : f32 to vector<12x12xf32>
    %794 = arith.mulf %793, %783 : vector<12x12xf32>
    %795 = arith.addf %781, %794 : vector<12x12xf32>
    %c0_172 = arith.constant 0 : index
    %c1_173 = arith.constant 1 : index
    %c3_174 = arith.constant 3 : index
    %c2_175 = arith.constant 2 : index
    %796 = vector.load %arg3[%c0_172, %c1_173, %c3_174, %c2_175] : memref<1x2x16x16xf32, #tpu.memory_space<vmem>>, vector<1x1x12x12xf32>
    %797 = vector.shape_cast %796 : vector<1x1x12x12xf32> to vector<12x12xf32>
    %798 = vector.broadcast %42 : f32 to vector<12x12xf32>
    %799 = arith.mulf %798, %797 : vector<12x12xf32>
    %800 = arith.addf %786, %799 : vector<12x12xf32>
    %801 = vector.broadcast %92 : f32 to vector<12x12xf32>
    %802 = arith.mulf %801, %797 : vector<12x12xf32>
    %803 = arith.addf %789, %802 : vector<12x12xf32>
    %804 = vector.broadcast %142 : f32 to vector<12x12xf32>
    %805 = arith.mulf %804, %797 : vector<12x12xf32>
    %806 = arith.addf %792, %805 : vector<12x12xf32>
    %807 = vector.broadcast %192 : f32 to vector<12x12xf32>
    %808 = arith.mulf %807, %797 : vector<12x12xf32>
    %809 = arith.addf %795, %808 : vector<12x12xf32>
    %c0_176 = arith.constant 0 : index
    %c1_177 = arith.constant 1 : index
    %c3_178 = arith.constant 3 : index
    %c3_179 = arith.constant 3 : index
    %810 = vector.load %arg3[%c0_176, %c1_177, %c3_178, %c3_179] : memref<1x2x16x16xf32, #tpu.memory_space<vmem>>, vector<1x1x12x12xf32>
    %811 = vector.shape_cast %810 : vector<1x1x12x12xf32> to vector<12x12xf32>
    %812 = vector.broadcast %43 : f32 to vector<12x12xf32>
    %813 = arith.mulf %812, %811 : vector<12x12xf32>
    %814 = arith.addf %800, %813 : vector<12x12xf32>
    %815 = vector.broadcast %93 : f32 to vector<12x12xf32>
    %816 = arith.mulf %815, %811 : vector<12x12xf32>
    %817 = arith.addf %803, %816 : vector<12x12xf32>
    %818 = vector.broadcast %143 : f32 to vector<12x12xf32>
    %819 = arith.mulf %818, %811 : vector<12x12xf32>
    %820 = arith.addf %806, %819 : vector<12x12xf32>
    %821 = vector.broadcast %193 : f32 to vector<12x12xf32>
    %822 = arith.mulf %821, %811 : vector<12x12xf32>
    %823 = arith.addf %809, %822 : vector<12x12xf32>
    %c0_180 = arith.constant 0 : index
    %c1_181 = arith.constant 1 : index
    %c3_182 = arith.constant 3 : index
    %c4_183 = arith.constant 4 : index
    %824 = vector.load %arg3[%c0_180, %c1_181, %c3_182, %c4_183] : memref<1x2x16x16xf32, #tpu.memory_space<vmem>>, vector<1x1x12x12xf32>
    %825 = vector.shape_cast %824 : vector<1x1x12x12xf32> to vector<12x12xf32>
    %826 = vector.broadcast %44 : f32 to vector<12x12xf32>
    %827 = arith.mulf %826, %825 : vector<12x12xf32>
    %828 = arith.addf %814, %827 : vector<12x12xf32>
    %829 = vector.broadcast %94 : f32 to vector<12x12xf32>
    %830 = arith.mulf %829, %825 : vector<12x12xf32>
    %831 = arith.addf %817, %830 : vector<12x12xf32>
    %832 = vector.broadcast %144 : f32 to vector<12x12xf32>
    %833 = arith.mulf %832, %825 : vector<12x12xf32>
    %834 = arith.addf %820, %833 : vector<12x12xf32>
    %835 = vector.broadcast %194 : f32 to vector<12x12xf32>
    %836 = arith.mulf %835, %825 : vector<12x12xf32>
    %837 = arith.addf %823, %836 : vector<12x12xf32>
    %c0_184 = arith.constant 0 : index
    %c1_185 = arith.constant 1 : index
    %c4_186 = arith.constant 4 : index
    %c0_187 = arith.constant 0 : index
    %838 = vector.load %arg3[%c0_184, %c1_185, %c4_186, %c0_187] : memref<1x2x16x16xf32, #tpu.memory_space<vmem>>, vector<1x1x12x12xf32>
    %839 = vector.shape_cast %838 : vector<1x1x12x12xf32> to vector<12x12xf32>
    %840 = vector.broadcast %45 : f32 to vector<12x12xf32>
    %841 = arith.mulf %840, %839 : vector<12x12xf32>
    %842 = arith.addf %828, %841 : vector<12x12xf32>
    %843 = vector.broadcast %95 : f32 to vector<12x12xf32>
    %844 = arith.mulf %843, %839 : vector<12x12xf32>
    %845 = arith.addf %831, %844 : vector<12x12xf32>
    %846 = vector.broadcast %145 : f32 to vector<12x12xf32>
    %847 = arith.mulf %846, %839 : vector<12x12xf32>
    %848 = arith.addf %834, %847 : vector<12x12xf32>
    %849 = vector.broadcast %195 : f32 to vector<12x12xf32>
    %850 = arith.mulf %849, %839 : vector<12x12xf32>
    %851 = arith.addf %837, %850 : vector<12x12xf32>
    %c0_188 = arith.constant 0 : index
    %c1_189 = arith.constant 1 : index
    %c4_190 = arith.constant 4 : index
    %c1_191 = arith.constant 1 : index
    %852 = vector.load %arg3[%c0_188, %c1_189, %c4_190, %c1_191] : memref<1x2x16x16xf32, #tpu.memory_space<vmem>>, vector<1x1x12x12xf32>
    %853 = vector.shape_cast %852 : vector<1x1x12x12xf32> to vector<12x12xf32>
    %854 = vector.broadcast %46 : f32 to vector<12x12xf32>
    %855 = arith.mulf %854, %853 : vector<12x12xf32>
    %856 = arith.addf %842, %855 : vector<12x12xf32>
    %857 = vector.broadcast %96 : f32 to vector<12x12xf32>
    %858 = arith.mulf %857, %853 : vector<12x12xf32>
    %859 = arith.addf %845, %858 : vector<12x12xf32>
    %860 = vector.broadcast %146 : f32 to vector<12x12xf32>
    %861 = arith.mulf %860, %853 : vector<12x12xf32>
    %862 = arith.addf %848, %861 : vector<12x12xf32>
    %863 = vector.broadcast %196 : f32 to vector<12x12xf32>
    %864 = arith.mulf %863, %853 : vector<12x12xf32>
    %865 = arith.addf %851, %864 : vector<12x12xf32>
    %c0_192 = arith.constant 0 : index
    %c1_193 = arith.constant 1 : index
    %c4_194 = arith.constant 4 : index
    %c2_195 = arith.constant 2 : index
    %866 = vector.load %arg3[%c0_192, %c1_193, %c4_194, %c2_195] : memref<1x2x16x16xf32, #tpu.memory_space<vmem>>, vector<1x1x12x12xf32>
    %867 = vector.shape_cast %866 : vector<1x1x12x12xf32> to vector<12x12xf32>
    %868 = vector.broadcast %47 : f32 to vector<12x12xf32>
    %869 = arith.mulf %868, %867 : vector<12x12xf32>
    %870 = arith.addf %856, %869 : vector<12x12xf32>
    %871 = vector.broadcast %97 : f32 to vector<12x12xf32>
    %872 = arith.mulf %871, %867 : vector<12x12xf32>
    %873 = arith.addf %859, %872 : vector<12x12xf32>
    %874 = vector.broadcast %147 : f32 to vector<12x12xf32>
    %875 = arith.mulf %874, %867 : vector<12x12xf32>
    %876 = arith.addf %862, %875 : vector<12x12xf32>
    %877 = vector.broadcast %197 : f32 to vector<12x12xf32>
    %878 = arith.mulf %877, %867 : vector<12x12xf32>
    %879 = arith.addf %865, %878 : vector<12x12xf32>
    %c0_196 = arith.constant 0 : index
    %c1_197 = arith.constant 1 : index
    %c4_198 = arith.constant 4 : index
    %c3_199 = arith.constant 3 : index
    %880 = vector.load %arg3[%c0_196, %c1_197, %c4_198, %c3_199] : memref<1x2x16x16xf32, #tpu.memory_space<vmem>>, vector<1x1x12x12xf32>
    %881 = vector.shape_cast %880 : vector<1x1x12x12xf32> to vector<12x12xf32>
    %882 = vector.broadcast %48 : f32 to vector<12x12xf32>
    %883 = arith.mulf %882, %881 : vector<12x12xf32>
    %884 = arith.addf %870, %883 : vector<12x12xf32>
    %885 = vector.broadcast %98 : f32 to vector<12x12xf32>
    %886 = arith.mulf %885, %881 : vector<12x12xf32>
    %887 = arith.addf %873, %886 : vector<12x12xf32>
    %888 = vector.broadcast %148 : f32 to vector<12x12xf32>
    %889 = arith.mulf %888, %881 : vector<12x12xf32>
    %890 = arith.addf %876, %889 : vector<12x12xf32>
    %891 = vector.broadcast %198 : f32 to vector<12x12xf32>
    %892 = arith.mulf %891, %881 : vector<12x12xf32>
    %893 = arith.addf %879, %892 : vector<12x12xf32>
    %c0_200 = arith.constant 0 : index
    %c1_201 = arith.constant 1 : index
    %c4_202 = arith.constant 4 : index
    %c4_203 = arith.constant 4 : index
    %894 = vector.load %arg3[%c0_200, %c1_201, %c4_202, %c4_203] : memref<1x2x16x16xf32, #tpu.memory_space<vmem>>, vector<1x1x12x12xf32>
    %895 = vector.shape_cast %894 : vector<1x1x12x12xf32> to vector<12x12xf32>
    %896 = vector.broadcast %49 : f32 to vector<12x12xf32>
    %897 = arith.mulf %896, %895 : vector<12x12xf32>
    %898 = arith.addf %884, %897 : vector<12x12xf32>
    %899 = vector.broadcast %99 : f32 to vector<12x12xf32>
    %900 = arith.mulf %899, %895 : vector<12x12xf32>
    %901 = arith.addf %887, %900 : vector<12x12xf32>
    %902 = vector.broadcast %149 : f32 to vector<12x12xf32>
    %903 = arith.mulf %902, %895 : vector<12x12xf32>
    %904 = arith.addf %890, %903 : vector<12x12xf32>
    %905 = vector.broadcast %199 : f32 to vector<12x12xf32>
    %906 = arith.mulf %905, %895 : vector<12x12xf32>
    %907 = arith.addf %893, %906 : vector<12x12xf32>
    %c0_204 = arith.constant 0 : index
    %c0_205 = arith.constant 0 : index
    %c0_206 = arith.constant 0 : index
    %c0_207 = arith.constant 0 : index
    %908 = vector.load %arg4[%c0_204, %c0_205, %c0_206, %c0_207] : memref<1x4x12x12xf32, #tpu.memory_space<vmem>>, vector<1x1x12x12xf32>
    %909 = vector.shape_cast %908 : vector<1x1x12x12xf32> to vector<12x12xf32>
    %910 = vector.shape_cast %898 : vector<12x12xf32> to vector<1x1x12x12xf32>
    tpu.vector_store %arg4[%c0_204, %c0_205, %c0_206, %c0_207], %910 {strides = array<i32>} : memref<1x4x12x12xf32, #tpu.memory_space<vmem>>, vector<1x1x12x12xf32>,
    %c0_208 = arith.constant 0 : index
    %c1_209 = arith.constant 1 : index
    %c0_210 = arith.constant 0 : index
    %c0_211 = arith.constant 0 : index
    %911 = vector.load %arg4[%c0_208, %c1_209, %c0_210, %c0_211] : memref<1x4x12x12xf32, #tpu.memory_space<vmem>>, vector<1x1x12x12xf32>
    %912 = vector.shape_cast %911 : vector<1x1x12x12xf32> to vector<12x12xf32>
    %913 = vector.shape_cast %901 : vector<12x12xf32> to vector<1x1x12x12xf32>
    tpu.vector_store %arg4[%c0_208, %c1_209, %c0_210, %c0_211], %913 {strides = array<i32>} : memref<1x4x12x12xf32, #tpu.memory_space<vmem>>, vector<1x1x12x12xf32>,
    %c0_212 = arith.constant 0 : index
    %c2_213 = arith.constant 2 : index
    %c0_214 = arith.constant 0 : index
    %c0_215 = arith.constant 0 : index
    %914 = vector.load %arg4[%c0_212, %c2_213, %c0_214, %c0_215] : memref<1x4x12x12xf32, #tpu.memory_space<vmem>>, vector<1x1x12x12xf32>
    %915 = vector.shape_cast %914 : vector<1x1x12x12xf32> to vector<12x12xf32>
    %916 = vector.shape_cast %904 : vector<12x12xf32> to vector<1x1x12x12xf32>
    tpu.vector_store %arg4[%c0_212, %c2_213, %c0_214, %c0_215], %916 {strides = array<i32>} : memref<1x4x12x12xf32, #tpu.memory_space<vmem>>, vector<1x1x12x12xf32>,
    %c0_216 = arith.constant 0 : index
    %c3_217 = arith.constant 3 : index
    %c0_218 = arith.constant 0 : index
    %c0_219 = arith.constant 0 : index
    %917 = vector.load %arg4[%c0_216, %c3_217, %c0_218, %c0_219] : memref<1x4x12x12xf32, #tpu.memory_space<vmem>>, vector<1x1x12x12xf32>
    %918 = vector.shape_cast %917 : vector<1x1x12x12xf32> to vector<12x12xf32>
    %919 = vector.shape_cast %907 : vector<12x12xf32> to vector<1x1x12x12xf32>
    tpu.vector_store %arg4[%c0_216, %c3_217, %c0_218, %c0_219], %919 {strides = array<i32>} : memref<1x4x12x12xf32, #tpu.memory_space<vmem>>, vector<1x1x12x12xf32>,
    return
  }
  func.func @transform_0(%arg0: i32) -> i32 {
    %c0_i32 = arith.constant 0 : i32
    %c0_i32_0 = arith.constant 0 : i32
    return %c0_i32 : i32
  }
  func.func @transform_1(%arg0: i32) -> i32 {
    %c0_i32 = arith.constant 0 : i32
    %c0_i32_0 = arith.constant 0 : i32
    return %c0_i32 : i32
  }
  func.func @transform_2(%arg0: i32) -> (i32, i32, i32, i32) {
    %c0_i32 = arith.constant 0 : i32
    %c0_i32_0 = arith.constant 0 : i32
    %c0_i32_1 = arith.constant 0 : i32
    %c0_i32_2 = arith.constant 0 : i32
    return %arg0, %c0_i32, %c0_i32_0, %c0_i32_1 : i32, i32, i32, i32
  }
  func.func @transform_3(%arg0: i32) -> (i32, i32, i32, i32) {
    %c0_i32 = arith.constant 0 : i32
    %c0_i32_0 = arith.constant 0 : i32
    %c0_i32_1 = arith.constant 0 : i32
    %c0_i32_2 = arith.constant 0 : i32
    return %arg0, %c0_i32, %c0_i32_0, %c0_i32_1 : i32, i32, i32, i32
  }
}

</mosaic_0001>

<bundles_post_ra>
// kernel: custom_conv_forward.1
= control target key start
LH: loop header
LB: loop body
LE: loop exit
PB: predicated region body
PF: predicated region fallthrough
CT: control target
= control target key end

     0   :  { %8 = vsyncpa [#allocation3], 0  ;;  %s5063_s0 = inlined_call_operand.vmem [shape: f32[200], index: 0, kind: input, shape index: {}]   ;;  %s5064_s1 = inlined_call_operand.vmem [shape: f32[4], index: 1, kind: input, shape index: {}]   ;;  %s5065_s2 = inlined_call_operand.vmem [shape: f32[2,2,16,16], index: 2, kind: input, shape index: {}]   ;;  %s5066_s3 = inlined_call_operand.vmem [shape: f32[2,4,12,12], index: 3, kind: output, shape index: {}]  }
   0x1   :  { %9 = vsyncpa [#allocation5], 0  ;;  %s3149_s12 = smov 0  }
   0x2 LB: > { %s3155_s13 = sadd.s32 4294967295, %s3121_s12   ;;  %p2799_p0 = scmp.ge.s32.totalorder %s3121_s12, 1  ;;  %s3121_s12 = sphi %s3149_s12, %s15_s12  }
   0x3   : > { %p114_p1 = scmp.lt.s32.totalorder %s3121_s12, 3  ;;  %s127_s16 = sshll.u32 %s5063_s0, 4  ;;  %s128_s16 = int_to_ptr.vmem [resolvable:$true] %s127_s16 }
   0x4   : > { %p5067_p3 = scmp.eq.s32.totalorder %s3155_s13, 0  ;;  %s138_s20 = sshll.u32 %s5064_s1, 4  ;;  %s139_s20 = int_to_ptr.vmem [resolvable:$true] %s138_s20 }
   0x5   : > { %p3162_p2 = pnand %p2799_p0, %p114_p1  ;;  %s3077_s22 = scalar_lea.vmem %s128_s16, 32 }
   0x6   : > { %p3078_p6 = scmp.ne.s32.totalorder %s128_s16, %s3077_s22  ;;  %p3085_p10 = scmp.lt.s32.totalorder %s128_s16, %s128_s16 }
   0x7   : > { %s5075_s17 = scalar_select %p3162_p2, 1, 0 }
   0x8   : > { %p3040_p4 = pneg %p3162_p2  ;;  %p3086_p11 = scmp.lt.s32.totalorder %s3077_s22, %s3077_s22 }
   0xa   : > { %p3174_p5 = pnand %p5067_p3, %p3040_p4  ;;  %p3087_p12 = por %p3086_p11, %p3085_p10 }
   0xc   : > { %p3079_p7 = pneg %p3174_p5 }
   0xe   : > { %p3080_p8 = pnand %p3079_p7, %p3078_p6 }
  0x10   : > { %p3081_p9 = pneg %p3080_p8 }
  0x12   : > { %p3088_p13 = pnand %p3087_p12, %p3081_p9 }
  0x14   : > { %3091 = shalt.err (!%p3088_p13)
}
  0x15   : > { %s3123_s23 = smov [#allocation2]   ;;  %s3092_s24 = scalar_lea.vmem %s139_s20, 16 }
  0x16   : > { %3043 = dma.vmem_to_smem (!%p3174_p5), %s128_s16, 32, %s3123_s23, [#allocation3]  }
  0x17   : > { %p3093_p0 = scmp.ne.s32.totalorder %s139_s20, %s3092_s24  ;;  %p3100_p3 = scmp.lt.s32.totalorder %s139_s20, %s139_s20 }
  0x18   : > { %p3101_p2 = scmp.lt.s32.totalorder %s3092_s24, %s3092_s24 }
  0x19   : > { %p3095_p1 = pnand %p3093_p0, %p3079_p7 }
  0x1a   : > { %p3102_p6 = por %p3101_p2, %p3100_p3 }
  0x1b   : > { %p3096_p4 = pneg %p3095_p1 }
  0x1d   : > { %p3103_p8 = pnand %p3102_p6, %p3096_p4 }
  0x1f   : > { %3106 = shalt.err (!%p3103_p8)
}
  0x20   : > { %s3124_s25 = smov [#allocation4]   ;;  %p5077_p9 = scmp.ne.s32.totalorder %s5075_s17, 0 }
  0x21   : > { %3046 = dma.vmem_to_smem (!%p3174_p5), %s139_s20, 16, %s3124_s25, [#allocation5]  }
  0x22   : > { %159 = sbr.rel (%p5077_p9) target bundleno = 812 (0x32c), region = 32 }
  0x27   : > { %p5078_p10 = scmp.eq.s32.totalorder %s3155_s13, 0 }
  0x29   : > { %3112 = dma.done.wait (%p5078_p10), [#allocation3], 32   ;;  %p5079_p11 = pmov %p5078_p10 }
  0x2a   : > { %p5080_p7 = pmov %p5078_p10 }
  0x2b   : > { %3114 = vsyncadd (%p5079_p11), [#allocation3], 4294967264 }
  0x2c   : > { %3116 = dma.done.wait (%p5080_p7), [#allocation5], 16   ;;  %p5081_p2 = pmov %p5080_p7 }
  0x2e   : > { %3118 = vsyncadd (%p5081_p2), [#allocation5], 4294967280 }
  0x2f   : > { %169 = sfence }
  0x30   : > { %p188_p3 = scmp.lt.s32.totalorder %s3155_s13, 1  ;;  %s2860_s26 = sld [smem:[#allocation2 + $0x33]]  ;;  %vm2709_vm0 = vcmask 93184   ;;  %vm2707_vm1 = vcmask 97280  }
  0x31   : > { %s2810_s27 = sld [smem:[#allocation2 + $0x1]]  ;;  %s3125_s7 = smov 127  }
  0x32   : > { %s5365_s13 = smov (!%p188_p3, %s3155_s13), 1  ;;  %s2910_s28 = sld [smem:[#allocation2 + $0x65]] }
  0x33   : > { %s3030_s29 = sshll.u32 %s5365_s13, 5  ;;  %s2960_s6 = sld [smem:[#allocation2 + $0x97]] }
  0x34   : > { %s3202_s5 = scalar_lea.vmem %s5065_s2, %s3030_s29  ;;  %s2811_s8 = sld [smem:[#allocation2 + $0x2]] }
  0x35   : > { %v3205_v0 = vld [vmem:[%s3202_s5] sm:$0xff]  ;;  %v3208_v1 = vld [vmem:[%s3202_s5 + $0x8] sm:$0xf]  ;;  %s2861_s9 = sld [smem:[#allocation2 + $0x34]]  ;;  %s3126_s14 = smov 126  }
  0x36   : > { %v441_v2 = vstv %s2860_s26  ;;  %s2911_s10 = sld [smem:[#allocation2 + $0x66]]  ;;  %s3127_s19 = smov 125   ;;  %v3273_v50 = vld [vmem:[%s3202_s5 + $0x9] sm:$0xf]  ;;  %v3276_v52 = vld [vmem:[%s3202_s5 + $0x1] sm:$0xff] }
  0x37   : > { %v442_v3 = vmul.f32 %v441_v2, %v3205_v0  ;;  %v428_v4 = vstv %s2810_s27  ;;  %v443_v6 = vmul.f32 %v441_v2, %v3208_v1  ;;  %s2961_s11 = sld [smem:[#allocation2 + $0x98]]  ;;  %s3128_s24 = smov 124  }
  0x38   : > { %v429_v5 = vmul.f32 %v428_v4, %v3205_v0  ;;  %v430_v7 = vmul.f32 %v428_v4, %v3208_v1  ;;  %v454_v8 = vstv %s2910_s28  ;;  %s2812_s15 = sld [smem:[#allocation2 + $0x3]] }
  0x39   : > { %446 = vrot.lane.b32.xlu1 %v442_v3, %s3125_s7  ;;  %v456_v9 = vmul.f32 %v454_v8, %v3208_v1  ;;  %v455_v10 = vmul.f32 %v454_v8, %v3205_v0  ;;  %v467_v11 = vstv %s2960_s6  ;;  %s2862_s16 = sld [smem:[#allocation2 + $0x35]] }
  0x3a   : > { %433 = vrot.lane.b32.xlu0 %v429_v5, %s3125_s7  ;;  %v469_v12 = vmul.f32 %v467_v11, %v3208_v1  ;;  %v468_v13 = vmul.f32 %v467_v11, %v3205_v0  ;;  %v480_v14 = vstv %s2811_s8  ;;  %s2912_s17 = sld [smem:[#allocation2 + $0x67]] }
  0x3b   : > { %v482_v15 = vmul.f32 %v480_v14, %v3208_v1  ;;  %v481_v16 = vmul.f32 %v480_v14, %v3205_v0  ;;  %v493_v17 = vstv %s2861_s9  ;;  %s2962_s18 = sld [smem:[#allocation2 + $0x99]] }
  0x3c   : > { %v495_v18 = vmul.f32 %v493_v17, %v3208_v1  ;;  %v494_v19 = vmul.f32 %v493_v17, %v3205_v0  ;;  %v506_v20 = vstv %s2911_s10  ;;  %s2813_s20 = sld [smem:[#allocation2 + $0x4]] }
  0x3d   : > { %448 = vrot.lane.b32.xlu1 %v443_v6, %s3125_s7  ;;  %v508_v21 = vmul.f32 %v506_v20, %v3208_v1  ;;  %v507_v22 = vmul.f32 %v506_v20, %v3205_v0  ;;  %v519_v23 = vstv %s2961_s11  ;;  %s2863_s21 = sld [smem:[#allocation2 + $0x36]] }
  0x3e   : > { %435 = vrot.lane.b32.xlu0 %v430_v7, %s3125_s7  ;;  %v521_v24 = vmul.f32 %v519_v23, %v3208_v1  ;;  %v520_v25 = vmul.f32 %v519_v23, %v3205_v0  ;;  %v532_v26 = vstv %s2812_s15  ;;  %s2913_s22 = sld [smem:[#allocation2 + $0x68]] }
  0x3f   : > { %v534_v27 = vmul.f32 %v532_v26, %v3208_v1  ;;  %v533_v28 = vmul.f32 %v532_v26, %v3205_v0  ;;  %v545_v29 = vstv %s2862_s16  ;;  %s2963_s23 = sld [smem:[#allocation2 + $0x9a]] }
  0x40   : > { %v547_v30 = vmul.f32 %v545_v29, %v3208_v1  ;;  %v546_v31 = vmul.f32 %v545_v29, %v3205_v0  ;;  %v558_v32 = vstv %s2912_s17  ;;  %s2815_s25 = sld [smem:[#allocation2 + $0x6]] }
  0x41   : > { %461 = vrot.lane.b32.xlu1 %v456_v9, %s3125_s7  ;;  %v560_v33 = vmul.f32 %v558_v32, %v3208_v1  ;;  %v559_v34 = vmul.f32 %v558_v32, %v3205_v0  ;;  %v571_v35 = vstv %s2962_s18  ;;  %s2865_s26 = sld [smem:[#allocation2 + $0x38]] }
  0x42   : > { %459 = vrot.lane.b32.xlu0 %v455_v10, %s3125_s7  ;;  %v573_v36 = vmul.f32 %v571_v35, %v3208_v1  ;;  %v572_v37 = vmul.f32 %v571_v35, %v3205_v0  ;;  %v584_v38 = vstv %s2813_s20  ;;  %s2915_s27 = sld [smem:[#allocation2 + $0x6a]] }
  0x43   : > { %v586_v39 = vmul.f32 %v584_v38, %v3208_v1  ;;  %v585_v40 = vmul.f32 %v584_v38, %v3205_v0  ;;  %v597_v41 = vstv %s2863_s21  ;;  %s2965_s28 = sld [smem:[#allocation2 + $0x9c]] }
  0x44   : > { %v599_v42 = vmul.f32 %v597_v41, %v3208_v1  ;;  %v598_v43 = vmul.f32 %v597_v41, %v3205_v0  ;;  %v610_v44 = vstv %s2913_s22  ;;  %s2816_s29 = sld [smem:[#allocation2 + $0x7]] }
  0x45   : > { %474 = vrot.lane.b32.xlu1 %v469_v12, %s3125_s7  ;;  %v612_v45 = vmul.f32 %v610_v44, %v3208_v1  ;;  %v611_v46 = vmul.f32 %v610_v44, %v3205_v0  ;;  %v623_v47 = vstv %s2963_s23  ;;  %s2866_s30 = sld [smem:[#allocation2 + $0x39]] }
  0x46   : > { %472 = vrot.lane.b32.xlu0 %v468_v13, %s3125_s7  ;;  %v625_v48 = vmul.f32 %v623_v47, %v3208_v1  ;;  %v624_v49 = vmul.f32 %v623_v47, %v3205_v0  ;;  %v658_v51 = vstv %s2815_s25  ;;  %s2916_s4 = sld [smem:[#allocation2 + $0x6b]] }
  0x47   : > { %v660_v53 = vmul.f32 %v658_v51, %v3273_v50  ;;  %v659_v54 = vmul.f32 %v658_v51, %v3276_v52  ;;  %v671_v55 = vstv %s2865_s26  ;;  %s2966_s6 = sld [smem:[#allocation2 + $0x9d]] }
  0x48   : > { %v673_v56 = vmul.f32 %v671_v55, %v3273_v50  ;;  %v672_v57 = vmul.f32 %v671_v55, %v3276_v52  ;;  %v684_v58 = vstv %s2915_s27  ;;  %s2817_s8 = sld [smem:[#allocation2 + $0x8]] }
  0x49   : > { %487 = vrot.lane.b32.xlu1 %v482_v15, %s3126_s14  ;;  %v686_v59 = vmul.f32 %v684_v58, %v3273_v50  ;;  %v685_v60 = vmul.f32 %v684_v58, %v3276_v52  ;;  %v697_v61 = vstv %s2965_s28  ;;  %s2867_s9 = sld [smem:[#allocation2 + $0x3a]] }
  0x4a   : > { %485 = vrot.lane.b32.xlu0 %v481_v16, %s3126_s14  ;;  %v699_v62 = vmul.f32 %v697_v61, %v3273_v50  ;;  %v698_v63 = vmul.f32 %v697_v61, %v3276_v52  ;;  %v710_v2 = vstv %s2816_s29  ;;  %s2917_s10 = sld [smem:[#allocation2 + $0x6c]] }
  0x4b   : > { %v712_v3 = vmul.f32 %v710_v2, %v3273_v50  ;;  %v711_v4 = vmul.f32 %v710_v2, %v3276_v52  ;;  %v723_v5 = vstv %s2866_s30  ;;  %s2967_s11 = sld [smem:[#allocation2 + $0x9e]] }
  0x4c   : > { %v725_v6 = vmul.f32 %v723_v5, %v3273_v50  ;;  %v724_v7 = vmul.f32 %v723_v5, %v3276_v52  ;;  %v736_v8 = vstv %s2916_s4  ;;  %s2818_s15 = sld [smem:[#allocation2 + $0x9]] }
  0x4d   : > { %500 = vrot.lane.b32.xlu1 %v495_v18, %s3126_s14  ;;  %v738_v9 = vmul.f32 %v736_v8, %v3273_v50  ;;  %v737_v10 = vmul.f32 %v736_v8, %v3276_v52  ;;  %v749_v11 = vstv %s2966_s6  ;;  %s2868_s16 = sld [smem:[#allocation2 + $0x3b]] }
  0x4e   : > { %498 = vrot.lane.b32.xlu0 %v494_v19, %s3126_s14  ;;  %v751_v12 = vmul.f32 %v749_v11, %v3273_v50  ;;  %v750_v13 = vmul.f32 %v749_v11, %v3276_v52  ;;  %v762_v14 = vstv %s2817_s8  ;;  %s2918_s17 = sld [smem:[#allocation2 + $0x6d]] }
  0x4f   : > { %v764_v15 = vmul.f32 %v762_v14, %v3273_v50  ;;  %v763_v16 = vmul.f32 %v762_v14, %v3276_v52  ;;  %v775_v17 = vstv %s2867_s9  ;;  %s2968_s18 = sld [smem:[#allocation2 + $0x9f]] }
  0x50   : > { %v777_v18 = vmul.f32 %v775_v17, %v3273_v50  ;;  %v776_v19 = vmul.f32 %v775_v17, %v3276_v52  ;;  %v788_v20 = vstv %s2917_s10  ;;  %s2820_s20 = sld [smem:[#allocation2 + $0xb]] }
  0x51   : > { %513 = vrot.lane.b32.xlu1 %v508_v21, %s3126_s14  ;;  %v790_v21 = vmul.f32 %v788_v20, %v3273_v50  ;;  %v801_v23 = vstv %s2967_s11  ;;  %s2870_s21 = sld [smem:[#allocation2 + $0x3d]] }
  0x52   : > { %511 = vrot.lane.b32.xlu0 %v507_v22, %s3126_s14  ;;  %v789_v22 = vmul.f32 %v788_v20, %v3276_v52  ;;  %v814_v26 = vstv %s2818_s15  ;;  %s2920_s22 = sld [smem:[#allocation2 + $0x6f]] }
  0x53   : > { %v827_v29 = vstv %s2868_s16  ;;  %s2970_s23 = sld [smem:[#allocation2 + $0xa1]] }
  0x54   : > { %v840_v32 = vstv %s2918_s17  ;;  %s2821_s25 = sld [smem:[#allocation2 + $0xc]] }
  0x55   : > { %526 = vrot.lane.b32.xlu1 %v521_v24, %s3126_s14  ;;  %v803_v24 = vmul.f32 %v801_v23, %v3273_v50  ;;  %v842_v35 = vmul.f32 %v840_v32, %v3273_v50  ;;  %s2871_s26 = sld [smem:[#allocation2 + $0x3e]] }
  0x56   : > { %524 = vrot.lane.b32.xlu0 %v520_v25, %s3126_s14  ;;  %v802_v25 = vmul.f32 %v801_v23, %v3276_v52  ;;  %s3388_s27 = sld [smem:[#allocation2 + $0x70]] }
  0x57   : > { %s3390_s28 = sld [smem:[#allocation2 + $0x32]] }
  0x58   : > { %s3394_s29 = sld [smem:[#allocation2]] }
  0x59   : > { %539 = vrot.lane.b32.xlu1 %v534_v27, %s3127_s19  ;;  %v816_v27 = vmul.f32 %v814_v26, %v3273_v50  ;;  %v927_v61 = vstv %s2970_s23  ;;  %s3398_s30 = sld [smem:[#allocation4 + $0x1]] }
  0x5a   : > { %537 = vrot.lane.b32.xlu0 %v533_v28, %s3127_s19  ;;  %v815_v28 = vmul.f32 %v814_v26, %v3276_v52  ;;  %s3404_s4 = sld [smem:[#allocation2 + $0xa2]] }
  0x5b   : > { %s3406_s6 = sld [smem:[#allocation4]] }
  0x5c   : > { %s3410_s8 = sld [smem:[#allocation2 + $0x64]]  ;;  %v966_v14 = vstv %s3388_s27 }
  0x5d   : > { %552 = vrot.lane.b32.xlu1 %v547_v30, %s3127_s19  ;;  %v829_v30 = vmul.f32 %v827_v29, %v3273_v50  ;;  %s3414_s9 = sld [smem:[#allocation2 + $0x96]] }
  0x5e   : > { %550 = vrot.lane.b32.xlu0 %v546_v31, %s3127_s19  ;;  %v828_v31 = vmul.f32 %v827_v29, %v3276_v52  ;;  %s3421_s10 = sld [smem:[#allocation2 + $0xd]] }
  0x5f   : > { %s3423_s11 = sld [smem:[#allocation4 + $0x2]] }
  0x60   : > { %s3428_s15 = sld [smem:[#allocation4 + $0x3]] }
  0x61   : > { %565 = vrot.lane.b32.xlu1 %v560_v33, %s3127_s19  ;;  %s3434_s16 = sld [smem:[#allocation2 + $0x5]] }
  0x62   : > { %563 = vrot.lane.b32.xlu0 %v559_v34, %s3127_s19  ;;  %s3440_s17 = sld [smem:[#allocation2 + $0x3f]] }
  0x63   : > { %v423_v29 = vstv %s3414_s9  ;;  %s3490_s23 = sld [smem:[#allocation2 + $0x9b]] }
  0x64   : > { %s3540_s27 = sld [smem:[#allocation2 + $0x72]] }
  0x65   : > { %578 = vrot.lane.b32.xlu1 %v573_v36, %s3127_s19  ;;  %v841_v36 = vmul.f32 %v840_v32, %v3276_v52  ;;  %s2876_s9 = sld [smem:[#allocation2 + $0x43]] }
  0x66   : > { %576 = vrot.lane.b32.xlu0 %v572_v37, %s3127_s19  ;;  %v853_v37 = vstv %s2968_s18  ;;  %s3454_s18 = sld [smem:[#allocation2 + $0x37]] }
  0x67   : > { %v854_v41 = vmul.f32 %v853_v37, %v3276_v52 }
  0x69   : > { %591 = vrot.lane.b32.xlu1 %v586_v39, %s3128_s24 }
  0x6a   : > { %589 = vrot.lane.b32.xlu0 %v585_v40, %s3128_s24  ;;  %v855_v40 = vmul.f32 %v853_v37, %v3273_v50 }
  0x6d   : > { %604 = vrot.lane.b32.xlu1 %v599_v42, %s3128_s24  ;;  %v3351_v42 = vld [vmem:[%s3202_s5 + $0xa] sm:$0xf] }
  0x6e   : > { %602 = vrot.lane.b32.xlu0 %v598_v43, %s3128_s24  ;;  %v888_v43 = vstv %s2820_s20  ;;  %v929_v2 = vmul.f32 %v927_v61, %v3351_v42  ;;  %s3459_s20 = sld [smem:[#allocation2 + $0x71]] }
  0x6f   : > { %v890_v47 = vmul.f32 %v888_v43, %v3351_v42 }
  0x71   : > { %617 = vrot.lane.b32.xlu1 %v612_v45, %s3128_s24  ;;  %v3356_v45 = vld [vmem:[%s3202_s5 + $0x2] sm:$0xff] }
  0x72   : > { %615 = vrot.lane.b32.xlu0 %v611_v46, %s3128_s24  ;;  %v967_v20 = vmul.f32 %v966_v14, %v3356_v45 }
  0x75   : > { %630 = vrot.lane.b32.xlu1 %v625_v48, %s3128_s24  ;;  %v889_v48 = vmul.f32 %v888_v43, %v3356_v45 }
  0x76   : > { %628 = vrot.lane.b32.xlu0 %v624_v49, %s3128_s24  ;;  %v901_v49 = vstv %s2870_s21  ;;  %s3470_s21 = sld [smem:[#allocation2 + $0x69]] }
  0x77   : > { %v902_v55 = vmul.f32 %v901_v49, %v3356_v45 }
  0x79   : > { %665 = vrot.lane.b32.xlu1 %v660_v53, %s3125_s7 }
  0x7a   : > { %663 = vrot.lane.b32.xlu0 %v659_v54, %s3125_s7  ;;  %v903_v54 = vmul.f32 %v901_v49, %v3351_v42 }
  0x7d   : > { %678 = vrot.lane.b32.xlu1 %v673_v56, %s3125_s7  ;;  %v914_v56 = vstv %s2920_s22  ;;  %s3481_s22 = sld [smem:[#allocation2 + $0xa3]] }
  0x7e   : > { %676 = vrot.lane.b32.xlu0 %v672_v57, %s3125_s7 }
  0x81   : > { %691 = vrot.lane.b32.xlu1 %v686_v59, %s3125_s7  ;;  %v916_v59 = vmul.f32 %v914_v56, %v3351_v42 }
  0x82   : > { %689 = vrot.lane.b32.xlu0 %v685_v60, %s3125_s7  ;;  %v915_v60 = vmul.f32 %v914_v56, %v3356_v45  ;;  %v405_v56 = vstv %s3428_s15  ;;  %s2827_s15 = sld [smem:[#allocation2 + $0x12]] }
  0x85   : > { %704 = vrot.lane.b32.xlu1 %v699_v62, %s3125_s7 }
  0x86   : > { %702 = vrot.lane.b32.xlu0 %v698_v63, %s3125_s7 }
  0x89   : > { %717 = vrot.lane.b32.xlu1 %v712_v3, %s3126_s14  ;;  %v928_v3 = vmul.f32 %v927_v61, %v3356_v45 }
  0x8a   : > { %715 = vrot.lane.b32.xlu0 %v711_v4, %s3126_s14  ;;  %v940_v4 = vstv %s2821_s25  ;;  %s3502_s25 = sld [smem:[#allocation2 + $0xe]] }
  0x8b   : > { %v941_v8 = vmul.f32 %v940_v4, %v3356_v45 }
  0x8d   : > { %730 = vrot.lane.b32.xlu1 %v725_v6, %s3126_s14 }
  0x8e   : > { %728 = vrot.lane.b32.xlu0 %v724_v7, %s3126_s14  ;;  %v942_v7 = vmul.f32 %v940_v4, %v3351_v42 }
  0x91   : > { %743 = vrot.lane.b32.xlu1 %v738_v9, %s3126_s14  ;;  %v953_v9 = vstv %s2871_s26  ;;  %s3520_s26 = sld [smem:[#allocation2 + $0x40]] }
  0x92   : > { %741 = vrot.lane.b32.xlu0 %v737_v10, %s3126_s14 }
  0x95   : > { %756 = vrot.lane.b32.xlu1 %v751_v12, %s3126_s14  ;;  %v955_v12 = vmul.f32 %v953_v9, %v3351_v42 }
  0x96   : > { %754 = vrot.lane.b32.xlu0 %v750_v13, %s3126_s14  ;;  %v954_v13 = vmul.f32 %v953_v9, %v3356_v45 }
  0x99   : > { %769 = vrot.lane.b32.xlu1 %v764_v15, %s3127_s19 }
  0x9a   : > { %767 = vrot.lane.b32.xlu0 %v763_v16, %s3127_s19  ;;  %v408_v16 = vstv %s3394_s29  ;;  %s2825_s29 = sld [smem:[#allocation2 + $0x10]] }
  0x9d   : > { %782 = vrot.lane.b32.xlu1 %v777_v18, %s3127_s19  ;;  %v968_v18 = vmul.f32 %v966_v14, %v3351_v42 }
  0x9e   : > { %780 = vrot.lane.b32.xlu0 %v776_v19, %s3127_s19  ;;  %v410_v19 = vmul.f32 %v408_v16, %v3208_v1 }
  0xa1   : > { %795 = vrot.lane.b32.xlu1 %v790_v21, %s3127_s19  ;;  %v979_v21 = vstv %s3404_s4  ;;  %s2925_s4 = sld [smem:[#allocation2 + $0x74]] }
  0xa2   : > { %793 = vrot.lane.b32.xlu0 %v789_v22, %s3127_s19  ;;  %v409_v22 = vmul.f32 %v408_v16, %v3205_v0  ;;  %v980_v32 = vmul.f32 %v979_v21, %v3356_v45 }
  0xa5   : > { %808 = vrot.lane.b32.xlu1 %v803_v24, %s3127_s19  ;;  %v413_v24 = vstv %s3390_s28  ;;  %s2973_s28 = sld [smem:[#allocation2 + $0xa4]] }
  0xa6   : > { %806 = vrot.lane.b32.xlu0 %v802_v25, %s3127_s19  ;;  %v399_v25 = vstv %s3406_s6  ;;  %s2975_s6 = sld [smem:[#allocation2 + $0xa6]] }
  0xa7   : > { %v411_v37 = vadd.f32 %v409_v22, %v399_v25 }
  0xa9   : > { %821 = vrot.lane.b32.xlu1 %v816_v27, %s3128_s24  ;;  %v415_v27 = vmul.f32 %v413_v24, %v3208_v1 }
  0xaa   : > { %819 = vrot.lane.b32.xlu0 %v815_v28, %s3128_s24  ;;  %v418_v28 = vstv %s3410_s8  ;;  %s2826_s8 = sld [smem:[#allocation2 + $0x11]] }
  0xab   : > { %v3334_v33 = vpop.permute.xlu1 %446  ;;  %v420_v43 = vmul.f32 %v418_v28, %v3208_v1 }
  0xac   : > { %v3336_v34 = vpop.permute.xlu0 %433 }
  0xad   : > { %834 = vrot.lane.b32.xlu1 %v829_v30, %s3128_s24  ;;  %v981_v30 = vmul.f32 %v979_v21, %v3351_v42  ;;  %v439_v4 = vadd.f32 %v3336_v34, %v411_v37  ;;  %v1018_v21 = vstv %s3459_s20  ;;  %v1031_v37 = vstv %s3481_s22  ;;  %s2828_s20 = sld [smem:[#allocation2 + $0x13]] }
  0xae   : > { %832 = vrot.lane.b32.xlu0 %v828_v31, %s3128_s24  ;;  %v412_v31 = vadd.f32 %v410_v19, %v399_v25  ;;  %s2928_s22 = sld [smem:[#allocation2 + $0x77]] }
  0xaf   : > { %v3342_v38 = vpop.permute.xlu1 %448 }
  0xb0   : > { %v3344_v39 = vpop.permute.xlu0 %435 }
  0xb1   : > { %847 = vrot.lane.b32.xlu1 %v842_v35, %s3128_s24  ;;  %v992_v35 = vstv %s3421_s10  ;;  %s2926_s10 = sld [smem:[#allocation2 + $0x75]] }
  0xb2   : > { %845 = vrot.lane.b32.xlu0 %v841_v36, %s3128_s24  ;;  %v414_v36 = vmul.f32 %v413_v24, %v3205_v0  ;;  %v993_v61 = vmul.f32 %v992_v35, %v3356_v45 }
  0xb3   : > { %v3353_v44 = vpop.permute.xlu1 %461 }
  0xb4   : > { %v3358_v46 = vpop.permute.xlu0 %459 }
  0xb5   : > { %860 = vrot.lane.b32.xlu1 %v855_v40, %s3128_s24 }
  0xb6   : > { %858 = vrot.lane.b32.xlu0 %v854_v41, %s3128_s24  ;;  %v401_v41 = vstv %s3398_s30  ;;  %s2875_s30 = sld [smem:[#allocation2 + $0x42]] }
  0xb7   : > { %v3364_v51 = vpop.permute.xlu1 %474 }
  0xb8   : > { %v3366_v53 = vpop.permute.xlu0 %472 }
  0xb9   : > { %895 = vrot.lane.b32.xlu1 %v890_v47, %s3125_s7  ;;  %v419_v47 = vmul.f32 %v418_v28, %v3205_v0 }
  0xba   : > { %893 = vrot.lane.b32.xlu0 %v889_v48, %s3125_s7  ;;  %v425_v48 = vmul.f32 %v423_v29, %v3208_v1  ;;  %v416_v1 = vadd.f32 %v414_v36, %v401_v41 }
  0xbb   : > { %v3372_v57 = vpop.permute.xlu1 %487 }
  0xbc   : > { %v3374_v58 = vpop.permute.xlu0 %485 }
  0xbd   : > { %908 = vrot.lane.b32.xlu1 %v903_v54, %s3125_s7  ;;  %v417_v54 = vadd.f32 %v415_v27, %v401_v41  ;;  %v491_v16 = vadd.f32 %v3374_v58, %v439_v4  ;;  %v452_v58 = vadd.f32 %v3334_v33, %v416_v1  ;;  %v1020_v33 = vmul.f32 %v1018_v21, %v3351_v42 }
  0xbe   : > { %906 = vrot.lane.b32.xlu0 %v902_v55, %s3125_s7  ;;  %v403_v55 = vstv %s3423_s11  ;;  %s2976_s11 = sld [smem:[#allocation2 + $0xa7]] }
  0xbf   : > { %v3380_v62 = vpop.permute.xlu1 %500  ;;  %v422_v9 = vadd.f32 %v420_v43, %v403_v55  ;;  %v453_v19 = vadd.f32 %v3342_v38, %v417_v54 }
  0xc0   : > { %v3382_v63 = vpop.permute.xlu0 %498 }
  0xc1   : > { %921 = vrot.lane.b32.xlu1 %v916_v59, %s3125_s7  ;;  %v994_v59 = vmul.f32 %v992_v35, %v3351_v42  ;;  %v505_v38 = vadd.f32 %v3380_v62, %v453_v19  ;;  %v466_v35 = vadd.f32 %v3353_v44, %v422_v9 }
  0xc2   : > { %919 = vrot.lane.b32.xlu0 %v915_v60, %s3125_s7  ;;  %v440_v60 = vadd.f32 %v3344_v39, %v412_v31  ;;  %v427_v39 = vadd.f32 %v425_v48, %v405_v56  ;;  %v504_v31 = vadd.f32 %v3382_v63, %v452_v58 }
  0xc3   : > { %v3392_v5 = vpop.permute.xlu1 %513 }
  0xc4   : > { %v3396_v6 = vpop.permute.xlu0 %511  ;;  %v518_v44 = vadd.f32 %v3392_v5, %v466_v35  ;;  %v1044_v5 = vstv %s3502_s25  ;;  %v3593_v35 = vld [vmem:[%s3202_s5 + $0x3] sm:$0xff]  ;;  %s2830_s25 = sld [smem:[#allocation2 + $0x15]] }
  0xc5   : > { %934 = vrot.lane.b32.xlu1 %v929_v2, %s3125_s7  ;;  %v638_v2 = vstv %s3434_s16  ;;  %s2877_s16 = sld [smem:[#allocation2 + $0x44]] }
  0xc6   : > { %932 = vrot.lane.b32.xlu0 %v928_v3, %s3125_s7  ;;  %v1005_v3 = vstv %s3440_s17  ;;  %v640_v34 = vmul.f32 %v638_v2, %v3273_v50  ;;  %v639_v27 = vmul.f32 %v638_v2, %v3276_v52  ;;  %s2927_s17 = sld [smem:[#allocation2 + $0x76]] }
  0xc7   : > { %v3408_v10 = vpop.permute.xlu1 %526 }
  0xc8   : > { %v3412_v11 = vpop.permute.xlu0 %524 }
  0xc9   : > { %947 = vrot.lane.b32.xlu1 %v942_v7, %s3126_s14  ;;  %v424_v7 = vmul.f32 %v423_v29, %v3205_v0  ;;  %v1007_v0 = vmul.f32 %v1005_v3, %v3351_v42 }
  0xca   : > { %945 = vrot.lane.b32.xlu0 %v941_v8, %s3126_s14 }
  0xcb   : > { %v3425_v15 = vpop.permute.xlu1 %539  ;;  %v426_v22 = vadd.f32 %v424_v7, %v405_v56  ;;  %v653_v56 = vstv %s3490_s23  ;;  %s2978_s23 = sld [smem:[#allocation2 + $0xa9]] }
  0xcc   : > { %v3430_v17 = vpop.permute.xlu0 %537 }
  0xcd   : > { %960 = vrot.lane.b32.xlu1 %v955_v12, %s3126_s14  ;;  %v421_v12 = vadd.f32 %v419_v47, %v403_v55  ;;  %v543_v24 = vadd.f32 %v3430_v17, %v491_v16  ;;  %v1019_v17 = vmul.f32 %v1018_v21, %v3356_v45  ;;  %v655_v16 = vmul.f32 %v653_v56, %v3273_v50 }
  0xce   : > { %958 = vrot.lane.b32.xlu0 %v954_v13, %s3126_s14  ;;  %v492_v13 = vadd.f32 %v3372_v57, %v440_v60  ;;  %v1006_v57 = vmul.f32 %v1005_v3, %v3356_v45 }
  0xcf   : > { %v3443_v23 = vpop.permute.xlu1 %552  ;;  %v465_v63 = vadd.f32 %v3358_v46, %v421_v12  ;;  %v1033_v46 = vmul.f32 %v1031_v37, %v3351_v42 }
  0xd0   : > { %v3447_v26 = vpop.permute.xlu0 %550  ;;  %v557_v36 = vadd.f32 %v3443_v23, %v505_v38 }
  0xd1   : > { %973 = vrot.lane.b32.xlu1 %v968_v18, %s3126_s14  ;;  %v643_v18 = vstv %s3454_s18  ;;  %v556_v41 = vadd.f32 %v3447_v26, %v504_v31  ;;  %v1032_v26 = vmul.f32 %v1031_v37, %v3356_v45  ;;  %s2977_s18 = sld [smem:[#allocation2 + $0xa8]] }
  0xd2   : > { %971 = vrot.lane.b32.xlu0 %v967_v20, %s3126_s14  ;;  %v544_v20 = vadd.f32 %v3425_v15, %v492_v13  ;;  %v645_v29 = vmul.f32 %v643_v18, %v3273_v50  ;;  %v644_v48 = vmul.f32 %v643_v18, %v3276_v52 }
  0xd3   : > { %v3462_v40 = vpop.permute.xlu1 %565 }
  0xd4   : > { %v3468_v49 = vpop.permute.xlu0 %563  ;;  %v570_v2 = vadd.f32 %v3462_v40, %v518_v44  ;;  %v1144_v44 = vstv %s2925_s4  ;;  %s2931_s4 = sld [smem:[#allocation2 + $0x7a]] }
  0xd5   : > { %986 = vrot.lane.b32.xlu1 %v981_v30, %s3126_s14  ;;  %v648_v30 = vstv %s3470_s21  ;;  %s2878_s21 = sld [smem:[#allocation2 + $0x45]] }
  0xd6   : > { %984 = vrot.lane.b32.xlu0 %v980_v32, %s3126_s14  ;;  %v650_v55 = vmul.f32 %v648_v30, %v3273_v50  ;;  %v649_v9 = vmul.f32 %v648_v30, %v3276_v52  ;;  %v654_v50 = vmul.f32 %v653_v56, %v3276_v52  ;;  %v1145_v56 = vmul.f32 %v1144_v44, %v3593_v35 }
  0xd7   : > { %v3485_v8 = vpop.permute.xlu1 %578 }
  0xd8   : > { %v3488_v14 = vpop.permute.xlu0 %576 }
  0xd9   : > { %999 = vrot.lane.b32.xlu1 %v994_v59, %s3127_s19  ;;  %v517_v59 = vadd.f32 %v3396_v6, %v465_v63  ;;  %v478_v6 = vadd.f32 %v3366_v53, %v426_v22  ;;  %v1046_v53 = vmul.f32 %v1044_v5, %v3351_v42  ;;  %v1131_v63 = vstv %s2875_s30  ;;  %s2881_s30 = sld [smem:[#allocation2 + $0x48]] }
  0xda   : > { %997 = vrot.lane.b32.xlu0 %v993_v61, %s3127_s19  ;;  %v479_v61 = vadd.f32 %v3364_v51, %v427_v39 }
  0xdb   : > { %v592_v25 = vpop.permute.xlu1 %591  ;;  %v569_v1 = vadd.f32 %v3468_v49, %v517_v59  ;;  %v530_v39 = vadd.f32 %v3412_v11, %v478_v6  ;;  %v1157_v59 = vstv %s2975_s6  ;;  %s2981_s6 = sld [smem:[#allocation2 + $0xac]] }
  0xdc   : > { %v596_v28 = vadd.f32 %v592_v25, %v544_v20  ;;  %v590_v15 = vpop.permute.xlu0 %589  ;;  %v531_v51 = vadd.f32 %v3408_v10, %v479_v61  ;;  %v1045_v10 = vmul.f32 %v1044_v5, %v3356_v45  ;;  %v1158_v61 = vmul.f32 %v1157_v59, %v3593_v35 }
  0xdd   : > { %v595_v32 = vadd.f32 %v590_v15, %v543_v24  ;;  %1012 = vrot.lane.b32.xlu1 %v1007_v0, %s3127_s19  ;;  %v1057_v0 = vstv %s3520_s26  ;;  %v582_v11 = vadd.f32 %v3488_v14, %v530_v39  ;;  %v1070_v24 = vstv %s3540_s27  ;;  %s2880_s26 = sld [smem:[#allocation2 + $0x47]] }
  0xde   : > { %v3516_v62 = vadd.f32 %v640_v34, %v596_v28  ;;  %1010 = vrot.lane.b32.xlu0 %v1006_v57, %s3127_s19  ;;  %v583_v49 = vadd.f32 %v3485_v8, %v531_v51  ;;  %v1059_v8 = vmul.f32 %v1057_v0, %v3351_v42  ;;  %v1058_v22 = vmul.f32 %v1057_v0, %v3356_v45  ;;  %s2930_s27 = sld [smem:[#allocation2 + $0x79]] }
  0xdf   : > { %v3524_v43 = vadd.f32 %v639_v27, %v595_v32  ;;  %v605_v47 = vpop.permute.xlu1 %604  ;;  %v1072_v27 = vmul.f32 %v1070_v24, %v3351_v42  ;;  %v1071_v38 = vmul.f32 %v1070_v24, %v3356_v45  ;;  %v1083_v28 = vstv %s2973_s28  ;;  %v3588_v32 = vld [vmem:[%s3202_s5 + $0xb] sm:$0xf]  ;;  %s2980_s28 = sld [smem:[#allocation2 + $0xab]] }
  0xe0   : > { %v609_v23 = vadd.f32 %v605_v47, %v557_v36  ;;  %v603_v54 = vpop.permute.xlu0 %602  ;;  %v1085_v30 = vmul.f32 %v1083_v28, %v3351_v42  ;;  %v1084_v31 = vmul.f32 %v1083_v28, %v3356_v45  ;;  %v1133_v47 = vmul.f32 %v1131_v63, %v3588_v32 }
  0xe1   : > { %v608_v60 = vadd.f32 %v603_v54, %v556_v41  ;;  %1025 = vrot.lane.b32.xlu1 %v1020_v33, %s3127_s19  ;;  %v1118_v33 = vstv %s2825_s29  ;;  %v1209_v0 = vstv %s2976_s11  ;;  %s2831_s29 = sld [smem:[#allocation2 + $0x16]] }
  0xe2   : > { %v3536_v3 = vadd.f32 %v645_v29, %v609_v23  ;;  %1023 = vrot.lane.b32.xlu0 %v1019_v17, %s3127_s19  ;;  %v1120_v37 = vmul.f32 %v1118_v33, %v3588_v32  ;;  %v1119_v42 = vmul.f32 %v1118_v33, %v3593_v35  ;;  %v1248_v33 = vstv %s2927_s17  ;;  %s2982_s11 = sld [smem:[#allocation2 + $0xad]] }
  0xe3   : > { %v3544_v4 = vadd.f32 %v644_v48, %v608_v60  ;;  %v618_v7 = vpop.permute.xlu1 %617  ;;  %v1132_v48 = vmul.f32 %v1131_v63, %v3593_v35  ;;  %v1250_v63 = vmul.f32 %v1248_v33, %v3588_v32  ;;  %s2933_s17 = sld [smem:[#allocation2 + $0x7c]] }
  0xe4   : > { %v622_v40 = vadd.f32 %v618_v7, %v570_v2  ;;  %v616_v12 = vpop.permute.xlu0 %615  ;;  %v1170_v2 = vstv %s2826_s8  ;;  %s2832_s8 = sld [smem:[#allocation2 + $0x17]] }
  0xe5   : > { %v621_v13 = vadd.f32 %v616_v12, %v569_v1  ;;  %1038 = vrot.lane.b32.xlu1 %v1033_v46, %s3127_s19  ;;  %v1172_v1 = vmul.f32 %v1170_v2, %v3588_v32  ;;  %v1171_v7 = vmul.f32 %v1170_v2, %v3593_v35 }
  0xe6   : > { %v3553_v34 = vadd.f32 %v650_v55, %v622_v40  ;;  %1036 = vrot.lane.b32.xlu0 %v1032_v26, %s3127_s19  ;;  %v1146_v55 = vmul.f32 %v1144_v44, %v3588_v32  ;;  %v1159_v26 = vmul.f32 %v1157_v59, %v3588_v32 }
  0xe7   : > { %v3559_v18 = vadd.f32 %v649_v9, %v621_v13  ;;  %v631_v19 = vpop.permute.xlu1 %630  ;;  %v1183_v9 = vstv %s2876_s9  ;;  %v1196_v13 = vstv %s2926_s10  ;;  %s2882_s9 = sld [smem:[#allocation2 + $0x49]] }
  0xe8   : > { %v635_v20 = vadd.f32 %v631_v19, %v583_v49  ;;  %v629_v57 = vpop.permute.xlu0 %628  ;;  %v1185_v12 = vmul.f32 %v1183_v9, %v3588_v32  ;;  %v1184_v39 = vmul.f32 %v1183_v9, %v3593_v35  ;;  %v1198_v49 = vmul.f32 %v1196_v13, %v3588_v32  ;;  %s2932_s10 = sld [smem:[#allocation2 + $0x7b]] }
  0xe9   : > { %v634_v21 = vadd.f32 %v629_v57, %v582_v11  ;;  %1051 = vrot.lane.b32.xlu1 %v1046_v53, %s3128_s24  ;;  %v1222_v57 = vstv %s2827_s15  ;;  %v1287_v9 = vstv %s2878_s21  ;;  %s2833_s15 = sld [smem:[#allocation2 + $0x18]] }
  0xea   : > { %v3564_v58 = vadd.f32 %v655_v16, %v635_v20  ;;  %1049 = vrot.lane.b32.xlu0 %v1045_v10, %s3128_s24  ;;  %v1197_v10 = vmul.f32 %v1196_v13, %v3593_v35  ;;  %v1210_v20 = vmul.f32 %v1209_v0, %v3593_v35  ;;  %v1223_v24 = vmul.f32 %v1222_v57, %v3593_v35  ;;  %s2885_s21 = sld [smem:[#allocation2 + $0x4c]] }
  0xeb   : > { %v3569_v14 = vadd.f32 %v654_v50, %v634_v21  ;;  %v3571_v25 = vpop.permute.xlu1 %665  ;;  %v1211_v50 = vmul.f32 %v1209_v0, %v3588_v32  ;;  %v1289_v13 = vmul.f32 %v1287_v9, %v3588_v32 }
  0xec   : > { %v3573_v52 = vpop.permute.xlu0 %663 }
  0xed   : > { %1064 = vrot.lane.b32.xlu1 %v1059_v8, %s3128_s24 }
  0xee   : > { %1062 = vrot.lane.b32.xlu0 %v1058_v22, %s3128_s24  ;;  %v1224_v22 = vmul.f32 %v1222_v57, %v3588_v32 }
  0xef   : > { %v3579_v15 = vpop.permute.xlu1 %678 }
  0xf0   : > { %v3581_v29 = vpop.permute.xlu0 %676 }
  0xf1   : > { %1077 = vrot.lane.b32.xlu1 %v1072_v27, %s3128_s24  ;;  %v1235_v27 = vstv %s2877_s16  ;;  %s2883_s16 = sld [smem:[#allocation2 + $0x4a]] }
  0xf2   : > { %1075 = vrot.lane.b32.xlu0 %v1071_v38, %s3128_s24 }
  0xf3   : > { %v3590_v17 = vpop.permute.xlu1 %691 }
  0xf4   : > { %v3595_v36 = vpop.permute.xlu0 %689 }
  0xf5   : > { %1090 = vrot.lane.b32.xlu1 %v1085_v30, %s3128_s24  ;;  %v1237_v30 = vmul.f32 %v1235_v27, %v3588_v32 }
  0xf6   : > { %1088 = vrot.lane.b32.xlu0 %v1084_v31, %s3128_s24  ;;  %v1236_v31 = vmul.f32 %v1235_v27, %v3593_v35 }
  0xf7   : > { %v3601_v45 = vpop.permute.xlu1 %704 }
  0xf8   : > { %v3603_v41 = vpop.permute.xlu0 %702 }
  0xf9   : > { %1125 = vrot.lane.b32.xlu1 %v1120_v37, %s3125_s7 }
  0xfa   : > { %1123 = vrot.lane.b32.xlu0 %v1119_v42, %s3125_s7 }
  0xfb   : > { %v3609_v23 = vpop.permute.xlu1 %717 }
  0xfc   : > { %v3611_v54 = vpop.permute.xlu0 %715 }
  0xfd   : > { %1138 = vrot.lane.b32.xlu1 %v1133_v47, %s3125_s7  ;;  %v1249_v47 = vmul.f32 %v1248_v33, %v3593_v35  ;;  %v3722_v33 = vld [vmem:[%s3202_s5 + $0xc] sm:$0xf] }
  0xfe   : > { %1136 = vrot.lane.b32.xlu0 %v1132_v48, %s3125_s7  ;;  %v1261_v48 = vstv %s2977_s18  ;;  %s2983_s18 = sld [smem:[#allocation2 + $0xae]] }
  0xff   : > { %v3617_v60 = vpop.permute.xlu1 %730  ;;  %v1262_v59 = vmul.f32 %v1261_v48, %v3593_v35 }
 0x100   : > { %v3619_v46 = vpop.permute.xlu0 %728 }
 0x101   : > { %1151 = vrot.lane.b32.xlu1 %v1146_v55, %s3125_s7 }
 0x102   : > { %1149 = vrot.lane.b32.xlu0 %v1145_v56, %s3125_s7  ;;  %v1263_v56 = vmul.f32 %v1261_v48, %v3588_v32  ;;  %v3727_v48 = vld [vmem:[%s3202_s5 + $0x4] sm:$0xff] }
 0x103   : > { %v3625_v5 = vpop.permute.xlu1 %743 }
 0x104   : > { %v3627_v6 = vpop.permute.xlu0 %741 }
 0x105   : > { %1164 = vrot.lane.b32.xlu1 %v1159_v26, %s3125_s7  ;;  %v1274_v26 = vstv %s2828_s20  ;;  %s2835_s20 = sld [smem:[#allocation2 + $0x1a]] }
 0x106   : > { %1162 = vrot.lane.b32.xlu0 %v1158_v61, %s3125_s7 }
 0x107   : > { %v3633_v51 = vpop.permute.xlu1 %756 }
 0x108   : > { %v3635_v40 = vpop.permute.xlu0 %754 }
 0x109   : > { %1177 = vrot.lane.b32.xlu1 %v1172_v1, %s3126_s14  ;;  %v1276_v1 = vmul.f32 %v1274_v26, %v3588_v32 }
 0x10a   : > { %1175 = vrot.lane.b32.xlu0 %v1171_v7, %s3126_s14  ;;  %v1275_v7 = vmul.f32 %v1274_v26, %v3593_v35  ;;  %v1361_v26 = vstv %s2880_s26  ;;  %s2886_s26 = sld [smem:[#allocation2 + $0x4d]] }
 0x10b   : > { %v3641_v16 = vpop.permute.xlu1 %769 }
 0x10c   : > { %v3643_v53 = vpop.permute.xlu0 %767 }
 0x10d   : > { %1190 = vrot.lane.b32.xlu1 %v1185_v12, %s3126_s14 }
 0x10e   : > { %1188 = vrot.lane.b32.xlu0 %v1184_v39, %s3126_s14 }
 0x10f   : > { %v3649_v11 = vpop.permute.xlu1 %782 }
 0x110   : > { %v3651_v19 = vpop.permute.xlu0 %780 }
 0x111   : > { %1203 = vrot.lane.b32.xlu1 %v1198_v49, %s3126_s14  ;;  %v1288_v49 = vmul.f32 %v1287_v9, %v3593_v35  ;;  %v1362_v9 = vmul.f32 %v1361_v26, %v3727_v48 }
 0x112   : > { %1201 = vrot.lane.b32.xlu0 %v1197_v10, %s3126_s14  ;;  %v1300_v10 = vstv %s2928_s22  ;;  %s2935_s22 = sld [smem:[#allocation2 + $0x7e]] }
 0x113   : > { %v3657_v21 = vpop.permute.xlu1 %795  ;;  %v1301_v57 = vmul.f32 %v1300_v10, %v3593_v35 }
 0x114   : > { %v3659_v8 = vpop.permute.xlu0 %793 }
 0x115   : > { %1216 = vrot.lane.b32.xlu1 %v1211_v50, %s3126_s14 }
 0x116   : > { %1214 = vrot.lane.b32.xlu0 %v1210_v20, %s3126_s14  ;;  %v1302_v20 = vmul.f32 %v1300_v10, %v3588_v32 }
 0x117   : > { %v3665_v38 = vpop.permute.xlu1 %808 }
 0x118   : > { %v3667_v28 = vpop.permute.xlu0 %806 }
 0x119   : > { %1229 = vrot.lane.b32.xlu1 %v1224_v22, %s3127_s19  ;;  %v1313_v22 = vstv %s2978_s23  ;;  %s2985_s23 = sld [smem:[#allocation2 + $0xb0]] }
 0x11a   : > { %1227 = vrot.lane.b32.xlu0 %v1223_v24, %s3127_s19 }
 0x11b   : > { %v3673_v37 = vpop.permute.xlu1 %821 }
 0x11c   : > { %v3675_v42 = vpop.permute.xlu0 %819 }
 0x11d   : > { %1242 = vrot.lane.b32.xlu1 %v1237_v30, %s3127_s19  ;;  %v1315_v30 = vmul.f32 %v1313_v22, %v3588_v32 }
 0x11e   : > { %1240 = vrot.lane.b32.xlu0 %v1236_v31, %s3127_s19  ;;  %v1314_v31 = vmul.f32 %v1313_v22, %v3593_v35  ;;  %v1387_v22 = vstv %s2980_s28  ;;  %s2986_s28 = sld [smem:[#allocation2 + $0xb1]] }
 0x11f   : > { %v3681_v44 = vpop.permute.xlu1 %834 }
 0x120   : > { %v3683_v55 = vpop.permute.xlu0 %832 }
 0x121   : > { %1255 = vrot.lane.b32.xlu1 %v1250_v63, %s3127_s19  ;;  %v1348_v63 = vstv %s2830_s25  ;;  %s2836_s25 = sld [smem:[#allocation2 + $0x1b]] }
 0x122   : > { %1253 = vrot.lane.b32.xlu0 %v1249_v47, %s3127_s19  ;;  %v1349_v32 = vmul.f32 %v1348_v63, %v3727_v48 }
 0x123   : > { %v3689_v61 = vpop.permute.xlu1 %847 }
 0x124   : > { %v3691_v2 = vpop.permute.xlu0 %845 }
 0x125   : > { %1268 = vrot.lane.b32.xlu1 %v1263_v56, %s3127_s19 }
 0x126   : > { %1266 = vrot.lane.b32.xlu0 %v1262_v59, %s3127_s19  ;;  %v1350_v59 = vmul.f32 %v1348_v63, %v3722_v33  ;;  %v1389_v63 = vmul.f32 %v1387_v22, %v3722_v33 }
 0x127   : > { %v3697_v12 = vpop.permute.xlu1 %860 }
 0x128   : > { %v3699_v39 = vpop.permute.xlu0 %858 }
 0x129   : > { %5082 = vst [vmem:[#allocation8_spill] sm:$0xff] %v3699_v39  ;;  %1281 = vrot.lane.b32.xlu1 %v1276_v1, %s3128_s24  ;;  %v3067_v39 = vld [vmem:[%s3202_s5 + $0xb] sm:$0xf] }
 0x12a   : > { %1279 = vrot.lane.b32.xlu0 %v1275_v7, %s3128_s24  ;;  %v1363_v7 = vmul.f32 %v1361_v26, %v3722_v33 }
 0x12b   : > { %v3705_v0 = vpop.permute.xlu1 %895 }
 0x12c   : > { %5083 = vst [vmem:[#allocation9_spill] sm:$0xff] %v3705_v0  ;;  %v3707_v50 = vpop.permute.xlu0 %893 }
 0x12d   : > { %5084 = vst [vmem:[#allocation10_spill] sm:$0xff] %v3707_v50  ;;  %1294 = vrot.lane.b32.xlu1 %v1289_v13, %s3128_s24  ;;  %v1374_v13 = vstv %s2930_s27  ;;  %s2936_s27 = sld [smem:[#allocation2 + $0x7f]] }
 0x12e   : > { %1292 = vrot.lane.b32.xlu0 %v1288_v49, %s3128_s24 }
 0x12f   : > { %v3713_v24 = vpop.permute.xlu1 %908 }
 0x130   : > { %5085 = vst [vmem:[#allocation11_spill] sm:$0xff] %v3713_v24  ;;  %v3715_v27 = vpop.permute.xlu0 %906 }
 0x131   : > { %5086 = vst [vmem:[#allocation12_spill] sm:$0xff] %v3715_v27  ;;  %1307 = vrot.lane.b32.xlu1 %v1302_v20, %s3128_s24  ;;  %v1376_v20 = vmul.f32 %v1374_v13, %v3722_v33 }
 0x132   : > { %1305 = vrot.lane.b32.xlu0 %v1301_v57, %s3128_s24  ;;  %v1375_v57 = vmul.f32 %v1374_v13, %v3727_v48 }
 0x133   : > { %v3724_v47 = vpop.permute.xlu1 %921 }
 0x134   : > { %5087 = vst [vmem:[#allocation13_spill] sm:$0xff] %v3724_v47  ;;  %v3729_v56 = vpop.permute.xlu0 %919 }
 0x135   : > { %5088 = vst [vmem:[#allocation14_spill] sm:$0xff] %v3729_v56  ;;  %1320 = vrot.lane.b32.xlu1 %v1315_v30, %s3128_s24 }
 0x136   : > { %1318 = vrot.lane.b32.xlu0 %v1314_v31, %s3128_s24 }
 0x137   : > { %v3735_v35 = vpop.permute.xlu1 %934 }
 0x138   : > { %5089 = vst [vmem:[#allocation15_spill] sm:$0xff] %v3735_v35  ;;  %v3737_v1 = vpop.permute.xlu0 %932 }
 0x139   : > { %5090 = vst [vmem:[#allocation16_spill] sm:$0xff] %v3737_v1  ;;  %1355 = vrot.lane.b32.xlu1 %v1350_v59, %s3125_s7  ;;  %v1388_v59 = vmul.f32 %v1387_v22, %v3727_v48 }
 0x13a   : > { %1353 = vrot.lane.b32.xlu0 %v1349_v32, %s3125_s7  ;;  %v1400_v32 = vstv %s2831_s29  ;;  %s2837_s29 = sld [smem:[#allocation2 + $0x1c]] }
 0x13b   : > { %v3743_v49 = vpop.permute.xlu1 %947  ;;  %v1401_v13 = vmul.f32 %v1400_v32, %v3727_v48 }
 0x13c   : > { %5091 = vst [vmem:[#allocation17_spill] sm:$0xff] %v3743_v49  ;;  %v3745_v10 = vpop.permute.xlu0 %945 }
 0x13d   : > { %5092 = vst [vmem:[#allocation18_spill] sm:$0xff] %v3745_v10  ;;  %1368 = vrot.lane.b32.xlu1 %v1363_v7, %s3125_s7 }
 0x13e   : > { %1366 = vrot.lane.b32.xlu0 %v1362_v9, %s3125_s7  ;;  %v1402_v9 = vmul.f32 %v1400_v32, %v3722_v33 }
 0x13f   : > { %v3751_v30 = vpop.permute.xlu1 %960 }
 0x140   : > { %5093 = vst [vmem:[#allocation19_spill] sm:$0xff] %v3751_v30  ;;  %v3753_v31 = vpop.permute.xlu0 %958 }
 0x141   : > { %5094 = vst [vmem:[#allocation20_spill] sm:$0xff] %v3753_v31  ;;  %1381 = vrot.lane.b32.xlu1 %v1376_v20, %s3125_s7  ;;  %v1413_v20 = vstv %s2881_s30  ;;  %s2887_s30 = sld [smem:[#allocation2 + $0x4e]] }
 0x142   : > { %1379 = vrot.lane.b32.xlu0 %v1375_v57, %s3125_s7  ;;  %v1415_v22 = vmul.f32 %v1413_v20, %v3722_v33 }
 0x143   : > { %v3759_v26 = vpop.permute.xlu1 %973 }
 0x144   : > { %5095 = vst [vmem:[#allocation21_spill] sm:$0xff] %v3759_v26  ;;  %v3761_v7 = vpop.permute.xlu0 %971 }
 0x145   : > { %5096 = vst [vmem:[#allocation22_spill] sm:$0xff] %v3761_v7  ;;  %1394 = vrot.lane.b32.xlu1 %v1389_v63, %s3125_s7  ;;  %v1414_v63 = vmul.f32 %v1413_v20, %v3727_v48  ;;  %v1426_v7 = vstv %s2931_s4  ;;  %s2937_s4 = sld [smem:[#allocation2 + $0x80]] }
 0x146   : > { %1392 = vrot.lane.b32.xlu0 %v1388_v59, %s3125_s7  ;;  %v1428_v32 = vmul.f32 %v1426_v7, %v3722_v33 }
 0x147   : > { %v3767_v31 = vpop.permute.xlu1 %986 }
 0x148   : > { %5097 = vst [vmem:[#allocation23_spill] sm:$0xff] %v3767_v31  ;;  %v3769_v57 = vpop.permute.xlu0 %984 }
 0x149   : > { %5098 = vst [vmem:[#allocation24_spill] sm:$0xff] %v3769_v57  ;;  %1407 = vrot.lane.b32.xlu1 %v1402_v9, %s3126_s14  ;;  %v1427_v9 = vmul.f32 %v1426_v7, %v3727_v48  ;;  %v1439_v57 = vstv %s2981_s6  ;;  %s2987_s6 = sld [smem:[#allocation2 + $0xb2]] }
 0x14a   : > { %1405 = vrot.lane.b32.xlu0 %v1401_v13, %s3126_s14  ;;  %v1441_v20 = vmul.f32 %v1439_v57, %v3722_v33 }
 0x14b   : > { %v3775_v26 = vpop.permute.xlu1 %999 }
 0x14c   : > { %5099 = vst [vmem:[#allocation25_spill] sm:$0xff] %v3775_v26  ;;  %v3777_v59 = vpop.permute.xlu0 %997 }
 0x14d   : > { %5100 = vst [vmem:[#allocation26_spill] sm:$0xff] %v3777_v59  ;;  %1420 = vrot.lane.b32.xlu1 %v1415_v22, %s3126_s14  ;;  %v1440_v22 = vmul.f32 %v1439_v57, %v3727_v48  ;;  %v1452_v59 = vstv %s2832_s8  ;;  %s2838_s8 = sld [smem:[#allocation2 + $0x1d]] }
 0x14e   : > { %1418 = vrot.lane.b32.xlu0 %v1414_v63, %s3126_s14  ;;  %v1454_v7 = vmul.f32 %v1452_v59, %v3722_v33 }
 0x14f   : > { %v3783_v31 = vpop.permute.xlu1 %1012 }
 0x150   : > { %5101 = vst [vmem:[#allocation27_spill] sm:$0xff] %v3783_v31  ;;  %v3785_v13 = vpop.permute.xlu0 %1010 }
 0x151   : > { %5102 = vst [vmem:[#allocation28_spill] sm:$0xff] %v3785_v13  ;;  %1433 = vrot.lane.b32.xlu1 %v1428_v32, %s3126_s14  ;;  %v1453_v32 = vmul.f32 %v1452_v59, %v3727_v48  ;;  %v1465_v13 = vstv %s2882_s9  ;;  %s2888_s9 = sld [smem:[#allocation2 + $0x4f]] }
 0x152   : > { %1431 = vrot.lane.b32.xlu0 %v1427_v9, %s3126_s14  ;;  %v1467_v57 = vmul.f32 %v1465_v13, %v3722_v33 }
 0x153   : > { %v3791_v26 = vpop.permute.xlu1 %1025 }
 0x154   : > { %5103 = vst [vmem:[#allocation29_spill] sm:$0xff] %v3791_v26  ;;  %v3793_v63 = vpop.permute.xlu0 %1023 }
 0x155   : > { %5104 = vst [vmem:[#allocation30_spill] sm:$0xff] %v3793_v63  ;;  %1446 = vrot.lane.b32.xlu1 %v1441_v20, %s3126_s14  ;;  %v1466_v20 = vmul.f32 %v1465_v13, %v3727_v48  ;;  %v1478_v63 = vstv %s2932_s10  ;;  %s2938_s10 = sld [smem:[#allocation2 + $0x81]] }
 0x156   : > { %1444 = vrot.lane.b32.xlu0 %v1440_v22, %s3126_s14  ;;  %v1480_v59 = vmul.f32 %v1478_v63, %v3722_v33 }
 0x157   : > { %v3799_v31 = vpop.permute.xlu1 %1038 }
 0x158   : > { %5105 = vst [vmem:[#allocation31_spill] sm:$0xff] %v3799_v31  ;;  %v3801_v9 = vpop.permute.xlu0 %1036 }
 0x159   : > { %5106 = vst [vmem:[#allocation32_spill] sm:$0xff] %v3801_v9  ;;  %1459 = vrot.lane.b32.xlu1 %v1454_v7, %s3127_s19  ;;  %v1479_v7 = vmul.f32 %v1478_v63, %v3727_v48  ;;  %v1491_v9 = vstv %s2982_s11  ;;  %s2988_s11 = sld [smem:[#allocation2 + $0xb3]] }
 0x15a   : > { %1457 = vrot.lane.b32.xlu0 %v1453_v32, %s3127_s19  ;;  %v1493_v13 = vmul.f32 %v1491_v9, %v3722_v33 }
 0x15b   : > { %v3807_v26 = vpop.permute.xlu1 %1051 }
 0x15c   : > { %5107 = vst [vmem:[#allocation33_spill] sm:$0xff] %v3807_v26  ;;  %v3809_v22 = vpop.permute.xlu0 %1049 }
 0x15d   : > { %5108 = vst [vmem:[#allocation34_spill] sm:$0xff] %v3809_v22  ;;  %1472 = vrot.lane.b32.xlu1 %v1467_v57, %s3127_s19  ;;  %v1492_v57 = vmul.f32 %v1491_v9, %v3727_v48  ;;  %v1504_v22 = vstv %s2833_s15  ;;  %s2840_s15 = sld [smem:[#allocation2 + $0x1f]] }
 0x15e   : > { %1470 = vrot.lane.b32.xlu0 %v1466_v20, %s3127_s19  ;;  %v1506_v63 = vmul.f32 %v1504_v22, %v3722_v33 }
 0x15f   : > { %v3815_v31 = vpop.permute.xlu1 %1064 }
 0x160   : > { %5109 = vst [vmem:[#allocation35_spill] sm:$0xff] %v3815_v31  ;;  %v3817_v32 = vpop.permute.xlu0 %1062 }
 0x161   : > { %5110 = vst [vmem:[#allocation36_spill] sm:$0xff] %v3817_v32  ;;  %1485 = vrot.lane.b32.xlu1 %v1480_v59, %s3127_s19  ;;  %v1505_v59 = vmul.f32 %v1504_v22, %v3727_v48  ;;  %v1517_v32 = vstv %s2883_s16  ;;  %s2890_s16 = sld [smem:[#allocation2 + $0x51]] }
 0x162   : > { %1483 = vrot.lane.b32.xlu0 %v1479_v7, %s3127_s19  ;;  %v1519_v9 = vmul.f32 %v1517_v32, %v3722_v33 }
 0x163   : > { %v3823_v26 = vpop.permute.xlu1 %1077 }
 0x164   : > { %5111 = vst [vmem:[#allocation37_spill] sm:$0xff] %v3823_v26  ;;  %v3825_v20 = vpop.permute.xlu0 %1075  ;;  %v1579_v26 = vstv %s2835_s20  ;;  %s2841_s20 = sld [smem:[#allocation2 + $0x20]] }
 0x165   : > { %5112 = vst [vmem:[#allocation38_spill] sm:$0xff] %v3825_v20  ;;  %1498 = vrot.lane.b32.xlu1 %v1493_v13, %s3127_s19  ;;  %v1518_v13 = vmul.f32 %v1517_v32, %v3727_v48  ;;  %v1530_v20 = vstv %s2933_s17  ;;  %s2940_s17 = sld [smem:[#allocation2 + $0x83]] }
 0x166   : > { %1496 = vrot.lane.b32.xlu0 %v1492_v57, %s3127_s19 }
 0x167   : > { %v3831_v31 = vpop.permute.xlu1 %1090 }
 0x168   : > { %5113 = vst [vmem:[#allocation39_spill] sm:$0xff] %v3831_v31  ;;  %v3833_v7 = vpop.permute.xlu0 %1088  ;;  %v1543_v31 = vstv %s2983_s18  ;;  %s2990_s18 = sld [smem:[#allocation2 + $0xb5]] }
 0x169   : > { %5114 = vst [vmem:[#allocation40_spill] sm:$0xff] %v3833_v7  ;;  %1511 = vrot.lane.b32.xlu1 %v1506_v63, %s3128_s24  ;;  %v1532_v7 = vmul.f32 %v1530_v20, %v3722_v33  ;;  %v1531_v63 = vmul.f32 %v1530_v20, %v3727_v48  ;;  %v3861_v20 = vld [vmem:[%s3202_s5 + $0x10] sm:$0xff] }
 0x16a   : > { %1509 = vrot.lane.b32.xlu0 %v1505_v59, %s3128_s24  ;;  %5121 = vst [vmem:[#allocation47_spill] sm:$0xff] %v3861_v20 }
 0x16b   : > { %v3839_v57 = vpop.permute.xlu1 %1125 }
 0x16c   : > { %5115 = vst [vmem:[#allocation41_spill] sm:$0xff] %v3839_v57  ;;  %v3841_v22 = vpop.permute.xlu0 %1123  ;;  %v1545_v57 = vmul.f32 %v1543_v31, %v3722_v33  ;;  %v1580_v33 = vmul.f32 %v3861_v20, %v1579_v26 }
 0x16d   : > { %5116 = vst [vmem:[#allocation42_spill] sm:$0xff] %v3841_v22  ;;  %1524 = vrot.lane.b32.xlu1 %v1519_v9, %s3128_s24  ;;  %v1544_v9 = vmul.f32 %v1543_v31, %v3727_v48  ;;  %v3856_v22 = vld [vmem:[%s3202_s5 + $0x18] sm:$0xf] }
 0x16e   : > { %1522 = vrot.lane.b32.xlu0 %v1518_v13, %s3128_s24  ;;  %5119 = vst [vmem:[#allocation45_spill] sm:$0xff] %v3856_v22 }
 0x16f   : > { %v3847_v59 = vpop.permute.xlu1 %1138 }
 0x170   : > { %5117 = vst [vmem:[#allocation43_spill] sm:$0xff] %v3847_v59  ;;  %v3849_v32 = vpop.permute.xlu0 %1136 }
 0x171   : > { %5118 = vst [vmem:[#allocation44_spill] sm:$0xff] %v3849_v32  ;;  %1537 = vrot.lane.b32.xlu1 %v1532_v7, %s3128_s24  ;;  %v1581_v7 = vmul.f32 %v3856_v22, %v1579_v26 }
 0x172   : > { %1535 = vrot.lane.b32.xlu0 %v1531_v63, %s3128_s24  ;;  %v1592_v63 = vstv %s2885_s21  ;;  %s2891_s21 = sld [smem:[#allocation2 + $0x52]] }
 0x173   : > { %v3858_v13 = vpop.permute.xlu1 %1151 }
 0x174   : > { %5120 = vst [vmem:[#allocation46_spill] sm:$0xff] %v3858_v13  ;;  %v3863_v30 = vpop.permute.xlu0 %1149  ;;  %v1594_v13 = vmul.f32 %v3856_v22, %v1592_v63 }
 0x175   : > { %5122 = vst [vmem:[#allocation48_spill] sm:$0xff] %v3863_v30  ;;  %1550 = vrot.lane.b32.xlu1 %v1545_v57, %s3128_s24  ;;  %v1593_v57 = vmul.f32 %v3861_v20, %v1592_v63  ;;  %v1605_v30 = vstv %s2935_s22  ;;  %s2941_s22 = sld [smem:[#allocation2 + $0x84]] }
 0x176   : > { %1548 = vrot.lane.b32.xlu0 %v1544_v9, %s3128_s24  ;;  %v1607_v26 = vmul.f32 %v3856_v22, %v1605_v30 }
 0x177   : > { %v3869_v48 = vpop.permute.xlu1 %1164 }
 0x178   : > { %5123 = vst [vmem:[#allocation49_spill] sm:$0xff] %v3869_v48  ;;  %v3871_v31 = vpop.permute.xlu0 %1162 }
 0x179   : > { %5124 = vst [vmem:[#allocation50_spill] sm:$0xff] %v3871_v31  ;;  %1586 = vrot.lane.b32.xlu1 %v1581_v7, %s3125_s7  ;;  %v1606_v7 = vmul.f32 %v3861_v20, %v1605_v30  ;;  %v1618_v31 = vstv %s2985_s23  ;;  %s2991_s23 = sld [smem:[#allocation2 + $0xb6]] }
 0x17a   : > { %1584 = vrot.lane.b32.xlu0 %v1580_v33, %s3125_s7  ;;  %v1620_v63 = vmul.f32 %v3856_v22, %v1618_v31 }
 0x17b   : > { %v3877_v32 = vpop.permute.xlu1 %1177 }
 0x17c   : > { %5125 = vst [vmem:[#allocation51_spill] sm:$0xff] %v3877_v32  ;;  %v3879_v9 = vpop.permute.xlu0 %1175 }
 0x17d   : > { %5126 = vst [vmem:[#allocation52_spill] sm:$0xff] %v3879_v9  ;;  %1599 = vrot.lane.b32.xlu1 %v1594_v13, %s3125_s7  ;;  %v1619_v13 = vmul.f32 %v3861_v20, %v1618_v31  ;;  %v1631_v9 = vstv %s2836_s25  ;;  %s2842_s25 = sld [smem:[#allocation2 + $0x21]] }
 0x17e   : > { %1597 = vrot.lane.b32.xlu0 %v1593_v57, %s3125_s7  ;;  %v1633_v30 = vmul.f32 %v3856_v22, %v1631_v9 }
 0x17f   : > { %v3885_v48 = vpop.permute.xlu1 %1190 }
 0x180   : > { %5127 = vst [vmem:[#allocation53_spill] sm:$0xff] %v3885_v48  ;;  %v3887_v33 = vpop.permute.xlu0 %1188 }
 0x181   : > { %5128 = vst [vmem:[#allocation54_spill] sm:$0xff] %v3887_v33  ;;  %1612 = vrot.lane.b32.xlu1 %v1607_v26, %s3125_s7  ;;  %v1632_v26 = vmul.f32 %v3861_v20, %v1631_v9  ;;  %v1644_v33 = vstv %s2886_s26  ;;  %s2892_s26 = sld [smem:[#allocation2 + $0x53]] }
 0x182   : > { %1610 = vrot.lane.b32.xlu0 %v1606_v7, %s3125_s7  ;;  %v1646_v31 = vmul.f32 %v3856_v22, %v1644_v33 }
 0x183   : > { %v3893_v32 = vpop.permute.xlu1 %1203 }
 0x184   : > { %5129 = vst [vmem:[#allocation55_spill] sm:$0xff] %v3893_v32  ;;  %v3895_v57 = vpop.permute.xlu0 %1201 }
 0x185   : > { %5130 = vst [vmem:[#allocation56_spill] sm:$0xff] %v3895_v57  ;;  %1625 = vrot.lane.b32.xlu1 %v1620_v63, %s3125_s7  ;;  %v1645_v63 = vmul.f32 %v3861_v20, %v1644_v33  ;;  %v1657_v57 = vstv %s2936_s27  ;;  %s2942_s27 = sld [smem:[#allocation2 + $0x85]] }
 0x186   : > { %1623 = vrot.lane.b32.xlu0 %v1619_v13, %s3125_s7  ;;  %v1659_v9 = vmul.f32 %v3856_v22, %v1657_v57 }
 0x187   : > { %v3901_v48 = vpop.permute.xlu1 %1216 }
 0x188   : > { %5131 = vst [vmem:[#allocation57_spill] sm:$0xff] %v3901_v48  ;;  %v3903_v7 = vpop.permute.xlu0 %1214 }
 0x189   : > { %5132 = vst [vmem:[#allocation58_spill] sm:$0xff] %v3903_v7  ;;  %1638 = vrot.lane.b32.xlu1 %v1633_v30, %s3126_s14  ;;  %v1658_v30 = vmul.f32 %v3861_v20, %v1657_v57  ;;  %v1670_v7 = vstv %s2986_s28  ;;  %s2992_s28 = sld [smem:[#allocation2 + $0xb7]] }
 0x18a   : > { %1636 = vrot.lane.b32.xlu0 %v1632_v26, %s3126_s14  ;;  %v1672_v33 = vmul.f32 %v3856_v22, %v1670_v7 }
 0x18b   : > { %v3909_v32 = vpop.permute.xlu1 %1229 }
 0x18c   : > { %5133 = vst [vmem:[#allocation59_spill] sm:$0xff] %v3909_v32  ;;  %v3911_v13 = vpop.permute.xlu0 %1227 }
 0x18d   : > { %5134 = vst [vmem:[#allocation60_spill] sm:$0xff] %v3911_v13  ;;  %1651 = vrot.lane.b32.xlu1 %v1646_v31, %s3126_s14  ;;  %v1671_v31 = vmul.f32 %v3861_v20, %v1670_v7  ;;  %v1683_v13 = vstv %s2837_s29  ;;  %s2843_s29 = sld [smem:[#allocation2 + $0x22]] }
 0x18e   : > { %1649 = vrot.lane.b32.xlu0 %v1645_v63, %s3126_s14  ;;  %v1685_v57 = vmul.f32 %v3856_v22, %v1683_v13 }
 0x18f   : > { %v3917_v48 = vpop.permute.xlu1 %1242 }
 0x190   : > { %5135 = vst [vmem:[#allocation61_spill] sm:$0xff] %v3917_v48  ;;  %v3919_v26 = vpop.permute.xlu0 %1240 }
 0x191   : > { %5136 = vst [vmem:[#allocation62_spill] sm:$0xff] %v3919_v26  ;;  %1664 = vrot.lane.b32.xlu1 %v1659_v9, %s3126_s14  ;;  %v1684_v9 = vmul.f32 %v3861_v20, %v1683_v13  ;;  %v1696_v26 = vstv %s2887_s30  ;;  %s2893_s30 = sld [smem:[#allocation2 + $0x54]] }
 0x192   : > { %1662 = vrot.lane.b32.xlu0 %v1658_v30, %s3126_s14  ;;  %v1698_v7 = vmul.f32 %v3856_v22, %v1696_v26 }
 0x193   : > { %v3925_v32 = vpop.permute.xlu1 %1255 }
 0x194   : > { %5137 = vst [vmem:[#allocation63_spill] sm:$0xff] %v3925_v32  ;;  %v3927_v63 = vpop.permute.xlu0 %1253 }
 0x195   : > { %5138 = vst [vmem:[#allocation64_spill] sm:$0xff] %v3927_v63  ;;  %1677 = vrot.lane.b32.xlu1 %v1672_v33, %s3126_s14  ;;  %v1697_v33 = vmul.f32 %v3861_v20, %v1696_v26  ;;  %v1709_v63 = vstv %s2937_s4  ;;  %s2943_s4 = sld [smem:[#allocation2 + $0x86]] }
 0x196   : > { %1675 = vrot.lane.b32.xlu0 %v1671_v31, %s3126_s14  ;;  %v1711_v13 = vmul.f32 %v3856_v22, %v1709_v63 }
 0x197   : > { %v3933_v48 = vpop.permute.xlu1 %1268 }
 0x198   : > { %5139 = vst [vmem:[#allocation65_spill] sm:$0xff] %v3933_v48  ;;  %v3935_v30 = vpop.permute.xlu0 %1266 }
 0x199   : > { %5140 = vst [vmem:[#allocation66_spill] sm:$0xff] %v3935_v30  ;;  %1690 = vrot.lane.b32.xlu1 %v1685_v57, %s3127_s19  ;;  %v1710_v57 = vmul.f32 %v3861_v20, %v1709_v63  ;;  %v1722_v30 = vstv %s2987_s6  ;;  %s2993_s6 = sld [smem:[#allocation2 + $0xb8]] }
 0x19a   : > { %1688 = vrot.lane.b32.xlu0 %v1684_v9, %s3127_s19  ;;  %v1724_v26 = vmul.f32 %v3856_v22, %v1722_v30 }
 0x19b   : > { %v3941_v32 = vpop.permute.xlu1 %1281 }
 0x19c   : > { %5141 = vst [vmem:[#allocation67_spill] sm:$0xff] %v3941_v32  ;;  %v3943_v31 = vpop.permute.xlu0 %1279 }
 0x19d   : > { %5142 = vst [vmem:[#allocation68_spill] sm:$0xff] %v3943_v31  ;;  %1703 = vrot.lane.b32.xlu1 %v1698_v7, %s3127_s19  ;;  %v1723_v7 = vmul.f32 %v3861_v20, %v1722_v30  ;;  %v1735_v31 = vstv %s2838_s8  ;;  %s2845_s8 = sld [smem:[#allocation2 + $0x24]] }
 0x19e   : > { %1701 = vrot.lane.b32.xlu0 %v1697_v33, %s3127_s19  ;;  %v1737_v63 = vmul.f32 %v3856_v22, %v1735_v31 }
 0x19f   : > { %v3949_v48 = vpop.permute.xlu1 %1294 }
 0x1a0   : > { %5143 = vst [vmem:[#allocation69_spill] sm:$0xff] %v3949_v48  ;;  %v3951_v9 = vpop.permute.xlu0 %1292 }
 0x1a1   : > { %5144 = vst [vmem:[#allocation70_spill] sm:$0xff] %v3951_v9  ;;  %1716 = vrot.lane.b32.xlu1 %v1711_v13, %s3127_s19  ;;  %v1736_v13 = vmul.f32 %v3861_v20, %v1735_v31  ;;  %v1748_v9 = vstv %s2888_s9  ;;  %s2895_s9 = sld [smem:[#allocation2 + $0x56]] }
 0x1a2   : > { %1714 = vrot.lane.b32.xlu0 %v1710_v57, %s3127_s19  ;;  %v1750_v30 = vmul.f32 %v3856_v22, %v1748_v9 }
 0x1a3   : > { %v3957_v32 = vpop.permute.xlu1 %1307 }
 0x1a4   : > { %5145 = vst [vmem:[#allocation71_spill] sm:$0xff] %v3957_v32  ;;  %v3959_v33 = vpop.permute.xlu0 %1305  ;;  %v1809_v32 = vstv %s2840_s15  ;;  %s2846_s15 = sld [smem:[#allocation2 + $0x25]] }
 0x1a5   : > { %5146 = vst [vmem:[#allocation72_spill] sm:$0xff] %v3959_v33  ;;  %1729 = vrot.lane.b32.xlu1 %v1724_v26, %s3127_s19  ;;  %v1749_v26 = vmul.f32 %v3861_v20, %v1748_v9  ;;  %v1761_v33 = vstv %s2938_s10  ;;  %s2945_s10 = sld [smem:[#allocation2 + $0x88]] }
 0x1a6   : > { %1727 = vrot.lane.b32.xlu0 %v1723_v7, %s3127_s19 }
 0x1a7   : > { %v3965_v48 = vpop.permute.xlu1 %1320 }
 0x1a8   : > { %5147 = vst [vmem:[#allocation73_spill] sm:$0xff] %v3965_v48  ;;  %v3967_v57 = vpop.permute.xlu0 %1318  ;;  %v1774_v48 = vstv %s2988_s11  ;;  %s2995_s11 = sld [smem:[#allocation2 + $0xba]] }
 0x1a9   : > { %5148 = vst [vmem:[#allocation74_spill] sm:$0xff] %v3967_v57  ;;  %1742 = vrot.lane.b32.xlu1 %v1737_v63, %s3128_s24  ;;  %v1763_v57 = vmul.f32 %v3856_v22, %v1761_v33  ;;  %v1762_v63 = vmul.f32 %v3861_v20, %v1761_v33  ;;  %v3995_v33 = vld [vmem:[%s3202_s5 + $0x11] sm:$0xff] }
 0x1aa   : > { %1740 = vrot.lane.b32.xlu0 %v1736_v13, %s3128_s24  ;;  %5155 = vst [vmem:[#allocation81_spill] sm:$0xff] %v3995_v33 }
 0x1ab   : > { %v3973_v7 = vpop.permute.xlu1 %1355 }
 0x1ac   : > { %5149 = vst [vmem:[#allocation75_spill] sm:$0xff] %v3973_v7  ;;  %v3975_v31 = vpop.permute.xlu0 %1353  ;;  %v1776_v7 = vmul.f32 %v3856_v22, %v1774_v48 }
 0x1ad   : > { %5150 = vst [vmem:[#allocation76_spill] sm:$0xff] %v3975_v31  ;;  %1755 = vrot.lane.b32.xlu1 %v1750_v30, %s3128_s24  ;;  %v1775_v30 = vmul.f32 %v3861_v20, %v1774_v48  ;;  %v3990_v31 = vld [vmem:[%s3202_s5 + $0x19] sm:$0xf] }
 0x1ae   : > { %1753 = vrot.lane.b32.xlu0 %v1749_v26, %s3128_s24  ;;  %5153 = vst [vmem:[#allocation79_spill] sm:$0xff] %v3990_v31 }
 0x1af   : > { %v3981_v13 = vpop.permute.xlu1 %1368 }
 0x1b0   : > { %5151 = vst [vmem:[#allocation77_spill] sm:$0xff] %v3981_v13  ;;  %v3983_v9 = vpop.permute.xlu0 %1366 }
 0x1b1   : > { %5152 = vst [vmem:[#allocation78_spill] sm:$0xff] %v3983_v9  ;;  %1768 = vrot.lane.b32.xlu1 %v1763_v57, %s3128_s24  ;;  %v1811_v57 = vmul.f32 %v3990_v31, %v1809_v32  ;;  %v1822_v9 = vstv %s2890_s16  ;;  %s2896_s16 = sld [smem:[#allocation2 + $0x57]] }
 0x1b2   : > { %1766 = vrot.lane.b32.xlu0 %v1762_v63, %s3128_s24  ;;  %v1810_v63 = vmul.f32 %v3995_v33, %v1809_v32 }
 0x1b3   : > { %v3992_v26 = vpop.permute.xlu1 %1381 }
 0x1b4   : > { %5154 = vst [vmem:[#allocation80_spill] sm:$0xff] %v3992_v26  ;;  %v3997_v59 = vpop.permute.xlu0 %1379  ;;  %v1824_v26 = vmul.f32 %v3990_v31, %v1822_v9 }
 0x1b5   : > { %5156 = vst [vmem:[#allocation82_spill] sm:$0xff] %v3997_v59  ;;  %1781 = vrot.lane.b32.xlu1 %v1776_v7, %s3128_s24  ;;  %v1823_v7 = vmul.f32 %v3995_v33, %v1822_v9  ;;  %v1835_v59 = vstv %s2940_s17  ;;  %s4161_s17 = sld [smem:[#allocation2 + $0x89]] }
 0x1b6   : > { %1779 = vrot.lane.b32.xlu0 %v1775_v30, %s3128_s24  ;;  %v1837_v32 = vmul.f32 %v3990_v31, %v1835_v59 }
 0x1b7   : > { %v4003_v48 = vpop.permute.xlu1 %1394 }
 0x1b8   : > { %5157 = vst [vmem:[#allocation83_spill] sm:$0xff] %v4003_v48  ;;  %v4005_v13 = vpop.permute.xlu0 %1392 }
 0x1b9   : > { %5158 = vst [vmem:[#allocation84_spill] sm:$0xff] %v4005_v13  ;;  %1816 = vrot.lane.b32.xlu1 %v1811_v57, %s3125_s7  ;;  %v1836_v57 = vmul.f32 %v3995_v33, %v1835_v59  ;;  %v1848_v13 = vstv %s2990_s18  ;;  %s4163_s18 = sld [smem:[#allocation2 + $0xa]] }
 0x1ba   : > { %1814 = vrot.lane.b32.xlu0 %v1810_v63, %s3125_s7  ;;  %v1850_v9 = vmul.f32 %v3990_v31, %v1848_v13 }
 0x1bb   : > { %v4011_v20 = vpop.permute.xlu1 %1407 }
 0x1bc   : > { %5159 = vst [vmem:[#allocation85_spill] sm:$0xff] %v4011_v20  ;;  %v4013_v30 = vpop.permute.xlu0 %1405 }
 0x1bd   : > { %5160 = vst [vmem:[#allocation86_spill] sm:$0xff] %v4013_v30  ;;  %1829 = vrot.lane.b32.xlu1 %v1824_v26, %s3125_s7  ;;  %v1849_v26 = vmul.f32 %v3995_v33, %v1848_v13  ;;  %v1861_v30 = vstv %s2841_s20  ;;  %s4167_s20 = sld [smem:[#allocation2 + $0x3c]] }
 0x1be   : > { %1827 = vrot.lane.b32.xlu0 %v1823_v7, %s3125_s7  ;;  %v1863_v59 = vmul.f32 %v3990_v31, %v1861_v30 }
 0x1bf   : > { %v4019_v48 = vpop.permute.xlu1 %1420 }
 0x1c0   : > { %5161 = vst [vmem:[#allocation87_spill] sm:$0xff] %v4019_v48  ;;  %v4021_v63 = vpop.permute.xlu0 %1418 }
 0x1c1   : > { %5162 = vst [vmem:[#allocation88_spill] sm:$0xff] %v4021_v63  ;;  %1842 = vrot.lane.b32.xlu1 %v1837_v32, %s3125_s7  ;;  %v1862_v32 = vmul.f32 %v3995_v33, %v1861_v30  ;;  %v1874_v63 = vstv %s2891_s21  ;;  %s4171_s21 = sld [smem:[#allocation2 + $0x6e]] }
 0x1c2   : > { %1840 = vrot.lane.b32.xlu0 %v1836_v57, %s3125_s7  ;;  %v1876_v13 = vmul.f32 %v3990_v31, %v1874_v63 }
 0x1c3   : > { %v4027_v20 = vpop.permute.xlu1 %1433 }
 0x1c4   : > { %5163 = vst [vmem:[#allocation89_spill] sm:$0xff] %v4027_v20  ;;  %v4029_v7 = vpop.permute.xlu0 %1431 }
 0x1c5   : > { %5164 = vst [vmem:[#allocation90_spill] sm:$0xff] %v4029_v7  ;;  %1855 = vrot.lane.b32.xlu1 %v1850_v9, %s3125_s7  ;;  %v1875_v9 = vmul.f32 %v3995_v33, %v1874_v63  ;;  %v1887_v7 = vstv %s2941_s22  ;;  %s4177_s22 = sld [smem:[#allocation2 + $0xbb]] }
 0x1c6   : > { %1853 = vrot.lane.b32.xlu0 %v1849_v26, %s3125_s7  ;;  %v1889_v30 = vmul.f32 %v3990_v31, %v1887_v7 }
 0x1c7   : > { %v4035_v48 = vpop.permute.xlu1 %1446 }
 0x1c8   : > { %5165 = vst [vmem:[#allocation91_spill] sm:$0xff] %v4035_v48  ;;  %v4037_v57 = vpop.permute.xlu0 %1444 }
 0x1c9   : > { %5166 = vst [vmem:[#allocation92_spill] sm:$0xff] %v4037_v57  ;;  %1868 = vrot.lane.b32.xlu1 %v1863_v59, %s3126_s14  ;;  %v1888_v59 = vmul.f32 %v3995_v33, %v1887_v7  ;;  %v1900_v57 = vstv %s2991_s23  ;;  %s4179_s23 = sld [smem:[#allocation2 + $0xa0]] }
 0x1ca   : > { %1866 = vrot.lane.b32.xlu0 %v1862_v32, %s3126_s14  ;;  %v1902_v63 = vmul.f32 %v3990_v31, %v1900_v57 }
 0x1cb   : > { %v4043_v20 = vpop.permute.xlu1 %1459 }
 0x1cc   : > { %5167 = vst [vmem:[#allocation93_spill] sm:$0xff] %v4043_v20  ;;  %v4045_v26 = vpop.permute.xlu0 %1457 }
 0x1cd   : > { %5168 = vst [vmem:[#allocation94_spill] sm:$0xff] %v4045_v26  ;;  %1881 = vrot.lane.b32.xlu1 %v1876_v13, %s3126_s14  ;;  %v1901_v13 = vmul.f32 %v3995_v33, %v1900_v57  ;;  %v1913_v26 = vstv %s2842_s25  ;;  %s4183_s25 = sld [smem:[#allocation2 + $0xf]] }
 0x1ce   : > { %1879 = vrot.lane.b32.xlu0 %v1875_v9, %s3126_s14  ;;  %v1915_v7 = vmul.f32 %v3990_v31, %v1913_v26 }
 0x1cf   : > { %v4051_v48 = vpop.permute.xlu1 %1472  ;;  %v883_v10 = vstv %s4179_s23  ;;  %s4423_s23 = sld [smem:[#allocation2 + $0x29]] }
 0x1d0   : > { %5169 = vst [vmem:[#allocation95_spill] sm:$0xff] %v4051_v48  ;;  %v4053_v32 = vpop.permute.xlu0 %1470 }
 0x1d1   : > { %5170 = vst [vmem:[#allocation96_spill] sm:$0xff] %v4053_v32  ;;  %1894 = vrot.lane.b32.xlu1 %v1889_v30, %s3126_s14  ;;  %v1914_v30 = vmul.f32 %v3995_v33, %v1913_v26  ;;  %v1926_v32 = vstv %s2892_s26  ;;  %s4187_s26 = sld [smem:[#allocation2 + $0x41]] }
 0x1d2   : > { %1892 = vrot.lane.b32.xlu0 %v1888_v59, %s3126_s14  ;;  %v1928_v57 = vmul.f32 %v3990_v31, %v1926_v32 }
 0x1d3   : > { %v4059_v20 = vpop.permute.xlu1 %1485  ;;  %v1098_v1 = vstv %s4183_s25  ;;  %s4435_s25 = sld [smem:[#allocation2 + $0xaf]] }
 0x1d4   : > { %5171 = vst [vmem:[#allocation97_spill] sm:$0xff] %v4059_v20  ;;  %v4061_v9 = vpop.permute.xlu0 %1483 }
 0x1d5   : > { %5172 = vst [vmem:[#allocation98_spill] sm:$0xff] %v4061_v9  ;;  %1907 = vrot.lane.b32.xlu1 %v1902_v63, %s3126_s14  ;;  %v1927_v63 = vmul.f32 %v3995_v33, %v1926_v32  ;;  %v1939_v9 = vstv %s2942_s27  ;;  %s4194_s27 = sld [smem:[#allocation2 + $0x26]] }
 0x1d6   : > { %1905 = vrot.lane.b32.xlu0 %v1901_v13, %s3126_s14  ;;  %v1941_v26 = vmul.f32 %v3990_v31, %v1939_v9 }
 0x1d7   : > { %v4067_v48 = vpop.permute.xlu1 %1498  ;;  %v1103_v47 = vstv %s4187_s26  ;;  %s4449_s26 = sld [smem:[#allocation2 + $0x5b]] }
 0x1d8   : > { %5173 = vst [vmem:[#allocation99_spill] sm:$0xff] %v4067_v48  ;;  %v4069_v59 = vpop.permute.xlu0 %1496 }
 0x1d9   : > { %5174 = vst [vmem:[#allocation100_spill] sm:$0xff] %v4069_v59  ;;  %1920 = vrot.lane.b32.xlu1 %v1915_v7, %s3127_s19  ;;  %v1940_v7 = vmul.f32 %v3995_v33, %v1939_v9  ;;  %v1952_v59 = vstv %s2992_s28  ;;  %s4196_s28 = sld [smem:[#allocation2 + $0x73]] }
 0x1da   : > { %1918 = vrot.lane.b32.xlu0 %v1914_v30, %s3127_s19  ;;  %v1954_v32 = vmul.f32 %v3990_v31, %v1952_v59 }
 0x1db   : > { %v4075_v20 = vpop.permute.xlu1 %1511 }
 0x1dc   : > { %5175 = vst [vmem:[#allocation101_spill] sm:$0xff] %v4075_v20  ;;  %v4077_v13 = vpop.permute.xlu0 %1509 }
 0x1dd   : > { %5176 = vst [vmem:[#allocation102_spill] sm:$0xff] %v4077_v13  ;;  %1933 = vrot.lane.b32.xlu1 %v1928_v57, %s3127_s19  ;;  %v1953_v57 = vmul.f32 %v3995_v33, %v1952_v59  ;;  %v1965_v13 = vstv %s2843_s29  ;;  %s4200_s29 = sld [smem:[#allocation2 + $0xa5]] }
 0x1de   : > { %1931 = vrot.lane.b32.xlu0 %v1927_v63, %s3127_s19  ;;  %v1967_v9 = vmul.f32 %v3990_v31, %v1965_v13 }
 0x1df   : > { %v4083_v48 = vpop.permute.xlu1 %1524 }
 0x1e0   : > { %5177 = vst [vmem:[#allocation103_spill] sm:$0xff] %v4083_v48  ;;  %v4085_v30 = vpop.permute.xlu0 %1522 }
 0x1e1   : > { %5178 = vst [vmem:[#allocation104_spill] sm:$0xff] %v4085_v30  ;;  %1946 = vrot.lane.b32.xlu1 %v1941_v26, %s3127_s19  ;;  %v1966_v26 = vmul.f32 %v3995_v33, %v1965_v13  ;;  %v1978_v30 = vstv %s2893_s30  ;;  %s4210_s30 = sld [smem:[#allocation2 + $0x58]] }
 0x1e2   : > { %1944 = vrot.lane.b32.xlu0 %v1940_v7, %s3127_s19  ;;  %v1980_v59 = vmul.f32 %v3990_v31, %v1978_v30 }
 0x1e3   : > { %v4091_v20 = vpop.permute.xlu1 %1537 }
 0x1e4   : > { %5179 = vst [vmem:[#allocation105_spill] sm:$0xff] %v4091_v20  ;;  %v4093_v63 = vpop.permute.xlu0 %1535 }
 0x1e5   : > { %5180 = vst [vmem:[#allocation106_spill] sm:$0xff] %v4093_v63  ;;  %1959 = vrot.lane.b32.xlu1 %v1954_v32, %s3127_s19  ;;  %v1979_v32 = vmul.f32 %v3995_v33, %v1978_v30  ;;  %v1991_v63 = vstv %s2943_s4  ;;  %s4231_s4 = sld [smem:[#allocation2 + $0x8a]] }
 0x1e6   : > { %1957 = vrot.lane.b32.xlu0 %v1953_v57, %s3127_s19  ;;  %v1993_v20 = vmul.f32 %v3990_v31, %v1991_v63 }
 0x1e7   : > { %v4099_v48 = vpop.permute.xlu1 %1550 }
 0x1e8   : > { %5181 = vst [vmem:[#allocation107_spill] sm:$0xff] %v4099_v48  ;;  %v4101_v7 = vpop.permute.xlu0 %1548  ;;  %v2039_v48 = vstv %s2845_s8  ;;  %s4269_s8 = sld [smem:[#allocation2 + $0xbc]] }
 0x1e9   : > { %5182 = vst [vmem:[#allocation108_spill] sm:$0xff] %v4101_v7  ;;  %1972 = vrot.lane.b32.xlu1 %v1967_v9, %s3128_s24  ;;  %v1992_v9 = vmul.f32 %v3995_v33, %v1991_v63  ;;  %v2004_v7 = vstv %s2993_s6  ;;  %v4129_v63 = vld [vmem:[%s3202_s5 + $0x12] sm:$0xff]  ;;  %s4258_s6 = sld [smem:[#allocation2 + $0x14]] }
 0x1ea   : > { %1970 = vrot.lane.b32.xlu0 %v1966_v26, %s3128_s24 }
 0x1eb   : > { %v4107_v57 = vpop.permute.xlu1 %1586 }
 0x1ec   : > { %5183 = vst [vmem:[#allocation109_spill] sm:$0xff] %v4107_v57  ;;  %v4109_v13 = vpop.permute.xlu0 %1584  ;;  %v2006_v57 = vmul.f32 %v3990_v31, %v2004_v7 }
 0x1ed   : > { %5184 = vst [vmem:[#allocation110_spill] sm:$0xff] %v4109_v13  ;;  %1985 = vrot.lane.b32.xlu1 %v1980_v59, %s3128_s24  ;;  %v2005_v59 = vmul.f32 %v3995_v33, %v2004_v7  ;;  %v4124_v13 = vld [vmem:[%s3202_s5 + $0x1a] sm:$0xf] }
 0x1ee   : > { %1983 = vrot.lane.b32.xlu0 %v1979_v32, %s3128_s24 }
 0x1ef   : > { %v4115_v26 = vpop.permute.xlu1 %1599 }
 0x1f0   : > { %5185 = vst [vmem:[#allocation111_spill] sm:$0xff] %v4115_v26  ;;  %v4117_v30 = vpop.permute.xlu0 %1597 }
 0x1f1   : > { %5186 = vst [vmem:[#allocation112_spill] sm:$0xff] %v4117_v30  ;;  %1998 = vrot.lane.b32.xlu1 %v1993_v20, %s3128_s24  ;;  %v2041_v20 = vmul.f32 %v4124_v13, %v2039_v48  ;;  %v2052_v30 = vstv %s2895_s9  ;;  %s4289_s9 = sld [smem:[#allocation2 + $0x46]] }
 0x1f2   : > { %1996 = vrot.lane.b32.xlu0 %v1992_v9, %s3128_s24  ;;  %v2040_v9 = vmul.f32 %v4129_v63, %v2039_v48 }
 0x1f3   : > { %v4126_v32 = vpop.permute.xlu1 %1612 }
 0x1f4   : > { %5187 = vst [vmem:[#allocation113_spill] sm:$0xff] %v4126_v32  ;;  %v4131_v22 = vpop.permute.xlu0 %1610  ;;  %v2054_v32 = vmul.f32 %v4124_v13, %v2052_v30 }
 0x1f5   : > { %5188 = vst [vmem:[#allocation114_spill] sm:$0xff] %v4131_v22  ;;  %2011 = vrot.lane.b32.xlu1 %v2006_v57, %s3128_s24  ;;  %v2053_v57 = vmul.f32 %v4129_v63, %v2052_v30  ;;  %v2065_v22 = vstv %s2945_s10  ;;  %s4299_s10 = sld [smem:[#allocation2 + $0x78]] }
 0x1f6   : > { %2009 = vrot.lane.b32.xlu0 %v2005_v59, %s3128_s24  ;;  %v2067_v48 = vmul.f32 %v4124_v13, %v2065_v22 }
 0x1f7   : > { %v4137_v7 = vpop.permute.xlu1 %1625 }
 0x1f8   : > { %5189 = vst [vmem:[#allocation115_spill] sm:$0xff] %v4137_v7  ;;  %v4139_v26 = vpop.permute.xlu0 %1623 }
 0x1f9   : > { %5190 = vst [vmem:[#allocation116_spill] sm:$0xff] %v4139_v26  ;;  %2046 = vrot.lane.b32.xlu1 %v2041_v20, %s3125_s7  ;;  %v2066_v20 = vmul.f32 %v4129_v63, %v2065_v22  ;;  %v2078_v26 = vstv %s2995_s11  ;;  %s4309_s11 = sld [smem:[#allocation2 + $0x27]] }
 0x1fa   : > { %2044 = vrot.lane.b32.xlu0 %v2040_v9, %s3125_s7  ;;  %v2080_v30 = vmul.f32 %v4124_v13, %v2078_v26 }
 0x1fb   : > { %v4145_v33 = vpop.permute.xlu1 %1638 }
 0x1fc   : > { %5191 = vst [vmem:[#allocation117_spill] sm:$0xff] %v4145_v33  ;;  %v4147_v59 = vpop.permute.xlu0 %1636  ;;  %v878_v33 = vstv %s4171_s21  ;;  %s4407_s21 = sld [smem:[#allocation2 + $0x4b]] }
 0x1fd   : > { %5192 = vst [vmem:[#allocation118_spill] sm:$0xff] %v4147_v59  ;;  %2059 = vrot.lane.b32.xlu1 %v2054_v32, %s3125_s7  ;;  %v2079_v32 = vmul.f32 %v4129_v63, %v2078_v26  ;;  %v2091_v59 = vstv %s2846_s15  ;;  %s4321_s15 = sld [smem:[#allocation2 + $0xaa]] }
 0x1fe   : > { %2057 = vrot.lane.b32.xlu0 %v2053_v57, %s3125_s7  ;;  %v2092_v26 = vmul.f32 %v4129_v63, %v2091_v59 }
 0x1ff   : > { %v4153_v7 = vpop.permute.xlu1 %1651 }
 0x200   : > { %5193 = vst [vmem:[#allocation119_spill] sm:$0xff] %v4153_v7  ;;  %v4155_v9 = vpop.permute.xlu0 %1649 }
 0x201   : > { %5194 = vst [vmem:[#allocation120_spill] sm:$0xff] %v4155_v9  ;;  %2072 = vrot.lane.b32.xlu1 %v2067_v48, %s3125_s7  ;;  %v2093_v48 = vmul.f32 %v4124_v13, %v2091_v59 }
 0x202   : > { %2070 = vrot.lane.b32.xlu0 %v2066_v20, %s3125_s7  ;;  %v2104_v20 = vstv %s2896_s16  ;;  %s4335_s16 = sld [smem:[#allocation2 + $0x59]] }
 0x203   : > { %v4165_v22 = vpop.permute.xlu1 %1664  ;;  %v2105_v59 = vmul.f32 %v4129_v63, %v2104_v20 }
 0x204   : > { %5195 = vst [vmem:[#allocation121_spill] sm:$0xff] %v4165_v22  ;;  %v4169_v57 = vpop.permute.xlu0 %1662 }
 0x205   : > { %5196 = vst [vmem:[#allocation122_spill] sm:$0xff] %v4169_v57  ;;  %2085 = vrot.lane.b32.xlu1 %v2080_v30, %s3125_s7  ;;  %v2106_v30 = vmul.f32 %v4124_v13, %v2104_v20  ;;  %v868_v20 = vstv %s4163_s18  ;;  %s4384_s18 = sld [smem:[#allocation2 + $0x19]] }
 0x206   : > { %2083 = vrot.lane.b32.xlu0 %v2079_v32, %s3125_s7  ;;  %v2117_v32 = vstv %s4161_s17  ;;  %s4363_s17 = sld [smem:[#allocation2 + $0x8b]] }
 0x207   : > { %v4181_v22 = vpop.permute.xlu1 %1677  ;;  %v2118_v7 = vmul.f32 %v4129_v63, %v2117_v32 }
 0x208   : > { %5197 = vst [vmem:[#allocation123_spill] sm:$0xff] %v4181_v22  ;;  %v4185_v57 = vpop.permute.xlu0 %1675  ;;  %v873_v22 = vstv %s4167_s20  ;;  %s4393_s20 = sld [smem:[#allocation2 + $0xbd]] }
 0x209   : > { %5198 = vst [vmem:[#allocation124_spill] sm:$0xff] %v4185_v57  ;;  %2098 = vrot.lane.b32.xlu1 %v2093_v48, %s3126_s14  ;;  %v2130_v57 = vstv %s4177_s22  ;;  %s4414_s22 = sld [smem:[#allocation2 + $0x7d]] }
 0x20a   : > { %2096 = vrot.lane.b32.xlu0 %v2092_v26, %s3126_s14  ;;  %v2119_v26 = vmul.f32 %v4124_v13, %v2117_v32  ;;  %v3066_v32 = vld [vmem:[%s3202_s5 + $0x2] sm:$0xff] }
 0x20b   : > { %v4198_v9 = vpop.permute.xlu1 %1690  ;;  %v4225_v49 = vmul.f32 %v3066_v32, %v868_v20  ;;  %v4250_v0 = vmul.f32 %v3066_v32, %v883_v10 }
 0x20c   : > { %5199 = vst [vmem:[#allocation125_spill] sm:$0xff] %v4198_v9  ;;  %v4202_v48 = vpop.permute.xlu0 %1688 }
 0x20d   : > { %5200 = vst [vmem:[#allocation126_spill] sm:$0xff] %v4202_v48  ;;  %2111 = vrot.lane.b32.xlu1 %v2106_v30, %s3126_s14  ;;  %v3065_v30 = vld [vmem:[%s3202_s5 + $0xa] sm:$0xf] }
 0x20e   : > { %2109 = vrot.lane.b32.xlu0 %v2105_v59, %s3126_s14  ;;  %v4219_v31 = vmul.f32 %v3065_v30, %v868_v20  ;;  %v2132_v59 = vmul.f32 %v4124_v13, %v2130_v57  ;;  %v4233_v35 = vmul.f32 %v3065_v30, %v873_v22  ;;  %v4237_v56 = vmul.f32 %v3065_v30, %v878_v33 }
 0x20f   : > { %v4212_v9 = vpop.permute.xlu1 %1703  ;;  %v4242_v20 = vmul.f32 %v3066_v32, %v878_v33  ;;  %v4244_v24 = vmul.f32 %v3065_v30, %v883_v10  ;;  %v4262_v30 = vmul.f32 %v3067_v39, %v1103_v47 }
 0x210   : > { %5201 = vst [vmem:[#allocation127_spill] sm:$0xff] %v4212_v9  ;;  %v4216_v48 = vpop.permute.xlu0 %1701  ;;  %v2143_v9 = vstv %s4194_s27  ;;  %5203 = vst [vmem:[#allocation129_spill] sm:$0xff] %v4233_v35  ;;  %v4253_v35 = vmul.f32 %v3067_v39, %v1098_v1  ;;  %s4480_s27 = sld [smem:[#allocation2 + $0x8d]] }
 0x211   : > { %5202 = vst [vmem:[#allocation128_spill] sm:$0xff] %v4216_v48  ;;  %2124 = vrot.lane.b32.xlu1 %v2119_v26, %s3126_s14  ;;  %v2131_v48 = vmul.f32 %v4129_v63, %v2130_v57  ;;  %v4235_v26 = vmul.f32 %v3066_v32, %v873_v22  ;;  %v1113_v57 = vstv %s4200_s29  ;;  %v3068_v22 = vld [vmem:[%s3202_s5 + $0x3] sm:$0xff]  ;;  %v2145_v33 = vmul.f32 %v4124_v13, %v2143_v9  ;;  %s4515_s29 = sld [smem:[#allocation2 + $0xbf]] }
 0x212   : > { %2122 = vrot.lane.b32.xlu0 %v2118_v7, %s3126_s14  ;;  %v1108_v7 = vstv %s4196_s28  ;;  %5207 = vst [vmem:[#allocation133_spill] sm:$0xff] %v4253_v35  ;;  %v2144_v10 = vmul.f32 %v4129_v63, %v2143_v9  ;;  %v2156_v32 = vstv %s4210_s30  ;;  %v669_v9 = vadd.f32 %v3573_v52, %v3524_v43  ;;  %s4506_s28 = sld [smem:[#allocation2 + $0x1e]] }
 0x213   : > { %5204 = vst [vmem:[#allocation130_spill] sm:$0xff] %v4235_v26  ;;  %v4240_v27 = vpop.permute.xlu1 %1716  ;;  %v4256_v26 = vmul.f32 %v3068_v22, %v1098_v1  ;;  %v4273_v1 = vmul.f32 %v3068_v22, %v1108_v7  ;;  %v2158_v43 = vmul.f32 %v4124_v13, %v2156_v32  ;;  %s4529_s30 = sld [smem:[#allocation2 + $0x50]] }
 0x214   : > { %5205 = vst [vmem:[#allocation131_spill] sm:$0xff] %v4240_v27  ;;  %v4248_v50 = vpop.permute.xlu0 %1714  ;;  %v4264_v27 = vmul.f32 %v3068_v22, %v1103_v47  ;;  %v670_v47 = vadd.f32 %v3571_v25, %v3516_v62  ;;  %v695_v62 = vadd.f32 %v3595_v36, %v3559_v18  ;;  %v709_v25 = vadd.f32 %v3601_v45, %v3564_v58 }
 0x215   : > { %5206 = vst [vmem:[#allocation132_spill] sm:$0xff] %v4248_v50  ;;  %5208 = vst [vmem:[#allocation134_spill] sm:$0xff] %v4256_v26  ;;  %2137 = vrot.lane.b32.xlu1 %v2132_v59, %s3126_s14  ;;  %v4271_v50 = vmul.f32 %v3067_v39, %v1108_v7  ;;  %v4275_v26 = vmul.f32 %v3067_v39, %v1113_v57  ;;  %v4277_v59 = vmul.f32 %v3068_v22, %v1113_v57 }
 0x216   : > { %2135 = vrot.lane.b32.xlu0 %v2131_v48, %s3126_s14  ;;  %v683_v48 = vadd.f32 %v3579_v15, %v3536_v3  ;;  %v682_v7 = vadd.f32 %v3581_v29, %v3544_v4  ;;  %v696_v57 = vadd.f32 %v3590_v17, %v3553_v34  ;;  %v708_v3 = vadd.f32 %v3603_v41, %v3569_v14 }
 0x217   : > { %v4279_v35 = vpop.permute.xlu1 %1729  ;;  %v722_v4 = vadd.f32 %v3609_v23, %v670_v47  ;;  %v2157_v34 = vmul.f32 %v4129_v63, %v2156_v32  ;;  %v2169_v18 = vstv %s4231_s4  ;;  %v721_v58 = vadd.f32 %v3611_v54, %v669_v9  ;;  %v3069_v32 = vld [vmem:[%s3202_s5 + $0xc] sm:$0xf]  ;;  %v3070_v9 = vld [vmem:[%s3202_s5 + $0x4] sm:$0xff]  ;;  %s4536_s4 = sld [smem:[#allocation2 + $0x82]] }
 0x218   : > { %v4291_v39 = vpop.permute.xlu0 %1727  ;;  %v735_v52 = vadd.f32 %v3617_v60, %v683_v48  ;;  %v734_v15 = vadd.f32 %v3619_v46, %v682_v7  ;;  %v748_v29 = vadd.f32 %v3625_v5, %v696_v57  ;;  %v747_v14 = vadd.f32 %v3627_v6, %v695_v62 }
 0x219   : > { %2150 = vrot.lane.b32.xlu1 %v2145_v33, %s3127_s19  ;;  %v761_v36 = vadd.f32 %v3633_v51, %v709_v25  ;;  %v760_v45 = vadd.f32 %v3635_v40, %v708_v3  ;;  %v774_v41 = vadd.f32 %v3641_v16, %v722_v4  ;;  %v773_v54 = vadd.f32 %v3643_v53, %v721_v58 }
 0x21a   : > { %2148 = vrot.lane.b32.xlu0 %v2144_v10, %s3127_s19  ;;  %v787_v60 = vadd.f32 %v3649_v11, %v735_v52  ;;  %v1328_v46 = vstv %s4258_s6  ;;  %v2171_v5 = vmul.f32 %v4124_v13, %v2169_v18  ;;  %v786_v6 = vadd.f32 %v3651_v19, %v734_v15  ;;  %s4545_s6 = sld [smem:[#allocation2 + $0x2a]] }
 0x21b   : > { %v4315_v17 = vpop.permute.xlu1 %1742  ;;  %v800_v51 = vadd.f32 %v3657_v21, %v748_v29  ;;  %v2170_v40 = vmul.f32 %v4129_v63, %v2169_v18  ;;  %v2182_v16 = vstv %s4269_s8  ;;  %v799_v53 = vadd.f32 %v3659_v8, %v747_v14  ;;  %v5211_v29 = vld [vmem:[#allocation130_spill] sm:$0xff]  ;;  %s4557_s8 = sld [smem:[#allocation2 + $0xb4]] }
 0x21c   : > { %v4323_v23 = vpop.permute.xlu0 %1740  ;;  %v813_v11 = vadd.f32 %v3665_v38, %v761_v36  ;;  %v826_v22 = vadd.f32 %v3673_v37, %v774_v41  ;;  %v825_v33 = vadd.f32 %v3675_v42, %v773_v54  ;;  %v812_v21 = vadd.f32 %v3667_v28, %v760_v45 }
 0x21d   : > { %2163 = vrot.lane.b32.xlu1 %v2158_v43, %s3127_s19  ;;  %v839_v10 = vadd.f32 %v3681_v44, %v787_v60  ;;  %v4346_v47 = vmul.f32 %v3069_v32, %v1328_v46  ;;  %v4349_v48 = vmul.f32 %v3070_v9, %v1328_v46  ;;  %v838_v38 = vadd.f32 %v3683_v55, %v786_v6  ;;  %v5209_v43 = vld [vmem:[#allocation8_spill] sm:$0xff] }
 0x21e   : > { %2161 = vrot.lane.b32.xlu0 %v2157_v34, %s3127_s19  ;;  %v852_v37 = vadd.f32 %v3689_v61, %v800_v51  ;;  %v1333_v42 = vstv %s4289_s9  ;;  %v2184_v28 = vmul.f32 %v4124_v13, %v2182_v16  ;;  %v851_v44 = vadd.f32 %v3691_v2, %v799_v53  ;;  %v5210_v34 = vld [vmem:[#allocation129_spill] sm:$0xff]  ;;  %v5214_v53 = vld [vmem:[#allocation11_spill] sm:$0xff]  ;;  %s4571_s9 = sld [smem:[#allocation2 + $0x5c]] }
 0x21f   : > { %v4341_v19 = vpop.permute.xlu1 %1755  ;;  %v1338_v7 = vstv %s4299_s10  ;;  %v2183_v57 = vmul.f32 %v4129_v63, %v2182_v16  ;;  %v2195_v62 = vstv %s4309_s11  ;;  %v872_v55 = vadd.f32 %v4219_v31, %v826_v22  ;;  %v5215_v22 = vld [vmem:[#allocation12_spill] sm:$0xff]  ;;  %s4599_s10 = sld [smem:[#allocation2 + $0x8e]] }
 0x220   : > { %v4351_v8 = vpop.permute.xlu0 %1753  ;;  %v871_v61 = vadd.f32 %v4225_v49, %v825_v33  ;;  %v865_v25 = vadd.f32 %v3697_v12, %v813_v11  ;;  %v864_v3 = vadd.f32 %v5209_v43, %v812_v21  ;;  %v877_v2 = vadd.f32 %v5210_v34, %v839_v10  ;;  %v5217_v10 = vld [vmem:[#allocation14_spill] sm:$0xff]  ;;  %s4626_s11 = sld [smem:[#allocation2 + $0xc0]] }
 0x221   : > { %2176 = vrot.lane.b32.xlu1 %v2171_v5, %s3127_s19  ;;  %v4372_v18 = vmul.f32 %v3069_v32, %v1333_v42  ;;  %v4374_v58 = vmul.f32 %v3070_v9, %v1333_v42  ;;  %v1343_v52 = vstv %s4321_s15  ;;  %v876_v31 = vadd.f32 %v5211_v29, %v838_v38  ;;  %v5219_v42 = vld [vmem:[#allocation16_spill] sm:$0xff]  ;;  %s4633_s15 = sld [smem:[#allocation2 + $0x2b]] }
 0x222   : > { %2174 = vrot.lane.b32.xlu0 %v2170_v40, %s3127_s19  ;;  %v4380_v14 = vmul.f32 %v3069_v32, %v1338_v7  ;;  %v4382_v49 = vmul.f32 %v3070_v9, %v1338_v7  ;;  %v2197_v12 = vmul.f32 %v4124_v13, %v2195_v62  ;;  %v882_v36 = vadd.f32 %v4237_v56, %v852_v37  ;;  %v5212_v56 = vld [vmem:[#allocation9_spill] sm:$0xff] }
 0x223   : > { %v4369_v4 = vpop.permute.xlu1 %1768  ;;  %v881_v45 = vadd.f32 %v4242_v20, %v851_v44  ;;  %v2196_v41 = vmul.f32 %v4129_v63, %v2195_v62  ;;  %v2208_v54 = vstv %s4335_s16  ;;  %v887_v60 = vadd.f32 %v4244_v24, %v865_v25  ;;  %v5213_v20 = vld [vmem:[#allocation10_spill] sm:$0xff]  ;;  %v5220_v44 = vld [vmem:[#allocation17_spill] sm:$0xff]  ;;  %v5222_v25 = vld [vmem:[#allocation19_spill] sm:$0xff]  ;;  %s4651_s16 = sld [smem:[#allocation2 + $0x5d]] }
 0x224   : > { %v4377_v15 = vpop.permute.xlu0 %1766  ;;  %v886_v46 = vadd.f32 %v4250_v0, %v864_v3  ;;  %v4397_v5 = vmul.f32 %v3069_v32, %v1343_v52  ;;  %v4399_v6 = vmul.f32 %v3070_v9, %v1343_v52  ;;  %v900_v40 = vadd.f32 %v5212_v56, %v872_v55  ;;  %v5216_v0 = vld [vmem:[#allocation13_spill] sm:$0xff]  ;;  %v5218_v9 = vld [vmem:[#allocation15_spill] sm:$0xff]  ;;  %v5221_v55 = vld [vmem:[#allocation18_spill] sm:$0xff] }
 0x225   : > { %2189 = vrot.lane.b32.xlu1 %v2184_v28, %s3127_s19  ;;  %v899_v16 = vadd.f32 %v5213_v20, %v871_v61  ;;  %v913_v11 = vadd.f32 %v5214_v53, %v877_v2  ;;  %v912_v33 = vadd.f32 %v5215_v22, %v876_v31  ;;  %v926_v21 = vadd.f32 %v5216_v0, %v882_v36  ;;  %v5223_v3 = vld [vmem:[#allocation20_spill] sm:$0xff]  ;;  %v5224_v2 = vld [vmem:[#allocation21_spill] sm:$0xff]  ;;  %v5225_v31 = vld [vmem:[#allocation22_spill] sm:$0xff] }
 0x226   : > { %2187 = vrot.lane.b32.xlu0 %v2183_v57, %s3127_s19  ;;  %v925_v32 = vadd.f32 %v5217_v10, %v881_v45  ;;  %v939_v38 = vadd.f32 %v5218_v9, %v887_v60  ;;  %v2210_v37 = vmul.f32 %v4124_v13, %v2208_v54  ;;  %v938_v28 = vadd.f32 %v5219_v42, %v886_v46  ;;  %v5226_v36 = vld [vmem:[#allocation23_spill] sm:$0xff]  ;;  %v5228_v60 = vld [vmem:[#allocation25_spill] sm:$0xff] }
 0x227   : > { %v4401_v51 = vpop.permute.xlu1 %1781  ;;  %v952_v7 = vadd.f32 %v5220_v44, %v900_v40  ;;  %v2209_v57 = vmul.f32 %v4129_v63, %v2208_v54  ;;  %v2221_v62 = vstv %s4363_s17  ;;  %v951_v61 = vadd.f32 %v5221_v55, %v899_v16  ;;  %v5229_v40 = vld [vmem:[#allocation26_spill] sm:$0xff]  ;;  %v5230_v16 = vld [vmem:[#allocation27_spill] sm:$0xff]  ;;  %s4658_s17 = sld [smem:[#allocation2 + $0x23]] }
 0x228   : > { %v4409_v24 = vpop.permute.xlu0 %1779  ;;  %v965_v43 = vadd.f32 %v5222_v25, %v913_v11  ;;  %v964_v34 = vadd.f32 %v5223_v3, %v912_v33  ;;  %v978_v52 = vadd.f32 %v5224_v2, %v926_v21  ;;  %v991_v45 = vadd.f32 %v5226_v36, %v939_v38  ;;  %v5231_v33 = vld [vmem:[#allocation28_spill] sm:$0xff]  ;;  %v5232_v21 = vld [vmem:[#allocation29_spill] sm:$0xff]  ;;  %v5233_v38 = vld [vmem:[#allocation30_spill] sm:$0xff] }
 0x229   : > { %2202 = vrot.lane.b32.xlu1 %v2197_v12, %s3128_s24  ;;  %v977_v12 = vadd.f32 %v5225_v31, %v925_v32  ;;  %v1004_v46 = vadd.f32 %v5228_v60, %v952_v7  ;;  %v1003_v20 = vadd.f32 %v5229_v40, %v951_v61  ;;  %v1559_v11 = vstv %s4384_s18  ;;  %v5236_v55 = vld [vmem:[#allocation34_spill] sm:$0xff]  ;;  %v5239_v3 = vld [vmem:[#allocation35_spill] sm:$0xff]  ;;  %v5243_v36 = vld [vmem:[#allocation36_spill] sm:$0xff]  ;;  %s4665_s18 = sld [smem:[#allocation2 + $0x8f]] }
 0x22a   : > { %2200 = vrot.lane.b32.xlu0 %v2196_v41, %s3128_s24  ;;  %v5227_v41 = vld [vmem:[#allocation24_spill] sm:$0xff]  ;;  %v1017_v53 = vadd.f32 %v5230_v16, %v965_v43  ;;  %v2223_v22 = vmul.f32 %v4124_v13, %v2221_v62  ;;  %v1016_v0 = vadd.f32 %v5231_v33, %v964_v34  ;;  %v1030_v10 = vadd.f32 %v5232_v21, %v978_v52  ;;  %v5240_v34 = vld [vmem:[#allocation45_spill] sm:$0xff]  ;;  %v5241_v52 = vld [vmem:[#allocation47_spill] sm:$0xff] }
 0x22b   : > { %v4429_v29 = vpop.permute.xlu1 %1816  ;;  %v990_v54 = vadd.f32 %v5227_v41, %v938_v28  ;;  %v2222_v32 = vmul.f32 %v4129_v63, %v2221_v62  ;;  %v2234_v9 = vstv %s4393_s20  ;;  %v1029_v42 = vadd.f32 %v5233_v38, %v977_v12  ;;  %v5234_v28 = vld [vmem:[#allocation31_spill] sm:$0xff]  ;;  %v5238_v43 = vld [vmem:[#allocation32_spill] sm:$0xff]  ;;  %v5244_v41 = vld [vmem:[#allocation37_spill] sm:$0xff]  ;;  %s4701_s20 = sld [smem:[#allocation2 + $0x55]] }
 0x22c   : > { %v4437_v56 = vpop.permute.xlu0 %1814  ;;  %v1043_v44 = vadd.f32 %v5234_v28, %v991_v45  ;;  %v1055_v61 = vadd.f32 %v5236_v55, %v1003_v20  ;;  %v1069_v62 = vadd.f32 %v5239_v3, %v1017_v53  ;;  %v4460_v2 = vmul.f32 %v5240_v34, %v1559_v11  ;;  %v5245_v40 = vld [vmem:[#allocation38_spill] sm:$0xff]  ;;  %v5248_v38 = vld [vmem:[#allocation133_spill] sm:$0xff] }
 0x22d   : > { %2215 = vrot.lane.b32.xlu1 %v2210_v37, %s3128_s24  ;;  %v5235_v37 = vld [vmem:[#allocation33_spill] sm:$0xff]  ;;  %v4463_v31 = vmul.f32 %v5241_v52, %v1559_v11  ;;  %v1068_v45 = vadd.f32 %v5243_v36, %v1016_v0  ;;  %v1082_v60 = vadd.f32 %v5244_v41, %v1030_v10  ;;  %v1081_v20 = vadd.f32 %v5245_v40, %v1029_v42  ;;  %v4477_v11 = vld [vmem:[%s3202_s5 + $0x1b] sm:$0xf]  ;;  %v3072_v34 = vld [vmem:[%s3202_s5 + $0x10] sm:$0xff] }
 0x22e   : > { %2213 = vrot.lane.b32.xlu0 %v2209_v57, %s3128_s24  ;;  %v1056_v7 = vadd.f32 %v5235_v37, %v1004_v46  ;;  %v1042_v57 = vadd.f32 %v5238_v43, %v990_v54  ;;  %v1564_v46 = vstv %s4407_s21  ;;  %v2236_v54 = vmul.f32 %v4124_v13, %v2234_v9  ;;  %v5246_v0 = vld [vmem:[#allocation39_spill] sm:$0xff]  ;;  %v5249_v37 = vld [vmem:[#allocation134_spill] sm:$0xff]  ;;  %s4707_s21 = sld [smem:[#allocation2 + $0xc1]] }
 0x22f   : > { %v4455_v25 = vpop.permute.xlu1 %1829  ;;  %v1569_v16 = vstv %s4414_s22  ;;  %v2235_v53 = vmul.f32 %v4129_v63, %v2234_v9  ;;  %v2269_v33 = vstv %s4423_s23  ;;  %v1095_v21 = vadd.f32 %v5246_v0, %v1043_v44  ;;  %v4489_v43 = vld [vmem:[%s3202_s5 + $0x13] sm:$0xff]  ;;  %s4745_s22 = sld [smem:[#allocation2 + $0x2c]] }
 0x230   : > { %5237 = vst [vmem:[#allocation8_spill] sm:$0xff] %v4455_v25  ;;  %v4465_v12 = vpop.permute.xlu0 %1827  ;;  %v1102_v28 = vadd.f32 %v5248_v38, %v1056_v7  ;;  %v1101_v42 = vadd.f32 %v5249_v37, %v1055_v61  ;;  %v3071_v9 = vld [vmem:[%s3202_s5 + $0x18] sm:$0xf]  ;;  %v4496_v52 = vmul.f32 %v3072_v34, %v1564_v46  ;;  %v1574_v44 = vstv %s4435_s25  ;;  %v5282_v25 = vld [vmem:[#allocation81_spill] sm:$0xff]  ;;  %s4759_s23 = sld [smem:[#allocation2 + $0x87]] }
 0x231   : > { %5242 = vst [vmem:[#allocation129_spill] sm:$0xff] %v4465_v12  ;;  %2228 = vrot.lane.b32.xlu1 %v2223_v22, %s3128_s24  ;;  %v5247_v22 = vld [vmem:[#allocation40_spill] sm:$0xff]  ;;  %v4493_v3 = vmul.f32 %v3071_v9, %v1564_v46  ;;  %v1106_v7 = vadd.f32 %v4264_v27, %v1068_v45  ;;  %v4504_v61 = vmul.f32 %v3072_v34, %v1569_v16  ;;  %v2282_v40 = vstv %s4449_s26  ;;  %s4788_s25 = sld [smem:[#allocation2 + $0x5e]] }
 0x232   : > { %2226 = vrot.lane.b32.xlu0 %v2222_v32, %s3128_s24  ;;  %v1094_v10 = vadd.f32 %v5247_v22, %v1042_v57  ;;  %v1107_v32 = vadd.f32 %v4262_v30, %v1069_v62  ;;  %v4502_v57 = vmul.f32 %v3071_v9, %v1569_v16  ;;  %v2271_v30 = vmul.f32 %v4477_v11, %v2269_v33  ;;  %v5255_v22 = vld [vmem:[#allocation44_spill] sm:$0xff]  ;;  %s4815_s26 = sld [smem:[#allocation2 + $0x90]] }
 0x233   : > { %v4486_v55 = vpop.permute.xlu1 %1842  ;;  %v1112_v62 = vadd.f32 %v4271_v50, %v1082_v60  ;;  %v1111_v41 = vadd.f32 %v4273_v1, %v1081_v20  ;;  %v2270_v46 = vmul.f32 %v4489_v43, %v2269_v33  ;;  %v1117_v27 = vadd.f32 %v4275_v26, %v1095_v21  ;;  %v5252_v50 = vld [vmem:[#allocation41_spill] sm:$0xff]  ;;  %v5253_v1 = vld [vmem:[#allocation42_spill] sm:$0xff] }
 0x234   : > { %5250 = vst [vmem:[#allocation130_spill] sm:$0xff] %v4486_v55  ;;  %v4499_v36 = vpop.permute.xlu0 %1840  ;;  %v1116_v45 = vadd.f32 %v4277_v59, %v1094_v10  ;;  %v4519_v16 = vmul.f32 %v3071_v9, %v1574_v44  ;;  %v1130_v60 = vadd.f32 %v5252_v50, %v1102_v28  ;;  %v1129_v20 = vadd.f32 %v5253_v1, %v1101_v42  ;;  %v5256_v59 = vld [vmem:[#allocation46_spill] sm:$0xff]  ;;  %v5257_v10 = vld [vmem:[#allocation48_spill] sm:$0xff]  ;;  %v5258_v9 = vld [vmem:[#allocation49_spill] sm:$0xff] }
 0x235   : > { %5251 = vst [vmem:[#allocation9_spill] sm:$0xff] %v4499_v36  ;;  %2241 = vrot.lane.b32.xlu1 %v2236_v54, %s3128_s24  ;;  %v4521_v54 = vmul.f32 %v3072_v34, %v1574_v44  ;;  %v1142_v38 = vadd.f32 %v5255_v22, %v1106_v7  ;;  %v1156_v21 = vadd.f32 %v5256_v59, %v1112_v62  ;;  %v5259_v42 = vld [vmem:[#allocation50_spill] sm:$0xff]  ;;  %v5260_v44 = vld [vmem:[#allocation51_spill] sm:$0xff]  ;;  %v2295_v62 = vstv %s4480_s27  ;;  %v5262_v1 = vld [vmem:[#allocation53_spill] sm:$0xff]  ;;  %s4834_s27 = sld [smem:[#allocation2 + $0xc2]] }
 0x236   : > { %2239 = vrot.lane.b32.xlu0 %v2235_v53, %s3128_s24  ;;  %v5254_v53 = vld [vmem:[#allocation43_spill] sm:$0xff]  ;;  %v1155_v37 = vadd.f32 %v5257_v10, %v1111_v41  ;;  %v1169_v34 = vadd.f32 %v5258_v9, %v1117_v27  ;;  %v2284_v28 = vmul.f32 %v4477_v11, %v2282_v40  ;;  %v1182_v7 = vadd.f32 %v5260_v44, %v1130_v60  ;;  %v5261_v41 = vld [vmem:[#allocation52_spill] sm:$0xff]  ;;  %v5263_v22 = vld [vmem:[#allocation54_spill] sm:$0xff] }
 0x237   : > { %v4523_v0 = vpop.permute.xlu1 %1855  ;;  %v1143_v33 = vadd.f32 %v5254_v53, %v1107_v32  ;;  %v1168_v32 = vadd.f32 %v5259_v42, %v1116_v45  ;;  %v2283_v50 = vmul.f32 %v4489_v43, %v2282_v40  ;;  %v1181_v27 = vadd.f32 %v5261_v41, %v1129_v20  ;;  %v5264_v59 = vld [vmem:[#allocation55_spill] sm:$0xff]  ;;  %v5265_v45 = vld [vmem:[#allocation56_spill] sm:$0xff]  ;;  %v5267_v40 = vld [vmem:[#allocation58_spill] sm:$0xff] }
 0x238   : > { %v4531_v26 = vpop.permute.xlu0 %1853  ;;  %v1208_v10 = vadd.f32 %v5264_v59, %v1156_v21  ;;  %v1207_v60 = vadd.f32 %v5265_v45, %v1155_v37  ;;  %v5268_v36 = vld [vmem:[#allocation59_spill] sm:$0xff]  ;;  %v1789_v21 = vstv %s4506_s28  ;;  %v5272_v37 = vld [vmem:[#allocation62_spill] sm:$0xff]  ;;  %s4839_s28 = sld [smem:[#allocation2 + $0xb9]] }
 0x239   : > { %2276 = vrot.lane.b32.xlu1 %v2271_v30, %s3125_s7  ;;  %v1195_v53 = vadd.f32 %v5262_v1, %v1143_v33  ;;  %v1194_v30 = vadd.f32 %v5263_v22, %v1142_v38  ;;  %v1220_v44 = vadd.f32 %v5267_v40, %v1168_v32  ;;  %v1234_v55 = vadd.f32 %v5268_v36, %v1182_v7  ;;  %v5270_v33 = vld [vmem:[#allocation60_spill] sm:$0xff]  ;;  %v5271_v38 = vld [vmem:[#allocation61_spill] sm:$0xff] }
 0x23a   : > { %2274 = vrot.lane.b32.xlu0 %v2270_v46, %s3125_s7  ;;  %v5266_v46 = vld [vmem:[#allocation57_spill] sm:$0xff]  ;;  %v1233_v41 = vadd.f32 %v5270_v33, %v1181_v27  ;;  %v2297_v22 = vmul.f32 %v4477_v11, %v2295_v62  ;;  %v2296_v36 = vmul.f32 %v4489_v43, %v2295_v62  ;;  %v2308_v32 = vstv %s4515_s29  ;;  %v5274_v7 = vld [vmem:[#allocation64_spill] sm:$0xff]  ;;  %v5281_v62 = vld [vmem:[#allocation79_spill] sm:$0xff]  ;;  %s4852_s29 = sld [smem:[#allocation2 + $0x2e]] }
 0x23b   : > { %v4551_v9 = vpop.permute.xlu1 %1868  ;;  %v1221_v42 = vadd.f32 %v5266_v46, %v1169_v34  ;;  %v1247_v1 = vadd.f32 %v5271_v38, %v1195_v53  ;;  %v1246_v59 = vadd.f32 %v5272_v37, %v1194_v30  ;;  %v5273_v34 = vld [vmem:[#allocation63_spill] sm:$0xff]  ;;  %v1259_v27 = vadd.f32 %v5274_v7, %v1207_v60  ;;  %v5275_v53 = vld [vmem:[#allocation65_spill] sm:$0xff]  ;;  %v5277_v33 = vld [vmem:[#allocation68_spill] sm:$0xff] }
 0x23c   : > { %v4559_v20 = vpop.permute.xlu0 %1866  ;;  %v1260_v45 = vadd.f32 %v5273_v34, %v1208_v10  ;;  %v1285_v38 = vadd.f32 %v5277_v33, %v1233_v41  ;;  %v5279_v10 = vld [vmem:[#allocation66_spill] sm:$0xff]  ;;  %v5280_v37 = vld [vmem:[#allocation69_spill] sm:$0xff]  ;;  %v4582_v12 = vmul.f32 %v5281_v62, %v1789_v21  ;;  %v1794_v41 = vstv %s4529_s30  ;;  %s4870_s30 = sld [smem:[#allocation2 + $0x60]] }
 0x23d   : > { %5269 = vst [vmem:[#allocation10_spill] sm:$0xff] %v4559_v20  ;;  %2289 = vrot.lane.b32.xlu1 %v2284_v28, %s3125_s7  ;;  %v1273_v46 = vadd.f32 %v5275_v53, %v1221_v42  ;;  %v5276_v28 = vld [vmem:[#allocation67_spill] sm:$0xff]  ;;  %v1299_v34 = vadd.f32 %v5280_v37, %v1247_v1  ;;  %v4585_v20 = vmul.f32 %v5282_v25, %v1789_v21  ;;  %v5284_v42 = vld [vmem:[#allocation70_spill] sm:$0xff]  ;;  %v1799_v33 = vstv %s4536_s4  ;;  %v5287_v37 = vld [vmem:[#allocation73_spill] sm:$0xff]  ;;  %s4883_s4 = sld [smem:[#allocation2 + $0x92]] }
 0x23e   : > { %2287 = vrot.lane.b32.xlu0 %v2283_v50, %s3125_s7  ;;  %v1286_v40 = vadd.f32 %v5276_v28, %v1234_v55  ;;  %v1272_v50 = vadd.f32 %v5279_v10, %v1220_v44  ;;  %v1298_v7 = vadd.f32 %v5284_v42, %v1246_v59  ;;  %v5285_v55 = vld [vmem:[#allocation71_spill] sm:$0xff]  ;;  %v2310_v44 = vmul.f32 %v4477_v11, %v2308_v32  ;;  %v5286_v28 = vld [vmem:[#allocation72_spill] sm:$0xff]  ;;  %v5288_v42 = vld [vmem:[#allocation74_spill] sm:$0xff] }
 0x23f   : > { %v4577_v30 = vpop.permute.xlu1 %1881  ;;  %v1312_v53 = vadd.f32 %v5285_v55, %v1260_v45  ;;  %v1311_v1 = vadd.f32 %v5286_v28, %v1259_v27  ;;  %v2309_v21 = vmul.f32 %v4489_v43, %v2308_v32  ;;  %v2321_v10 = vstv %s4545_s6  ;;  %s3005_s6 = sld [smem:[#allocation2 + $0xc4]] }
 0x240   : > { %5278 = vst [vmem:[#allocation11_spill] sm:$0xff] %v4577_v30  ;;  %v4587_v60 = vpop.permute.xlu0 %1879  ;;  %v1325_v59 = vadd.f32 %v5287_v37, %v1273_v46  ;;  %v1324_v45 = vadd.f32 %v5288_v42, %v1272_v50  ;;  %v1332_v55 = vadd.f32 %v4346_v47, %v1286_v40  ;;  %v1337_v27 = vadd.f32 %v4372_v18, %v1299_v34  ;;  %v5296_v37 = vld [vmem:[#allocation78_spill] sm:$0xff] }
 0x241   : > { %5283 = vst [vmem:[#allocation12_spill] sm:$0xff] %v4587_v60  ;;  %2302 = vrot.lane.b32.xlu1 %v2297_v22, %s3125_s7  ;;  %v1331_v22 = vadd.f32 %v4349_v48, %v1285_v38  ;;  %v4612_v32 = vmul.f32 %v5282_v25, %v1794_v41  ;;  %v1804_v28 = vstv %s4557_s8  ;;  %v1336_v46 = vadd.f32 %v4374_v58, %v1298_v7  ;;  %s2856_s8 = sld [smem:[#allocation2 + $0x2f]] }
 0x242   : > { %2300 = vrot.lane.b32.xlu0 %v2296_v36, %s3125_s7  ;;  %v4609_v36 = vmul.f32 %v5281_v62, %v1794_v41  ;;  %v4619_v47 = vmul.f32 %v5281_v62, %v1799_v33  ;;  %v4622_v48 = vmul.f32 %v5282_v25, %v1799_v33  ;;  %v2323_v18 = vmul.f32 %v4477_v11, %v2321_v10 }
 0x243   : > { %v4605_v60 = vpop.permute.xlu1 %1894  ;;  %v1342_v40 = vadd.f32 %v4380_v14, %v1312_v53  ;;  %v1341_v38 = vadd.f32 %v4382_v49, %v1311_v1  ;;  %v2322_v58 = vmul.f32 %v4489_v43, %v2321_v10  ;;  %v2334_v50 = vstv %s4571_s9  ;;  %v5293_v49 = vld [vmem:[#allocation75_spill] sm:$0xff]  ;;  %v5294_v1 = vld [vmem:[#allocation76_spill] sm:$0xff]  ;;  %s2906_s9 = sld [smem:[#allocation2 + $0x61]] }
 0x244   : > { %5289 = vst [vmem:[#allocation13_spill] sm:$0xff] %v4605_v60  ;;  %v4615_v30 = vpop.permute.xlu0 %1892  ;;  %5291 = vst [vmem:[#allocation15_spill] sm:$0xff] %v4619_v47  ;;  %v1347_v34 = vadd.f32 %v4397_v5, %v1325_v59  ;;  %v1346_v7 = vadd.f32 %v4399_v6, %v1324_v45  ;;  %v4638_v41 = vmul.f32 %v5281_v62, %v1804_v28  ;;  %v5297_v6 = vld [vmem:[#allocation80_spill] sm:$0xff]  ;;  %v5298_v59 = vld [vmem:[#allocation82_spill] sm:$0xff] }
 0x245   : > { %5290 = vst [vmem:[#allocation14_spill] sm:$0xff] %v4615_v30  ;;  %5292 = vst [vmem:[#allocation16_spill] sm:$0xff] %v4622_v48  ;;  %2315 = vrot.lane.b32.xlu1 %v2310_v44, %s3125_s7  ;;  %v4641_v44 = vmul.f32 %v5282_v25, %v1804_v28  ;;  %v1360_v53 = vadd.f32 %v5293_v49, %v1332_v55  ;;  %v1359_v33 = vadd.f32 %v5294_v1, %v1331_v22  ;;  %v5299_v45 = vld [vmem:[#allocation83_spill] sm:$0xff]  ;;  %v5300_v22 = vld [vmem:[#allocation84_spill] sm:$0xff] }
 0x246   : > { %2313 = vrot.lane.b32.xlu0 %v2309_v21, %s3125_s7  ;;  %v5295_v21 = vld [vmem:[#allocation77_spill] sm:$0xff]  ;;  %v1372_v42 = vadd.f32 %v5296_v37, %v1336_v46  ;;  %v1386_v62 = vadd.f32 %v5297_v6, %v1342_v40  ;;  %v1385_v25 = vadd.f32 %v5298_v59, %v1341_v38  ;;  %v1399_v28 = vadd.f32 %v5299_v45, %v1347_v34  ;;  %v5302_v40 = vld [vmem:[#allocation86_spill] sm:$0xff]  ;;  %v5303_v34 = vld [vmem:[#allocation87_spill] sm:$0xff] }
 0x247   : > { %v4643_v14 = vpop.permute.xlu1 %1907  ;;  %v1373_v10 = vadd.f32 %v5295_v21, %v1337_v27  ;;  %v2336_v55 = vmul.f32 %v4477_v11, %v2334_v50  ;;  %v1398_v27 = vadd.f32 %v5300_v22, %v1346_v7  ;;  %v5301_v49 = vld [vmem:[#allocation85_spill] sm:$0xff]  ;;  %v2335_v1 = vmul.f32 %v4489_v43, %v2334_v50  ;;  %v5304_v37 = vld [vmem:[#allocation88_spill] sm:$0xff] }
 0x248   : > { %v4649_v5 = vpop.permute.xlu0 %1905  ;;  %v1412_v46 = vadd.f32 %v5301_v49, %v1360_v53  ;;  %v2347_v21 = vstv %s4599_s10  ;;  %v1411_v38 = vadd.f32 %v5302_v40, %v1359_v33  ;;  %v1424_v6 = vadd.f32 %v5304_v37, %v1372_v42  ;;  %v5305_v59 = vld [vmem:[#allocation89_spill] sm:$0xff]  ;;  %v5306_v53 = vld [vmem:[#allocation90_spill] sm:$0xff]  ;;  %v5308_v50 = vld [vmem:[#allocation92_spill] sm:$0xff]  ;;  %s2956_s10 = sld [smem:[#allocation2 + $0x93]] }
 0x249   : > { %2328 = vrot.lane.b32.xlu1 %v2323_v18, %s3126_s14  ;;  %v1425_v18 = vadd.f32 %v5303_v34, %v1373_v10  ;;  %v1438_v45 = vadd.f32 %v5305_v59, %v1386_v62  ;;  %v1437_v22 = vadd.f32 %v5306_v53, %v1385_v25  ;;  %v1450_v30 = vadd.f32 %v5308_v50, %v1398_v27  ;;  %v5309_v60 = vld [vmem:[#allocation93_spill] sm:$0xff]  ;;  %v5311_v33 = vld [vmem:[#allocation94_spill] sm:$0xff]  ;;  %v5312_v10 = vld [vmem:[#allocation95_spill] sm:$0xff] }
 0x24a   : > { %2326 = vrot.lane.b32.xlu0 %v2322_v58, %s3126_s14  ;;  %v5307_v58 = vld [vmem:[#allocation91_spill] sm:$0xff]  ;;  %v1464_v48 = vadd.f32 %v5309_v60, %v1412_v46  ;;  %v1463_v40 = vadd.f32 %v5311_v33, %v1411_v38  ;;  %v2349_v42 = vmul.f32 %v4477_v11, %v2347_v21  ;;  %v2360_v62 = vstv %s4626_s11  ;;  %v5314_v59 = vld [vmem:[#allocation101_spill] sm:$0xff]  ;;  %v5315_v46 = vld [vmem:[#allocation96_spill] sm:$0xff]  ;;  %s3006_s11 = sld [smem:[#allocation2 + $0xc5]] }
 0x24b   : > { %v4671_v7 = vpop.permute.xlu1 %1920  ;;  %v1451_v49 = vadd.f32 %v5307_v58, %v1399_v28  ;;  %v1477_v34 = vadd.f32 %v5312_v10, %v1425_v18  ;;  %v5313_v37 = vld [vmem:[#allocation99_spill] sm:$0xff]  ;;  %v2348_v60 = vmul.f32 %v4489_v43, %v2347_v21  ;;  %v2373_v27 = vstv %s4633_s15  ;;  %v5316_v38 = vld [vmem:[#allocation97_spill] sm:$0xff]  ;;  %v5317_v58 = vld [vmem:[#allocation100_spill] sm:$0xff]  ;;  %s2857_s15 = sld [smem:[#allocation2 + $0x30]] }
 0x24c   : > { %v4677_v47 = vpop.permute.xlu0 %1918  ;;  %v1516_v28 = vadd.f32 %v5314_v59, %v1464_v48  ;;  %v1476_v53 = vadd.f32 %v5315_v46, %v1424_v6  ;;  %v1490_v18 = vadd.f32 %v5316_v38, %v1438_v45  ;;  %v5318_v50 = vld [vmem:[#allocation102_spill] sm:$0xff]  ;;  %v2361_v21 = vmul.f32 %v4489_v43, %v2360_v62  ;;  %v5323_v59 = vld [vmem:[#allocation108_spill] sm:$0xff] }
 0x24d   : > { %5310 = vst [vmem:[#allocation17_spill] sm:$0xff] %v4677_v47  ;;  %2341 = vrot.lane.b32.xlu1 %v2336_v55, %s3126_s14  ;;  %v1503_v25 = vadd.f32 %v5313_v37, %v1451_v49  ;;  %v1502_v55 = vadd.f32 %v5317_v58, %v1450_v30  ;;  %v1515_v33 = vadd.f32 %v5318_v50, %v1463_v40  ;;  %v5320_v47 = vld [vmem:[#allocation107_spill] sm:$0xff]  ;;  %v2386_v37 = vstv %s4651_s16  ;;  %v5322_v6 = vld [vmem:[#allocation98_spill] sm:$0xff]  ;;  %v5325_v50 = vld [vmem:[#allocation104_spill] sm:$0xff]  ;;  %s2957_s16 = sld [smem:[#allocation2 + $0x94]] }
 0x24e   : > { %2339 = vrot.lane.b32.xlu0 %v2335_v1, %s3126_s14  ;;  %v2362_v1 = vmul.f32 %v4477_v11, %v2360_v62  ;;  %v1489_v45 = vadd.f32 %v5322_v6, %v1437_v22  ;;  %v2375_v40 = vmul.f32 %v4477_v11, %v2373_v27  ;;  %v1563_v38 = vadd.f32 %v4460_v2, %v1516_v28 }
 0x24f   : > { %v4693_v10 = vpop.permute.xlu1 %1933  ;;  %v1555_v49 = vadd.f32 %v5320_v47, %v1503_v25  ;;  %v1554_v30 = vadd.f32 %v5323_v59, %v1502_v55  ;;  %v2019_v47 = vstv %s4658_s17  ;;  %v5324_v25 = vld [vmem:[#allocation103_spill] sm:$0xff]  ;;  %v2374_v62 = vmul.f32 %v4489_v43, %v2373_v27  ;;  %v5327_v27 = vld [vmem:[#allocation110_spill] sm:$0xff]  ;;  %s4926_s17 = sld [smem:[#allocation2 + $0xc6]] }
 0x250   : > { %5319 = vst [vmem:[#allocation18_spill] sm:$0xff] %v4693_v10  ;;  %v4696_v48 = vpop.permute.xlu0 %1931  ;;  %v1529_v46 = vadd.f32 %v5324_v25, %v1477_v34  ;;  %v2399_v58 = vstv %s4665_s18  ;;  %v1528_v22 = vadd.f32 %v5325_v50, %v1476_v53  ;;  %v1562_v55 = vadd.f32 %v4463_v31, %v1515_v33  ;;  %v5329_v25 = vld [vmem:[#allocation115_spill] sm:$0xff]  ;;  %s4934_s18 = sld [smem:[#allocation2 + $0x28]] }
 0x251   : > { %5321 = vst [vmem:[#allocation19_spill] sm:$0xff] %v4696_v48  ;;  %2354 = vrot.lane.b32.xlu1 %v2349_v42, %s3126_s14  ;;  %v2388_v42 = vmul.f32 %v4477_v11, %v2386_v37  ;;  %v2387_v59 = vmul.f32 %v4489_v43, %v2386_v37  ;;  %v5326_v48 = vld [vmem:[#allocation109_spill] sm:$0xff]  ;;  %v1578_v34 = vadd.f32 %v4519_v16, %v1555_v49 }
 0x252   : > { %2352 = vrot.lane.b32.xlu0 %v2348_v60, %s3126_s14  ;;  %v1591_v10 = vadd.f32 %v5326_v48, %v1563_v38  ;;  %v4726_v28 = vmul.f32 %v4124_v13, %v2019_v47  ;;  %v4729_v60 = vmul.f32 %v4129_v63, %v2019_v47  ;;  %v1590_v31 = vadd.f32 %v5327_v27, %v1562_v55  ;;  %v5328_v16 = vld [vmem:[#allocation105_spill] sm:$0xff]  ;;  %v5333_v55 = vld [vmem:[#allocation118_spill] sm:$0xff] }
 0x253   : > { %v4717_v6 = vpop.permute.xlu1 %1946  ;;  %v1577_v53 = vadd.f32 %v4521_v54, %v1554_v30  ;;  %v4735_v33 = vmul.f32 %v4477_v11, %v2399_v58  ;;  %v4738_v48 = vmul.f32 %v4489_v43, %v2399_v58  ;;  %v1542_v49 = vadd.f32 %v5328_v16, %v1490_v18  ;;  %v5330_v47 = vld [vmem:[#allocation117_spill] sm:$0xff]  ;;  %v5331_v54 = vld [vmem:[#allocation106_spill] sm:$0xff]  ;;  %v5332_v58 = vld [vmem:[#allocation116_spill] sm:$0xff] }
 0x254   : > { %v4723_v2 = vpop.permute.xlu0 %1944  ;;  %v1568_v37 = vadd.f32 %v4493_v3, %v1529_v46  ;;  %v1630_v63 = vadd.f32 %v5329_v25, %v1578_v34  ;;  %v1643_v38 = vadd.f32 %v5330_v47, %v1591_v10  ;;  %v1567_v30 = vadd.f32 %v4496_v52, %v1528_v22  ;;  %v5334_v3 = vld [vmem:[#allocation111_spill] sm:$0xff]  ;;  %v5336_v10 = vld [vmem:[#allocation125_spill] sm:$0xff]  ;;  %v5338_v52 = vld [vmem:[#allocation124_spill] sm:$0xff] }
 0x255   : > { %2367 = vrot.lane.b32.xlu1 %v2362_v1, %s3126_s14  ;;  %v1541_v1 = vadd.f32 %v5331_v54, %v1489_v45  ;;  %v1629_v50 = vadd.f32 %v5332_v58, %v1577_v53  ;;  %v1642_v27 = vadd.f32 %v5333_v55, %v1590_v31  ;;  %v5335_v34 = vld [vmem:[#allocation123_spill] sm:$0xff]  ;;  %v2024_v47 = vstv %s4701_s20  ;;  %v5337_v45 = vld [vmem:[#allocation112_spill] sm:$0xff]  ;;  %v5339_v53 = vld [vmem:[#allocation126_spill] sm:$0xff]  ;;  %s4941_s20 = sld [smem:[#allocation2 + $0x63]] }
 0x256   : > { %2365 = vrot.lane.b32.xlu0 %v2361_v21, %s3126_s14  ;;  %v1604_v46 = vadd.f32 %v5334_v3, %v1568_v37  ;;  %v1682_v16 = vadd.f32 %v5335_v34, %v1630_v63  ;;  %v1695_v25 = vadd.f32 %v5336_v10, %v1643_v38  ;;  %v1603_v54 = vadd.f32 %v5337_v45, %v1567_v30  ;;  %v5340_v63 = vld [vmem:[#allocation119_spill] sm:$0xff]  ;;  %v5341_v34 = vld [vmem:[#allocation120_spill] sm:$0xff]  ;;  %v5342_v45 = vld [vmem:[#allocation113_spill] sm:$0xff] }
 0x257   : > { %v4751_v18 = vpop.permute.xlu1 %1959  ;;  %v1681_v22 = vadd.f32 %v5338_v52, %v1629_v50  ;;  %v1694_v58 = vadd.f32 %v5339_v53, %v1642_v27  ;;  %v2412_v31 = vstv %s4707_s21  ;;  %v1573_v37 = vadd.f32 %v4502_v57, %v1542_v49  ;;  %v5343_v49 = vld [vmem:[#allocation127_spill] sm:$0xff]  ;;  %v5347_v53 = vld [vmem:[#allocation122_spill] sm:$0xff]  ;;  %s4943_s21 = sld [smem:[#allocation2 + $0x5a]] }
 0x258   : > { %v4756_v21 = vpop.permute.xlu0 %1957  ;;  %v1656_v55 = vadd.f32 %v5340_v63, %v1604_v46  ;;  %v1734_v38 = vadd.f32 %v4279_v35, %v1682_v16  ;;  %v1747_v3 = vadd.f32 %v4315_v17, %v1695_v25  ;;  %v1572_v30 = vadd.f32 %v4504_v61, %v1541_v1  ;;  %v5344_v61 = vld [vmem:[#allocation114_spill] sm:$0xff]  ;;  %v5345_v1 = vld [vmem:[#allocation128_spill] sm:$0xff] }
 0x259   : > { %2380 = vrot.lane.b32.xlu1 %v2375_v40, %s3127_s19  ;;  %v1655_v50 = vadd.f32 %v5341_v34, %v1603_v54  ;;  %v1733_v27 = vadd.f32 %v4291_v39, %v1681_v22  ;;  %v1746_v40 = vadd.f32 %v4323_v23, %v1694_v58  ;;  %v1617_v57 = vadd.f32 %v5342_v45, %v1573_v37  ;;  %v5346_v54 = vld [vmem:[#allocation121_spill] sm:$0xff] }
 0x25a   : > { %2378 = vrot.lane.b32.xlu0 %v2374_v62, %s3127_s19  ;;  %v1708_v46 = vadd.f32 %v5343_v49, %v1656_v55  ;;  %v1786_v35 = vadd.f32 %v4401_v51, %v1734_v38  ;;  %v4781_v17 = vmul.f32 %v4124_v13, %v2024_v47  ;;  %v1616_v62 = vadd.f32 %v5344_v61, %v1572_v30  ;;  %v5348_v55 = vld [vmem:[#allocation131_spill] sm:$0xff]  ;;  %v5353_v61 = vld [vmem:[#allocation17_spill] sm:$0xff] }
 0x25b   : > { %v1973_v10 = vpop.permute.xlu1 %1972  ;;  %v1707_v25 = vadd.f32 %v5345_v1, %v1655_v50  ;;  %v1785_v39 = vadd.f32 %v4409_v24, %v1733_v27  ;;  %v2414_v23 = vmul.f32 %v4477_v11, %v2412_v31  ;;  %v1669_v51 = vadd.f32 %v5346_v54, %v1617_v57 }
 0x25c   : > { %v1971_v16 = vpop.permute.xlu0 %1970  ;;  %v1760_v52 = vadd.f32 %v4341_v19, %v1708_v46  ;;  %v1793_v13 = vadd.f32 %v4582_v12, %v1747_v3  ;;  %v2425_v22 = vstv %s4745_s22  ;;  %v1668_v58 = vadd.f32 %v5347_v53, %v1616_v62  ;;  %v5349_v3 = vld [vmem:[#allocation132_spill] sm:$0xff]  ;;  %v5352_v46 = vld [vmem:[#allocation129_spill] sm:$0xff]  ;;  %v5354_v62 = vld [vmem:[#allocation15_spill] sm:$0xff]  ;;  %s4950_s22 = sld [smem:[#allocation2 + $0x95]] }
 0x25d   : > { %2393 = vrot.lane.b32.xlu1 %v2388_v42, %s3127_s19  ;;  %v1759_v24 = vadd.f32 %v4351_v8, %v1707_v25  ;;  %v1792_v42 = vadd.f32 %v4585_v20, %v1746_v40  ;;  %v2413_v63 = vmul.f32 %v4489_v43, %v2412_v31  ;;  %v1721_v38 = vadd.f32 %v5348_v55, %v1669_v51  ;;  %v5350_v40 = vld [vmem:[#allocation10_spill] sm:$0xff]  ;;  %v5355_v25 = vld [vmem:[#allocation11_spill] sm:$0xff]  ;;  %v5360_v55 = vld [vmem:[#allocation9_spill] sm:$0xff] }
 0x25e   : > { %2391 = vrot.lane.b32.xlu0 %v2387_v59, %s3127_s19  ;;  %v1821_v30 = vadd.f32 %v4429_v29, %v1793_v13  ;;  %v1808_v19 = vadd.f32 %v4638_v41, %v1786_v35  ;;  %v2029_v12 = vstv %s4759_s23  ;;  %v1720_v59 = vadd.f32 %v5349_v3, %v1668_v58  ;;  %v5358_v53 = vld [vmem:[#allocation130_spill] sm:$0xff]  ;;  %v5362_v3 = vld [vmem:[#allocation13_spill] sm:$0xff]  ;;  %s4953_s23 = sld [smem:[#allocation2 + $0x8c]] }
 0x25f   : > { %v1986_v37 = vpop.permute.xlu1 %1985  ;;  %v1820_v50 = vadd.f32 %v4437_v56, %v1792_v42  ;;  %v1807_v27 = vadd.f32 %v4641_v44, %v1785_v39  ;;  %v2427_v8 = vmul.f32 %v4477_v11, %v2425_v22  ;;  %v1773_v20 = vadd.f32 %v4369_v4, %v1721_v38 }
 0x260   : > { %v1984_v34 = vpop.permute.xlu0 %1983  ;;  %v1798_v31 = vadd.f32 %v4609_v36, %v1760_v52  ;;  %v1860_v29 = vadd.f32 %v4523_v0, %v1808_v19  ;;  %v1873_v41 = vadd.f32 %v4551_v9, %v1821_v30  ;;  %v1772_v56 = vadd.f32 %v4377_v15, %v1720_v59  ;;  %v5351_v36 = vld [vmem:[#allocation8_spill] sm:$0xff]  ;;  %v5361_v30 = vld [vmem:[#allocation19_spill] sm:$0xff] }
 0x261   : > { %2406 = vrot.lane.b32.xlu1 %v4735_v33, %s3127_s19  ;;  %v1797_v44 = vadd.f32 %v4612_v32, %v1759_v24  ;;  %v1859_v33 = vadd.f32 %v4531_v26, %v1807_v27  ;;  %v1872_v4 = vadd.f32 %v5350_v40, %v1820_v50  ;;  %v2438_v26 = vstv %s4788_s25  ;;  %v5357_v52 = vld [vmem:[#allocation12_spill] sm:$0xff]  ;;  %v5359_v24 = vld [vmem:[#allocation18_spill] sm:$0xff]  ;;  %s4961_s25 = sld [smem:[#allocation2 + $0xc7]] }
 0x262   : > { %2404 = vrot.lane.b32.xlu0 %v4738_v48, %s3127_s19  ;;  %v1834_v57 = vadd.f32 %v5351_v36, %v1798_v31  ;;  %v1912_v0 = vadd.f32 %v4643_v14, %v1860_v29  ;;  %v1925_v9 = vadd.f32 %v4671_v7, %v1873_v41  ;;  %v2426_v48 = vmul.f32 %v4489_v43, %v2425_v22  ;;  %v5356_v7 = vld [vmem:[#allocation16_spill] sm:$0xff]  ;;  %v5363_v31 = vld [vmem:[#allocation14_spill] sm:$0xff] }
 0x263   : > { %v1999_v45 = vpop.permute.xlu1 %1998  ;;  %v1833_v35 = vadd.f32 %v5352_v46, %v1797_v44  ;;  %v1911_v15 = vadd.f32 %v4649_v5, %v1859_v33  ;;  %v1924_v32 = vadd.f32 %v5353_v61, %v1872_v4  ;;  %v1803_v1 = vadd.f32 %v5354_v62, %v1773_v20  ;;  %v3073_v44 = vld [vmem:[%s3202_s5 + $0x12] sm:$0xff] }
 0x264   : > { %v1997_v49 = vpop.permute.xlu0 %1996  ;;  %v1886_v39 = vadd.f32 %v5355_v25, %v1834_v57  ;;  %v1964_v14 = vadd.f32 %v4751_v18, %v1912_v0  ;;  %v1977_v54 = vadd.f32 %v1973_v10, %v1925_v9  ;;  %v1802_v51 = vadd.f32 %v5356_v7, %v1772_v56  ;;  %v3074_v57 = vld [vmem:[%s3202_s5 + $0x1a] sm:$0xf] }
 0x265   : > { %2419 = vrot.lane.b32.xlu1 %v2414_v23, %s3127_s19  ;;  %v1885_v5 = vadd.f32 %v5357_v52, %v1833_v35  ;;  %v1963_v13 = vadd.f32 %v4756_v21, %v1911_v15  ;;  %v1976_v22 = vadd.f32 %v1971_v16, %v1924_v32  ;;  %v1847_v58 = vadd.f32 %v5358_v53, %v1803_v1 }
 0x266   : > { %2417 = vrot.lane.b32.xlu0 %v2413_v63, %s3127_s19  ;;  %v1938_v18 = vadd.f32 %v5359_v24, %v1886_v39  ;;  %v2440_v63 = vmul.f32 %v4477_v11, %v2438_v26  ;;  %v1846_v38 = vadd.f32 %v5360_v55, %v1802_v51  ;;  %v2439_v16 = vmul.f32 %v4489_v43, %v2438_v26 }
 0x267   : > { %v2012_v23 = vpop.permute.xlu1 %2011  ;;  %v1937_v19 = vadd.f32 %v5361_v30, %v1885_v5  ;;  %v1899_v59 = vadd.f32 %v5362_v3, %v1847_v58  ;;  %v2023_v27 = vadd.f32 %v4726_v28, %v1977_v54  ;;  %v2451_v20 = vstv %s4815_s26  ;;  %v4886_v54 = vld [vmem:[%s3202_s5 + $0x14] sm:$0xff]  ;;  %s4965_s26 = sld [smem:[#allocation2 + $0xbe]] }
 0x268   : > { %v2016_v10 = vadd.f32 %v2012_v23, %v1964_v14  ;;  %v2010_v42 = vpop.permute.xlu0 %2009  ;;  %v1990_v50 = vadd.f32 %v1986_v37, %v1938_v18  ;;  %v1898_v29 = vadd.f32 %v5363_v31, %v1846_v38  ;;  %v2025_v33 = vmul.f32 %v3073_v44, %v2024_v47 }
 0x269   : > { %v2015_v21 = vadd.f32 %v2010_v42, %v1963_v13  ;;  %2432 = vrot.lane.b32.xlu1 %v2427_v8, %s3128_s24  ;;  %v1989_v41 = vadd.f32 %v1984_v34, %v1937_v19  ;;  %v2022_v8 = vadd.f32 %v4729_v60, %v1976_v22  ;;  %v1951_v37 = vadd.f32 %v4717_v6, %v1899_v59 }
 0x26a   : > { %2430 = vrot.lane.b32.xlu0 %v2426_v48, %s3128_s24  ;;  %v1950_v28 = vadd.f32 %v4723_v2, %v1898_v29  ;;  %v2453_v34 = vmul.f32 %v4477_v11, %v2451_v20  ;;  %v2031_v60 = vmul.f32 %v3074_v57, %v2029_v12  ;;  %v2028_v47 = vadd.f32 %v4781_v17, %v1990_v50 }
 0x26b   : > { %v2047_v56 = vpop.permute.xlu1 %2046  ;;  %v2003_v0 = vadd.f32 %v1999_v45, %v1951_v37  ;;  %v2452_v6 = vmul.f32 %v4489_v43, %v2451_v20  ;;  %v2464_v9 = vstv %s4834_s27  ;;  %v2027_v46 = vadd.f32 %v2025_v33, %v1989_v41  ;;  %s5015_s27 = sld [smem:[#allocation2 + $0xc3]] }
 0x26c   : > { %v2051_v40 = vadd.f32 %v2047_v56, %v2023_v27  ;;  %v2045_v4 = vpop.permute.xlu0 %2044  ;;  %v2002_v2 = vadd.f32 %v1997_v49, %v1950_v28  ;;  %v2030_v35 = vmul.f32 %v3073_v44, %v2029_v12  ;;  %v2034_v15 = vstv %s4839_s28  ;;  %v4880_v49 = vld [vmem:[%s3202_s5 + $0x1c] sm:$0xf]  ;;  %s3031_s28 = sshll.u32 %s5365_s13, 6 }
 0x26d   : > { %v2050_v36 = vadd.f32 %v2045_v4, %v2022_v8  ;;  %2445 = vrot.lane.b32.xlu1 %v2440_v63, %s3128_s24  ;;  %v2466_v17 = vmul.f32 %v4477_v11, %v2464_v9  ;;  %v2033_v26 = vadd.f32 %v2031_v60, %v2003_v0  ;;  %v2465_v62 = vmul.f32 %v4489_v43, %v2464_v9 }
 0x26e   : > { %2443 = vrot.lane.b32.xlu0 %v2439_v16, %s3128_s24  ;;  %v2036_v1 = vmul.f32 %v3074_v57, %v2034_v15  ;;  %v2499_v25 = vstv %s4852_s29  ;;  %v2032_v39 = vadd.f32 %v2030_v35, %v2002_v2  ;;  %v2035_v14 = vmul.f32 %v3073_v44, %v2034_v15 }
 0x26f   : > { %v2060_v48 = vpop.permute.xlu1 %2059  ;;  %v2501_v5 = vmul.f32 %v4880_v49, %v2499_v25  ;;  %v2500_v22 = vmul.f32 %v4886_v54, %v2499_v25  ;;  %v2512_v23 = vstv %s4870_s30  ;;  %v2525_v38 = vstv %s4883_s4  ;;  %s5030_s4 = scalar_lea.vmem %s5066_s3, %s3031_s28 }
 0x270   : > { %v2064_v61 = vadd.f32 %v2060_v48, %v2028_v47  ;;  %v2058_v45 = vpop.permute.xlu0 %2057  ;;  %v2038_v13 = vadd.f32 %v2036_v1, %v2016_v10  ;;  %v2037_v58 = vadd.f32 %v2035_v14, %v2015_v21  ;;  %v2514_v63 = vmul.f32 %v4880_v49, %v2512_v23 }
 0x271   : > { %v2063_v32 = vadd.f32 %v2058_v45, %v2027_v46  ;;  %2458 = vrot.lane.b32.xlu1 %v2453_v34, %s3128_s24  ;;  %v2513_v55 = vmul.f32 %v4886_v54, %v2512_v23  ;;  %v2527_v21 = vmul.f32 %v4880_v49, %v2525_v38  ;;  %v2526_v3 = vmul.f32 %v4886_v54, %v2525_v38 }
 0x272   : > { %2456 = vrot.lane.b32.xlu0 %v2452_v6, %s3128_s24  ;;  %v2538_v59 = vstv %s3005_s6  ;;  %v2551_v56 = vstv %s2856_s8  ;;  %v2564_v28 = vstv %s2906_s9 }
 0x273   : > { %v2073_v12 = vpop.permute.xlu1 %2072  ;;  %v2540_v29 = vmul.f32 %v4880_v49, %v2538_v59  ;;  %v2539_v41 = vmul.f32 %v4886_v54, %v2538_v59  ;;  %v2552_v4 = vmul.f32 %v4886_v54, %v2551_v56  ;;  %v2566_v0 = vmul.f32 %v4880_v49, %v2564_v28 }
 0x274   : > { %v2077_v7 = vadd.f32 %v2073_v12, %v2033_v26  ;;  %v2071_v51 = vpop.permute.xlu0 %2070  ;;  %v2565_v47 = vmul.f32 %v4886_v54, %v2564_v28  ;;  %v2577_v6 = vstv %s2956_s10  ;;  %v2603_v25 = vstv %s2857_s15 }
 0x275   : > { %v2076_v52 = vadd.f32 %v2071_v51, %v2032_v39  ;;  %2471 = vrot.lane.b32.xlu1 %v2466_v17, %s3128_s24  ;;  %v2579_v35 = vmul.f32 %v4880_v49, %v2577_v6  ;;  %v2578_v15 = vmul.f32 %v4886_v54, %v2577_v6  ;;  %v2605_v51 = vmul.f32 %v4880_v49, %v2603_v25 }
 0x276   : > { %2469 = vrot.lane.b32.xlu0 %v2465_v62, %s3128_s24 }
 0x277   : > { %v2086_v53 = vpop.permute.xlu1 %2085 }
 0x278   : > { %v2090_v24 = vadd.f32 %v2086_v53, %v2038_v13  ;;  %v2084_v18 = vpop.permute.xlu0 %2083 }
 0x279   : > { %v2089_v42 = vadd.f32 %v2084_v18, %v2037_v58  ;;  %2506 = vrot.lane.b32.xlu1 %v2501_v5, %s3125_s7  ;;  %v2629_v18 = vstv %s2957_s16 }
 0x27a   : > { %2504 = vrot.lane.b32.xlu0 %v2500_v22, %s3125_s7 }
 0x27b   : > { %v2099_v10 = vpop.permute.xlu1 %2098 }
 0x27c   : > { %v2103_v30 = vadd.f32 %v2099_v10, %v2051_v40  ;;  %v2097_v19 = vpop.permute.xlu0 %2096  ;;  %v2553_v40 = vmul.f32 %v4880_v49, %v2551_v56  ;;  %v2631_v10 = vmul.f32 %v4880_v49, %v2629_v18 }
 0x27d   : > { %v2102_v16 = vadd.f32 %v2097_v19, %v2050_v36  ;;  %2519 = vrot.lane.b32.xlu1 %v2514_v63, %s3125_s7  ;;  %v2642_v19 = vstv %s4926_s17 }
 0x27e   : > { %2517 = vrot.lane.b32.xlu0 %v2513_v55, %s3125_s7 }
 0x27f   : > { %v2112_v50 = vpop.permute.xlu1 %2111 }
 0x280   : > { %v2116_v27 = vadd.f32 %v2112_v50, %v2064_v61  ;;  %v2110_v20 = vpop.permute.xlu0 %2109  ;;  %v2590_v61 = vstv %s3006_s11  ;;  %v2644_v50 = vmul.f32 %v4880_v49, %v2642_v19 }
 0x281   : > { %v2115_v31 = vadd.f32 %v2110_v20, %v2063_v32  ;;  %2532 = vrot.lane.b32.xlu1 %v2527_v21, %s3125_s7  ;;  %v2592_v62 = vmul.f32 %v4880_v49, %v2590_v61  ;;  %v2591_v1 = vmul.f32 %v4886_v54, %v2590_v61 }
 0x282   : > { %2530 = vrot.lane.b32.xlu0 %v2526_v3, %s3125_s7 }
 0x283   : > { %v2125_v8 = vpop.permute.xlu1 %2124 }
 0x284   : > { %v2129_v44 = vadd.f32 %v2125_v8, %v2077_v7  ;;  %v2123_v33 = vpop.permute.xlu0 %2122 }
 0x285   : > { %v2128_v37 = vadd.f32 %v2123_v33, %v2076_v52  ;;  %2545 = vrot.lane.b32.xlu1 %v2540_v29, %s3125_s7  ;;  %v2604_v52 = vmul.f32 %v4886_v54, %v2603_v25  ;;  %v2249_v29 = vstv %s4934_s18  ;;  %v2694_v25 = vstv %s4961_s25 }
 0x286   : > { %2543 = vrot.lane.b32.xlu0 %v2539_v41, %s3125_s7  ;;  %s2907_s7 = sld [smem:[#allocation2 + $0x62]]  ;;  %v2250_v28 = vmul.f32 %v4489_v43, %v2249_v29 }
 0x287   : > { %v2138_v36 = vpop.permute.xlu1 %2137 }
 0x288   : > { %v2142_v34 = vadd.f32 %v2138_v36, %v2090_v24  ;;  %v2136_v57 = vpop.permute.xlu0 %2135  ;;  %v2254_v36 = vstv %s4943_s21 }
 0x289   : > { %v2141_v60 = vadd.f32 %v2136_v57, %v2089_v42  ;;  %2558 = vrot.lane.b32.xlu1 %v2553_v40, %s3126_s14  ;;  %v2668_v40 = vstv %s4941_s20 }
 0x28a   : > { %2556 = vrot.lane.b32.xlu0 %v2552_v4, %s3126_s14  ;;  %v2669_v6 = vmul.f32 %v4886_v54, %v2668_v40 }
 0x28b   : > { %v2151_v9 = vpop.permute.xlu1 %2150 }
 0x28c   : > { %v2155_v2 = vadd.f32 %v2151_v9, %v2103_v30  ;;  %v2149_v48 = vpop.permute.xlu0 %2148  ;;  %v2616_v5 = vstv %s2907_s7  ;;  %v2630_v30 = vmul.f32 %v4886_v54, %v2629_v18  ;;  %v2256_v9 = vmul.f32 %v4477_v11, %v2254_v36  ;;  %v3076_v18 = vld [vmem:[%s3202_s5 + $0x13] sm:$0xff] }
 0x28d   : > { %v2154_v46 = vadd.f32 %v2149_v48, %v2102_v16  ;;  %2571 = vrot.lane.b32.xlu1 %v2566_v0, %s3126_s14  ;;  %v2618_v58 = vmul.f32 %v4880_v49, %v2616_v5  ;;  %v2617_v24 = vmul.f32 %v4886_v54, %v2616_v5  ;;  %v2670_v0 = vmul.f32 %v4880_v49, %v2668_v40 }
 0x28e   : > { %2569 = vrot.lane.b32.xlu0 %v2565_v47, %s3126_s14 }
 0x28f   : > { %v2164_v45 = vpop.permute.xlu1 %2163 }
 0x290   : > { %v2168_v32 = vadd.f32 %v2164_v45, %v2116_v27  ;;  %v2162_v17 = vpop.permute.xlu0 %2161  ;;  %v2643_v27 = vmul.f32 %v4886_v54, %v2642_v19 }
 0x291   : > { %v2167_v26 = vadd.f32 %v2162_v17, %v2115_v31  ;;  %2584 = vrot.lane.b32.xlu1 %v2579_v35, %s3126_s14  ;;  %v2255_v35 = vmul.f32 %v4489_v43, %v2254_v36 }
 0x292   : > { %2582 = vrot.lane.b32.xlu0 %v2578_v15, %s3126_s14  ;;  %v2259_v15 = vstv %s4953_s23 }
 0x293   : > { %v2177_v12 = vpop.permute.xlu1 %2176 }
 0x294   : > { %v2181_v39 = vadd.f32 %v2177_v12, %v2129_v44  ;;  %v2175_v14 = vpop.permute.xlu0 %2174 }
 0x295   : > { %v2180_v7 = vadd.f32 %v2175_v14, %v2128_v37  ;;  %2597 = vrot.lane.b32.xlu1 %v2592_v62, %s3126_s14  ;;  %v2251_v37 = vmul.f32 %v4477_v11, %v2249_v29  ;;  %v2260_v14 = vmul.f32 %v4489_v43, %v2259_v15 }
 0x296   : > { %2595 = vrot.lane.b32.xlu0 %v2591_v1, %s3126_s14  ;;  %s4932_s14 = sld [smem:[#allocation2 + $0x31]]  ;;  %v2261_v1 = vmul.f32 %v4477_v11, %v2259_v15  ;;  %v3075_v11 = vld [vmem:[%s3202_s5 + $0x1b] sm:$0xf] }
 0x297   : > { %v2190_v13 = vpop.permute.xlu1 %2189  ;;  %s2854_s5 = sld [smem:[#allocation2 + $0x2d]] }
 0x298   : > { %v2194_v22 = vadd.f32 %v2190_v13, %v2142_v34  ;;  %v2188_v23 = vpop.permute.xlu0 %2187  ;;  %v2696_v13 = vmul.f32 %v4880_v49, %v2694_v25 }
 0x299   : > { %v2193_v53 = vadd.f32 %v2188_v23, %v2141_v60  ;;  %2610 = vrot.lane.b32.xlu1 %v2605_v51, %s3127_s19  ;;  %v2695_v23 = vmul.f32 %v4886_v54, %v2694_v25 }
 0x29a   : > { %2608 = vrot.lane.b32.xlu0 %v2604_v52, %s3127_s19 }
 0x29b   : > { %v2203_v42 = vpop.permute.xlu1 %2202 }
 0x29c   : > { %v2207_v63 = vadd.f32 %v2203_v42, %v2155_v2  ;;  %v2201_v55 = vpop.permute.xlu0 %2200  ;;  %v2655_v20 = vstv %s4932_s14  ;;  %v2681_v2 = vstv %s4950_s22 }
 0x29d   : > { %v2206_v38 = vadd.f32 %v2201_v55, %v2154_v46  ;;  %2623 = vrot.lane.b32.xlu1 %v2618_v58, %s3127_s19  ;;  %v2657_v44 = vmul.f32 %v4880_v49, %v2655_v20  ;;  %v2656_v33 = vmul.f32 %v4886_v54, %v2655_v20  ;;  %v2683_v17 = vmul.f32 %v4880_v49, %v2681_v2 }
 0x29e   : > { %2621 = vrot.lane.b32.xlu0 %v2617_v24, %s3127_s19  ;;  %v2253_v47 = vadd.f32 %v2251_v37, %v2207_v63  ;;  %v2682_v62 = vmul.f32 %v4886_v54, %v2681_v2 }
 0x29f   : > { %v2216_v16 = vpop.permute.xlu1 %2215  ;;  %v2252_v46 = vadd.f32 %v2250_v28, %v2206_v38 }
 0x2a0   : > { %v2220_v21 = vadd.f32 %v2216_v16, %v2168_v32  ;;  %v2214_v3 = vpop.permute.xlu0 %2213 }
 0x2a1   : > { %v2219_v59 = vadd.f32 %v2214_v3, %v2167_v26  ;;  %2636 = vrot.lane.b32.xlu1 %v2631_v10, %s3127_s19 }
 0x2a2   : > { %2634 = vrot.lane.b32.xlu0 %v2630_v30, %s3127_s19  ;;  %v2258_v26 = vadd.f32 %v2256_v9, %v2220_v21 }
 0x2a3   : > { %v2229_v31 = vpop.permute.xlu1 %2228 }
 0x2a4   : > { %v2233_v41 = vadd.f32 %v2229_v31, %v2181_v39  ;;  %v2227_v56 = vpop.permute.xlu0 %2226  ;;  %v2257_v39 = vadd.f32 %v2255_v35, %v2219_v59 }
 0x2a5   : > { %v2232_v8 = vadd.f32 %v2227_v56, %v2180_v7  ;;  %2649 = vrot.lane.b32.xlu1 %v2644_v50, %s3127_s19  ;;  %v2264_v7 = vstv %s4965_s26 }
 0x2a6   : > { %2647 = vrot.lane.b32.xlu0 %v2643_v27, %s3127_s19  ;;  %v2265_v42 = vmul.f32 %v3076_v18, %v2264_v7  ;;  %s2904_s19 = sld [smem:[#allocation2 + $0x5f]] }
 0x2a7   : > { %v2242_v4 = vpop.permute.xlu1 %2241  ;;  %v2262_v24 = vadd.f32 %v2260_v14, %v2232_v8 }
 0x2a8   : > { %v2246_v34 = vadd.f32 %v2242_v4, %v2194_v22  ;;  %v2240_v57 = vpop.permute.xlu0 %2239  ;;  %v2263_v22 = vadd.f32 %v2261_v1, %v2233_v41 }
 0x2a9   : > { %v2245_v60 = vadd.f32 %v2240_v57, %v2193_v53  ;;  %2662 = vrot.lane.b32.xlu1 %v2657_v44, %s3128_s24  ;;  %v2266_v53 = vmul.f32 %v3075_v11, %v2264_v7 }
 0x2aa   : > { %2660 = vrot.lane.b32.xlu0 %v2656_v33, %s3128_s24 }
 0x2ab   : > { %v2277_v48 = vpop.permute.xlu1 %2276  ;;  %v2268_v38 = vadd.f32 %v2266_v53, %v2246_v34  ;;  %v2267_v30 = vadd.f32 %v2265_v42, %v2245_v60 }
 0x2ac   : > { %v2281_v61 = vadd.f32 %v2277_v48, %v2253_v47  ;;  %v2275_v45 = vpop.permute.xlu0 %2274 }
 0x2ad   : > { %v2280_v32 = vadd.f32 %v2275_v45, %v2252_v46  ;;  %2675 = vrot.lane.b32.xlu1 %v2670_v0, %s3128_s24 }
 0x2ae   : > { %2673 = vrot.lane.b32.xlu0 %v2669_v6, %s3128_s24 }
 0x2af   : > { %v2290_v12 = vpop.permute.xlu1 %2289 }
 0x2b0   : > { %v2294_v51 = vadd.f32 %v2290_v12, %v2258_v26  ;;  %v2288_v52 = vpop.permute.xlu0 %2287 }
 0x2b1   : > { %v2293_v5 = vadd.f32 %v2288_v52, %v2257_v39  ;;  %2688 = vrot.lane.b32.xlu1 %v2683_v17, %s3128_s24 }
 0x2b2   : > { %2686 = vrot.lane.b32.xlu0 %v2682_v62, %s3128_s24 }
 0x2b3   : > { %v2303_v58 = vpop.permute.xlu1 %2302 }
 0x2b4   : > { %v2307_v43 = vadd.f32 %v2303_v58, %v2263_v22  ;;  %v2301_v63 = vpop.permute.xlu0 %2300 }
 0x2b5   : > { %v2306_v55 = vadd.f32 %v2301_v63, %v2262_v24  ;;  %2701 = vrot.lane.b32.xlu1 %v2696_v13, %s3128_s24 }
 0x2b6   : > { %2699 = vrot.lane.b32.xlu0 %v2695_v23, %s3128_s24  ;;  %s2954_s24 = sld [smem:[#allocation2 + $0x91]] }
 0x2b7   : > { %v2316_v10 = vpop.permute.xlu1 %2315 }
 0x2b8   : > { %v2320_v19 = vadd.f32 %v2316_v10, %v2268_v38  ;;  %v2314_v16 = vpop.permute.xlu0 %2313 }
 0x2b9   : > { %v2319_v21 = vadd.f32 %v2314_v16, %v2267_v30  ;;  %v2479_v30 = vstv %s2854_s5 }
 0x2bb   : > { %v2329_v3 = vpop.permute.xlu1 %2328 }
 0x2bc   : > { %v2333_v59 = vadd.f32 %v2329_v3, %v2281_v61  ;;  %v2327_v50 = vpop.permute.xlu0 %2326 }
 0x2bd   : > { %v2332_v27 = vadd.f32 %v2327_v50, %v2280_v32  ;;  %v2480_v50 = vmul.f32 %v4886_v54, %v2479_v30 }
 0x2bf   : > { %v2342_v20 = vpop.permute.xlu1 %2341 }
 0x2c0   : > { %v2346_v31 = vadd.f32 %v2342_v20, %v2294_v51  ;;  %v2340_v29 = vpop.permute.xlu0 %2339 }
 0x2c1   : > { %v2345_v41 = vadd.f32 %v2340_v29, %v2293_v5 }
 0x2c3   : > { %v2355_v56 = vpop.permute.xlu1 %2354 }
 0x2c4   : > { %v2359_v8 = vadd.f32 %v2355_v56, %v2307_v43  ;;  %v2353_v44 = vpop.permute.xlu0 %2352 }
 0x2c5   : > { %v2358_v33 = vadd.f32 %v2353_v44, %v2306_v55 }
 0x2c7   : > { %v2368_v37 = vpop.permute.xlu1 %2367 }
 0x2c8   : > { %v2372_v40 = vadd.f32 %v2368_v37, %v2320_v19  ;;  %v2366_v4 = vpop.permute.xlu0 %2365  ;;  %v2489_v37 = vstv %s2954_s24 }
 0x2c9   : > { %v2371_v28 = vadd.f32 %v2366_v4, %v2319_v21  ;;  %v2481_v21 = vmul.f32 %v4880_v49, %v2479_v30 }
 0x2cb   : > { %v2381_v36 = vpop.permute.xlu1 %2380 }
 0x2cc   : > { %v2385_v34 = vadd.f32 %v2381_v36, %v2333_v59  ;;  %v2379_v57 = vpop.permute.xlu0 %2378 }
 0x2cd   : > { %v2384_v60 = vadd.f32 %v2379_v57, %v2332_v27  ;;  %v2484_v27 = vstv %s2904_s19 }
 0x2cf   : > { %v2394_v0 = vpop.permute.xlu1 %2393 }
 0x2d0   : > { %v2398_v47 = vadd.f32 %v2394_v0, %v2346_v31  ;;  %v2392_v6 = vpop.permute.xlu0 %2391 }
 0x2d1   : > { %v2397_v9 = vadd.f32 %v2392_v6, %v2345_v41  ;;  %v2486_v41 = vmul.f32 %v4880_v49, %v2484_v27 }
 0x2d3   : > { %v2407_v2 = vpop.permute.xlu1 %2406 }
 0x2d4   : > { %v2411_v48 = vadd.f32 %v2407_v2, %v2359_v8  ;;  %v2405_v46 = vpop.permute.xlu0 %2404 }
 0x2d5   : > { %v2410_v35 = vadd.f32 %v2405_v46, %v2358_v33  ;;  %v2485_v33 = vmul.f32 %v4886_v54, %v2484_v27  ;;  %v2490_v46 = vmul.f32 %v4886_v54, %v2489_v37 }
 0x2d7   : > { %v2420_v15 = vpop.permute.xlu1 %2419 }
 0x2d8   : > { %v4991_v61 = vadd.f32 %v2420_v15, %v2372_v40  ;;  %v2418_v45 = vpop.permute.xlu0 %2417 }
 0x2d9   : > { %v4993_v32 = vadd.f32 %v2418_v45, %v2371_v28  ;;  %v2494_v28 = vstv %s5015_s27 }
 0x2da   : > { %v2496_v45 = vmul.f32 %v4880_v49, %v2494_v28 }
 0x2db   : > { %v2433_v17 = vpop.permute.xlu1 %2432 }
 0x2dc   : > { %v2431_v26 = vpop.permute.xlu0 %2430  ;;  %v2437_v16 = vadd.f32 %v2433_v17, %v2385_v34  ;;  %v2495_v17 = vmul.f32 %v4886_v54, %v2494_v28 }
 0x2dd   : > { %v2436_v59 = vadd.f32 %v2431_v26, %v2384_v60  ;;  %v2491_v60 = vmul.f32 %v4880_v49, %v2489_v37 }
 0x2de   : > { %v2483_v29 = vadd.f32 %v2481_v21, %v2437_v16 }
 0x2df   : > { %v2446_v62 = vpop.permute.xlu1 %2445  ;;  %v2482_v44 = vadd.f32 %v2480_v50, %v2436_v59 }
 0x2e0   : > { %v2444_v1 = vpop.permute.xlu0 %2443  ;;  %v2450_v31 = vadd.f32 %v2446_v62, %v2398_v47 }
 0x2e1   : > { %v2449_v8 = vadd.f32 %v2444_v1, %v2397_v9 }
 0x2e2   : > { %v2488_v57 = vadd.f32 %v2486_v41, %v2450_v31 }
 0x2e3   : > { %v2459_v25 = vpop.permute.xlu1 %2458  ;;  %v2487_v2 = vadd.f32 %v2485_v33, %v2449_v8 }
 0x2e4   : > { %v2457_v12 = vpop.permute.xlu0 %2456  ;;  %v2463_v34 = vadd.f32 %v2459_v25, %v2411_v48 }
 0x2e5   : > { %v2462_v6 = vadd.f32 %v2457_v12, %v2410_v35 }
 0x2e6   : > { %v2493_v25 = vadd.f32 %v2491_v60, %v2463_v34 }
 0x2e7   : > { %v4995_v39 = vpop.permute.xlu1 %2471 }
 0x2e8   : > { %v4997_v14 = vpop.permute.xlu0 %2469  ;;  %v2476_v35 = vadd.f32 %v4995_v39, %v4991_v61 }
 0x2eb   : > { %v2507_v7 = vpop.permute.xlu1 %2506 }
 0x2ec   : > { %v2505_v51 = vpop.permute.xlu0 %2504  ;;  %v2511_v40 = vadd.f32 %v2507_v7, %v2483_v29  ;;  %v2475_v7 = vadd.f32 %v4997_v14, %v4993_v32 }
 0x2ed   : > { %v2510_v4 = vadd.f32 %v2505_v51, %v2482_v44  ;;  %v2492_v51 = vadd.f32 %v2490_v46, %v2462_v6 }
 0x2ef   : > { %v2520_v52 = vpop.permute.xlu1 %2519 }
 0x2f0   : > { %v2518_v5 = vpop.permute.xlu0 %2517  ;;  %v2524_v15 = vadd.f32 %v2520_v52, %v2488_v57 }
 0x2f1   : > { %v2523_v62 = vadd.f32 %v2518_v5, %v2487_v2 }
 0x2f3   : > { %v4999_v13 = vpop.permute.xlu1 %2532 }
 0x2f4   : > { %v5001_v22 = vpop.permute.xlu0 %2530 }
 0x2f7   : > { %v5003_v23 = vpop.permute.xlu1 %2545 }
 0x2f8   : > { %v5005_v11 = vpop.permute.xlu0 %2543 }
 0x2fb   : > { %v2559_v53 = vpop.permute.xlu1 %2558 }
 0x2fc   : > { %v2557_v58 = vpop.permute.xlu0 %2556  ;;  %v2563_v0 = vadd.f32 %v2559_v53, %v2511_v40  ;;  %v2537_v53 = vadd.f32 %v4999_v13, %v2493_v25 }
 0x2fd   : > { %v2562_v9 = vadd.f32 %v2557_v58, %v2510_v4 }
 0x2ff   : > { %v2572_v24 = vpop.permute.xlu1 %2571 }
 0x300   : > { %v2570_v18 = vpop.permute.xlu0 %2569  ;;  %v2576_v49 = vadd.f32 %v2572_v24, %v2524_v15  ;;  %v2498_v24 = vadd.f32 %v2496_v45, %v2476_v35 }
 0x301   : > { %v2575_v52 = vadd.f32 %v2570_v18, %v2523_v62  ;;  %v2497_v18 = vadd.f32 %v2495_v17, %v2475_v7 }
 0x303   : > { %v5007_v42 = vpop.permute.xlu1 %2584 }
 0x304   : > { %v5009_v43 = vpop.permute.xlu0 %2582 }
 0x307   : > { %v5011_v63 = vpop.permute.xlu1 %2597 }
 0x308   : > { %v5013_v55 = vpop.permute.xlu0 %2595 }
 0x30b   : > { %v2611_v38 = vpop.permute.xlu1 %2610 }
 0x30c   : > { %v2609_v10 = vpop.permute.xlu0 %2608  ;;  %v2615_v26 = vadd.f32 %v2611_v38, %v2563_v0  ;;  %v2536_v38 = vadd.f32 %v5001_v22, %v2492_v51  ;;  %v2549_v22 = vadd.f32 %v5005_v11, %v2497_v18 }
 0x30d   : > { %v2614_v1 = vadd.f32 %v2609_v10, %v2562_v9  ;;  %v2589_v10 = vadd.f32 %v5007_v42, %v2537_v53 }
 0x30e   : > { %v2588_v13 = vadd.f32 %v5009_v43, %v2536_v38  ;;  %v2601_v43 = vadd.f32 %v5013_v55, %v2549_v22 }
 0x30f   : > { %v2624_v19 = vpop.permute.xlu1 %2623 }
 0x310   : > { %v2622_v3 = vpop.permute.xlu0 %2621  ;;  %v2628_v58 = vadd.f32 %v2624_v19, %v2576_v49  ;;  %v2550_v19 = vadd.f32 %v5003_v23, %v2498_v24 }
 0x311   : > { %v2627_v61 = vadd.f32 %v2622_v3, %v2575_v52 }
 0x312   : > { %v2602_v3 = vadd.f32 %v5011_v63, %v2550_v19 }
 0x313   : > { %v2637_v20 = vpop.permute.xlu1 %2636 }
 0x314   : > { %v2635_v56 = vpop.permute.xlu0 %2634  ;;  %v2641_v16 = vadd.f32 %v2637_v20, %v2589_v10 }
 0x315   : > { %v2640_v21 = vadd.f32 %v2635_v56, %v2588_v13 }
 0x317   : > { %v2650_v36 = vpop.permute.xlu1 %2649 }
 0x318   : > { %v2648_v47 = vpop.permute.xlu0 %2647  ;;  %v2654_v31 = vadd.f32 %v2650_v36, %v2602_v3 }
 0x319   : > { %v2653_v23 = vadd.f32 %v2648_v47, %v2601_v43 }
 0x31b   : > { %v2663_v48 = vpop.permute.xlu1 %2662 }
 0x31c   : > { %v2667_v12 = vadd.f32 %v2663_v48, %v2615_v26  ;;  %v2661_v54 = vpop.permute.xlu0 %2660 }
 0x31d   : > { %v2666_v5 = vadd.f32 %v2661_v54, %v2614_v1 }
 0x31e   : > { %2710 = vst.msk [vmem:[%s5030_s4 + $0x8] sm:$0xf] %vm2709_vm0, %v2667_v12 }
 0x31f   : > { %2708 = vst.msk [vmem:[%s5030_s4] sm:$0xff] %vm2707_vm1, %v2666_v5  ;;  %v2676_v39 = vpop.permute.xlu1 %2675 }
 0x320   : > { %v2680_v32 = vadd.f32 %v2676_v39, %v2628_v58  ;;  %v2674_v14 = vpop.permute.xlu0 %2673 }
 0x321   : > { %v2679_v30 = vadd.f32 %v2674_v14, %v2627_v61 }
 0x322   : > { %3023 = vst.msk [vmem:[%s5030_s4 + $0x18] sm:$0xf] %vm2709_vm0, %v2680_v32 }
 0x323   : > { %3022 = vst.msk [vmem:[%s5030_s4 + $0x10] sm:$0xff] %vm2707_vm1, %v2679_v30  ;;  %v2689_v42 = vpop.permute.xlu1 %2688 }
 0x324   : > { %v2693_v59 = vadd.f32 %v2689_v42, %v2641_v16  ;;  %v2687_v50 = vpop.permute.xlu0 %2686 }
 0x325   : > { %v2692_v27 = vadd.f32 %v2687_v50, %v2640_v21 }
 0x326   : > { %3025 = vst.msk [vmem:[%s5030_s4 + $0x28] sm:$0xf] %vm2709_vm0, %v2693_v59 }
 0x327   : > { %3024 = vst.msk [vmem:[%s5030_s4 + $0x20] sm:$0xff] %vm2707_vm1, %v2692_v27  ;;  %v2702_v11 = vpop.permute.xlu1 %2701 }
 0x328   : > { %v2706_v20 = vadd.f32 %v2702_v11, %v2654_v31  ;;  %v2700_v29 = vpop.permute.xlu0 %2699 }
 0x329   : > { %v2705_v41 = vadd.f32 %v2700_v29, %v2653_v23 }
 0x32a   : > { %3027 = vst.msk [vmem:[%s5030_s4 + $0x38] sm:$0xf] %vm2709_vm0, %v2706_v20 }
 0x32b   : > { %3026 = vst.msk [vmem:[%s5030_s4 + $0x30] sm:$0xff] %vm2707_vm1, %v2705_v41 }
 0x32c PF: > { %s15_s12 = sadd.s32 1, %s3121_s12  }
 0x32d   : > { %p12_p5 = scmp.ge.s32.totalorder %s15_s12, 4  }
 0x32f   :  { %14 = sbr.rel (!%p12_p5) target bundleno = 2 (0x2), region = 75 }
 0x334   :  { %2741 = vsyncpa [#allocation3], 1 }
 0x335   :  { %2743 = vsyncpa [#allocation3 + $0x1], 1 }
 0x336   :  { %2744 = vsyncpa [#allocation5], 1 }

</bundles_post_ra>
